<compile_context>
chip_gen: v6e
topology: v6e:2x2x1
jax: 0.10.0
libtpu: 0.0.40
codegen_flags: <defaults>
</compile_context>

<pallas_src>
import math
from functools import partial

import jax
import jax.numpy as jnp
from jax.experimental import pallas as pl
from jax.experimental.pallas import tpu as pltpu

EPS_LN = 1e-5
EPS_BN = 1e-5
_F32 = jnp.float32
_BF16 = jnp.bfloat16
# Raises v5e's 16 MiB scoped default; comfortably under v7x's 64 MiB physical.
_VMEM_LIMIT = 32 * 1024 * 1024


# ----------------------------- in-kernel helpers -----------------------------

def _layernorm(x, g, b):
    mu = jnp.mean(x, axis=-1, keepdims=True)
    var = jnp.mean(jnp.square(x - mu), axis=-1, keepdims=True)
    return (x - mu) * jax.lax.rsqrt(var + EPS_LN) * g + b


def _sigmoid(x):
    # exp and (approx) reciprocal both land on the EUP slot, keeping VALU free.
    return pl.reciprocal(1.0 + jnp.exp(-x), approx=True)


def _swish(x):
    return x * _sigmoid(x)


# --------------------------------- kernels -----------------------------------

def ffn_kernel(x_ref, g_ref, b_ref, w1_ref, b1_ref, w2_ref, b2_ref, o_ref,
               *, res_factor):
    # out = x + res_factor * (Swish(LN(x) @ W1 + b1) @ W2 + b2)
    x = x_ref[...]
    h = _layernorm(x, g_ref[...], b_ref[...]).astype(_BF16)
    h = jnp.dot(h, w1_ref[...], preferred_element_type=_F32) + b1_ref[...]
    h = _swish(h).astype(_BF16)
    h = jnp.dot(h, w2_ref[...], preferred_element_type=_F32) + b2_ref[...]
    o_ref[...] = x + res_factor * h


def ffn_final_ln_kernel(x_ref, g_ref, b_ref, w1_ref, b1_ref, w2_ref, b2_ref,
                        fg_ref, fb_ref, o_ref, *, res_factor):
    # FFN #2 fused with the block's final LayerNorm (saves one HBM round trip).
    x = x_ref[...]
    h = _layernorm(x, g_ref[...], b_ref[...]).astype(_BF16)
    h = jnp.dot(h, w1_ref[...], preferred_element_type=_F32) + b1_ref[...]
    h = _swish(h).astype(_BF16)
    h = jnp.dot(h, w2_ref[...], preferred_element_type=_F32) + b2_ref[...]
    y = x + res_factor * h
    o_ref[...] = _layernorm(y, fg_ref[...], fb_ref[...])


def qkv_proj_kernel(x_ref, g_ref, b_ref, wq_ref, bq_ref, wk_ref, bk_ref,
                    wv_ref, bv_ref, q_ref, k_ref, v_ref):
    xn = _layernorm(x_ref[...], g_ref[...], b_ref[...]).astype(_BF16)
    q_ref[...] = (jnp.dot(xn, wq_ref[...], preferred_element_type=_F32)
                  + bq_ref[...]).astype(_BF16)
    k_ref[...] = (jnp.dot(xn, wk_ref[...], preferred_element_type=_F32)
                  + bk_ref[...]).astype(_BF16)
    v_ref[...] = (jnp.dot(xn, wv_ref[...], preferred_element_type=_F32)
                  + bv_ref[...]).astype(_BF16)


def attn_fused_kernel(q_ref, k_ref, v_ref, pos_ref, u_ref, xres_ref,
                      wo_ref, bo_ref, o_ref, *, num_heads, scale):
    # One batch element per grid step.  Per head: content scores, add the
    # (pre-shifted) positional scores, softmax, P.V, and accumulate the output
    # projection contribution -- the (S, S) score matrices never leave VMEM and
    # the output is written lane-dense in (S, D).
    S, D = q_ref.shape[1], q_ref.shape[2]
    Dh = D // num_heads
    q = q_ref[0]            # (S, D) bf16
    k = k_ref[0]
    v = v_ref[0]
    u = u_ref[...]          # (1, D) bf16

    acc = jnp.zeros((S, D), _F32)
    for h in range(num_heads):
        lo, hi = h * Dh, (h + 1) * Dh
        qh = q[:, lo:hi] + u[:, lo:hi]                                # (S, Dh)
        s = jnp.einsum('qd,kd->qk', qh, k[:, lo:hi],
                       preferred_element_type=_F32)                   # (S, S)
        s = (s + pos_ref[0, h]) * scale        # reference scales by 1/sqrt(d_model)
        s = s - jnp.max(s, axis=-1, keepdims=True)
        e = jnp.exp(s)
        p = e * pl.reciprocal(jnp.sum(e, axis=-1, keepdims=True), approx=True)
        ctx = jnp.dot(p.astype(_BF16), v[:, lo:hi],
                      preferred_element_type=_F32)                    # (S, Dh)
        acc = acc + jnp.dot(ctx.astype(_BF16), wo_ref[lo:hi, :],
                            preferred_element_type=_F32)              # (S, D)
    o_ref[0] = xres_ref[0] + acc + bo_ref[...]


def conv_module_kernel(x_ref, g_ref, b_ref, wa_ref, ba_ref, wb_ref, bb_ref,
                       dww_ref, dwb_ref, w2_ref, b2_ref, o_ref, pad_ref,
                       *, kernel_size):
    # Whole Conformer conv module for one batch element:
    # LN -> pointwise(2C) -> GLU -> depthwise(T) with folded BN -> Swish ->
    # pointwise -> residual.  The depthwise halo lives in a VMEM scratch.
    S = x_ref.shape[1]
    C = dww_ref.shape[1]
    K = kernel_size
    p = (K - 1) // 2

    x = x_ref[0]                                                      # (S, D) f32
    xn = _layernorm(x, g_ref[...], b_ref[...]).astype(_BF16)
    a = jnp.dot(xn, wa_ref[...], preferred_element_type=_F32) + ba_ref[...]
    gate = jnp.dot(xn, wb_ref[...], preferred_element_type=_F32) + bb_ref[...]
    glu = a * _sigmoid(gate)                                          # (S, C) f32

    # Zero-padded halo in VMEM (no host-side jnp.pad round trip through HBM).
    if p > 0:
        pad_ref[0:p, :] = jnp.zeros((p, C), _F32)
        pad_ref[p + S:p + S + p, :] = jnp.zeros((p, C), _F32)
    pad_ref[p:p + S, :] = glu

    # Depthwise conv along time; BatchNorm (running stats) folded into dww/dwb.
    acc = jnp.zeros((S, C), _F32)
    for kk in range(K):
        acc = acc + pad_ref[kk:kk + S, :] * dww_ref[kk:kk + 1, :]
    acc = acc + dwb_ref[...]
    y = _swish(acc).astype(_BF16)

    o_ref[0] = x + jnp.dot(y, w2_ref[...], preferred_element_type=_F32) + b2_ref[...]


# ------------------------------ call helpers ----------------------------------

def _row_tile(n):
    for t in (512, 256, 128, 64, 32, 16, 8):
        if n % t == 0:
            return t
    return n


def _cparams(n_axes=1):
    return pltpu.CompilerParams(
        dimension_semantics=("parallel",) * n_axes,
        vmem_limit_bytes=_VMEM_LIMIT)


def _row_spec(tm, d):
    return pl.BlockSpec((tm, d), lambda i: (i, 0))


def _const_spec(shape):
    return pl.BlockSpec(shape, lambda i: (0,) * len(shape))


def _ffn(x2, prm, *, res_factor, final_ln=None):
    N, D = x2.shape
    F = prm['w1'].shape[1]
    tm = _row_tile(N)
    in_specs = [_row_spec(tm, D),
                _const_spec((1, D)), _const_spec((1, D)),
                _const_spec((D, F)), _const_spec((1, F)),
                _const_spec((F, D)), _const_spec((1, D))]
    args = [x2, prm['ln_g'], prm['ln_b'], prm['w1'], prm['b1'], prm['w2'], prm['b2']]
    if final_ln is None:
        kern = partial(ffn_kernel, res_factor=res_factor)
    else:
        kern = partial(ffn_final_ln_kernel, res_factor=res_factor)
        in_specs += [_const_spec((1, D)), _const_spec((1, D))]
        args += [final_ln[0], final_ln[1]]
    return pl.pallas_call(
        kern,
        grid=(N // tm,),
        in_specs=in_specs,
        out_specs=_row_spec(tm, D),
        out_shape=jax.ShapeDtypeStruct((N, D), _F32),
        compiler_params=_cparams(),
    )(*args)


def _qkv_proj(x2, att):
    N, D = x2.shape
    tm = _row_tile(N)
    return pl.pallas_call(
        qkv_proj_kernel,
        grid=(N // tm,),
        in_specs=[_row_spec(tm, D),
                  _const_spec((1, D)), _const_spec((1, D)),
                  _const_spec((D, D)), _const_spec((1, D)),
                  _const_spec((D, D)), _const_spec((1, D)),
                  _const_spec((D, D)), _const_spec((1, D))],
        out_specs=[_row_spec(tm, D)] * 3,
        out_shape=[jax.ShapeDtypeStruct((N, D), _BF16)] * 3,
        compiler_params=_cparams(),
    )(x2, att['ln_g'], att['ln_b'], att['wq'], att['bq'],
      att['wk'], att['bk'], att['wv'], att['bv'])


def sinusoidal_pe(length, d_model):
    position = jnp.arange(length, dtype=_F32)[:, None]
    div_term = jnp.exp(jnp.arange(0, d_model, 2, dtype=_F32)
                       * (-math.log(10000.0) / d_model))
    pe = jnp.zeros((length, d_model), _F32)
    pe = pe.at[:, 0::2].set(jnp.sin(position * div_term))
    pe = pe.at[:, 1::2].set(jnp.cos(position * div_term))
    return pe


def _relative_shift(pos_score):
    # Exact Transformer-XL pad/reshape/slice shift (reference semantics).
    b, h, s1, s2 = pos_score.shape
    padded = jnp.pad(pos_score, ((0, 0), (0, 0), (0, 0), (1, 0)))
    padded = padded.reshape(b, h, s2 + 1, s1)
    return padded[:, :, 1:, :].reshape(b, h, s1, s2)


def _attention(x2, att, B, S, D, H):
    Dh = D // H
    q, k, v = _qkv_proj(x2, att)

    # TODO(synk): pe / pk depend only on (S, D); cache them outside the forward.
    pe = sinusoidal_pe(S, D)
    pk = jnp.dot(pe.astype(_BF16), att['wp'], preferred_element_type=_F32)   # no bias

    # Positional scores + exact relative shift kept in XLA glue to preserve the
    # reference pad/reshape/slice skew bit-for-bit.
    # TODO(synk): fold the skew into attn_fused_kernel to kill the (B,H,S,S) round trip.
    qv = q.reshape(B, S, H, Dh) + att['v_bias'].astype(_BF16)[None, None]
    pos_score = jnp.einsum('bqhd,khd->bhqk', qv,
                           pk.reshape(S, H, Dh).astype(_BF16),
                           preferred_element_type=_F32)
    pos_shift = _relative_shift(pos_score)

    blk = pl.BlockSpec((1, S, D), lambda b: (b, 0, 0))
    out = pl.pallas_call(
        partial(attn_fused_kernel, num_heads=H, scale=1.0 / math.sqrt(D)),
        grid=(B,),
        in_specs=[blk, blk, blk,
                  pl.BlockSpec((1, H, S, S), lambda b: (b, 0, 0, 0)),
                  _const_spec((1, D)),
                  blk,
                  _const_spec((D, D)),
                  _const_spec((1, D))],
        out_specs=pl.BlockSpec((1, S, D), lambda b: (b, 0, 0)),
        out_shape=jax.ShapeDtypeStruct((B, S, D), _F32),
        compiler_params=_cparams(),
    )(q.reshape(B, S, D), k.reshape(B, S, D), v.reshape(B, S, D),
      pos_shift, att['u_bias'].reshape(1, D).astype(_BF16),
      x2.reshape(B, S, D), att['wo'], att['bo'])
    return out.reshape(B * S, D)


def _conv_module(x2, cv, B, S, D):
    K = cv['dw_w_folded'].shape[0]
    C = cv['dw_w_folded'].shape[1]
    x3 = x2.reshape(B, S, D)
    out = pl.pallas_call(
        partial(conv_module_kernel, kernel_size=K),
        grid=(B,),
        in_specs=[pl.BlockSpec((1, S, D), lambda b: (b, 0, 0)),
                  _const_spec((1, D)), _const_spec((1, D)),
                  _const_spec((D, C)), _const_spec((1, C)),
                  _const_spec((D, C)), _const_spec((1, C)),
                  _const_spec((K, C)), _const_spec((1, C)),
                  _const_spec((C, D)), _const_spec((1, D))],
        out_specs=pl.BlockSpec((1, S, D), lambda b: (b, 0, 0)),
        out_shape=jax.ShapeDtypeStruct((B, S, D), _F32),
        scratch_shapes=[pltpu.VMEM((S + K - 1, C), _F32)],
        compiler_params=_cparams(),
    )(x3, cv['ln_g'], cv['ln_b'],
      cv['w_pw1_a'], cv['b_pw1_a'], cv['w_pw1_b'], cv['b_pw1_b'],
      cv['dw_w_folded'], cv['dw_b_folded'], cv['w_pw2'], cv['b_pw2'])
    return out.reshape(B * S, D)


# ------------------------- parameter preparation -------------------------------

def _prepare_params(params):
    """Cast matmul weights to bf16, split the GLU pointwise weight, fold BN."""
    bf = lambda a: a.astype(_BF16)

    def ffn(f):
        return dict(ln_g=f['ln_g'], ln_b=f['ln_b'],
                    w1=bf(f['w1']), b1=f['b1'], w2=bf(f['w2']), b2=f['b2'])

    att = params['attn']
    cv = params['conv']
    half = cv['w_pw1'].shape[1] // 2                       # GLU channels
    s = cv['bn_g'] / jnp.sqrt(cv['bn_rv'] + EPS_BN)        # (1, C)
    return dict(
        ffn1=ffn(params['ffn1']),
        ffn2=ffn(params['ffn2']),
        attn=dict(ln_g=att['ln_g'], ln_b=att['ln_b'],
                  wq=bf(att['wq']), bq=att['bq'],
                  wk=bf(att['wk']), bk=att['bk'],
                  wv=bf(att['wv']), bv=att['bv'],
                  wp=bf(att['wp']),
                  u_bias=att['u'], v_bias=att['v'],
                  wo=bf(att['wo']), bo=att['bo']),
        conv=dict(ln_g=cv['ln_g'], ln_b=cv['ln_b'],
                  w_pw1_a=bf(cv['w_pw1'][:, :half]), b_pw1_a=cv['b_pw1'][:, :half],
                  w_pw1_b=bf(cv['w_pw1'][:, half:]), b_pw1_b=cv['b_pw1'][:, half:],
                  dw_w_folded=cv['dw_w'] * s,
                  dw_b_folded=cv['bn_b'] + (cv['dw_b'] - cv['bn_rm']) * s,
                  w_pw2=bf(cv['w_pw2']), b_pw2=cv['b_pw2']),
        ln_g=params['ln_g'], ln_b=params['ln_b'],
    )


# --------------------------------- forward -------------------------------------

def conformer_block_forward(x, params, *, num_heads):
    B, S, D = x.shape
    p = _prepare_params(params)
    x2 = x.reshape(B * S, D).astype(_F32)

    x2 = _ffn(x2, p['ffn1'], res_factor=0.5)                       # FFN #1 (half-step)
    x2 = _attention(x2, p['attn'], B, S, D, num_heads)             # MHSA (rel. PE) + res
    x2 = _conv_module(x2, p['conv'], B, S, D)                      # conv module + res
    x2 = _ffn(x2, p['ffn2'], res_factor=0.5,
              final_ln=(p['ln_g'], p['ln_b']))                     # FFN #2 + final LN
    return x2.reshape(B, S, D)


# ----------------------------- parameter setup ----------------------------------

def init_params(key, D, H, ff_exp=4, conv_exp=2, conv_kernel=31):
    Dh = D // H
    Dff = D * ff_exp
    keys = iter(jax.random.split(key, 32))

    def w(shape, scale=0.02):
        return scale * jax.random.normal(next(keys), shape, jnp.float32)

    zeros = lambda s: jnp.zeros(s, jnp.float32)
    ones = lambda s: jnp.ones(s, jnp.float32)

    def ffn():
        return dict(ln_g=ones((1, D)), ln_b=zeros((1, D)),
                    w1=w((D, Dff)), b1=w((1, Dff)),
                    w2=w((Dff, D)), b2=w((1, D)))

    return dict(
        ffn1=ffn(),
        attn=dict(ln_g=ones((1, D)), ln_b=zeros((1, D)),
                  wq=w((D, D)), bq=w((1, D)),
                  wk=w((D, D)), bk=w((1, D)),
                  wv=w((D, D)), bv=w((1, D)),
                  wp=w((D, D)),                       # pos_proj (no bias)
                  u=w((H, Dh)), v=w((H, Dh)),
                  wo=w((D, D)), bo=w((1, D))),
        conv=dict(ln_g=ones((1, D)), ln_b=zeros((1, D)),
                  w_pw1=w((D, conv_exp * D)), b_pw1=w((1, conv_exp * D)),
                  dw_w=w((conv_kernel, D)), dw_b=zeros((1, D)),   # depthwise has bias=False
                  bn_g=ones((1, D)), bn_b=zeros((1, D)),
                  bn_rm=zeros((1, D)), bn_rv=ones((1, D)),
                  w_pw2=w((D, D)), b_pw2=w((1, D))),
        ffn2=ffn(),
        ln_g=ones((1, D)), ln_b=zeros((1, D)),
    )


if __name__ == "__main__":
    # small shapes consistent with the module: (batch, seq, encoder_dim), 4 heads
    B, S, D, H = 2, 16, 64, 4
    key = jax.random.PRNGKey(0)
    kx, kp = jax.random.split(key)
    x = jax.random.normal(kx, (B, S, D), jnp.float32)
    params = init_params(kp, D, H, ff_exp=4, conv_exp=2, conv_kernel=7)

    fwd = jax.jit(partial(conformer_block_forward, num_heads=H))
    out = jax.block_until_ready(fwd(x, params))
    assert out.shape == (B, S, D) and bool(jnp.all(jnp.isfinite(out)))
    print("KERNEL_OK")
</pallas_src>

<mosaic_0001>
module attributes {stable_mosaic.version = 11 : i64} {
  func.func @ffn_kernel(%arg0: i32, %arg1: memref<32x64xf32, #tpu.memory_space<vmem>>, %arg2: memref<1x64xf32, #tpu.memory_space<vmem>>, %arg3: memref<1x64xf32, #tpu.memory_space<vmem>>, %arg4: memref<64x256xbf16, #tpu.memory_space<vmem>>, %arg5: memref<1x256xf32, #tpu.memory_space<vmem>>, %arg6: memref<256x64xbf16, #tpu.memory_space<vmem>>, %arg7: memref<1x64xf32, #tpu.memory_space<vmem>>, %arg8: memref<32x64xf32, #tpu.memory_space<vmem>>) attributes {dimension_semantics = [#tpu.dimension_semantics<parallel>], iteration_bounds = array<i64: 1>, scalar_prefetch = 0 : i64, scratch_operands = 0 : i64, tpu.core_type = #tpu.core_type<tc>, window_params = [{transform_indices = @transform_0, window_bounds = array<i64: 32, 64>}, {pipeline_mode = #tpu.pipeline_mode<synchronous>, transform_indices = @transform_1, window_bounds = array<i64: 1, 64>}, {pipeline_mode = #tpu.pipeline_mode<synchronous>, transform_indices = @transform_2, window_bounds = array<i64: 1, 64>}, {pipeline_mode = #tpu.pipeline_mode<synchronous>, transform_indices = @transform_3, window_bounds = array<i64: 64, 256>}, {pipeline_mode = #tpu.pipeline_mode<synchronous>, transform_indices = @transform_4, window_bounds = array<i64: 1, 256>}, {pipeline_mode = #tpu.pipeline_mode<synchronous>, transform_indices = @transform_5, window_bounds = array<i64: 256, 64>}, {pipeline_mode = #tpu.pipeline_mode<synchronous>, transform_indices = @transform_6, window_bounds = array<i64: 1, 64>}, {transform_indices = @transform_7, window_bounds = array<i64: 32, 64>}]} {
    %c0 = arith.constant 0 : index
    %c0_0 = arith.constant 0 : index
    %0 = vector.load %arg1[%c0, %c0_0] : memref<32x64xf32, #tpu.memory_space<vmem>>, vector<32x64xf32>
    %c0_1 = arith.constant 0 : index
    %c0_2 = arith.constant 0 : index
    %1 = vector.load %arg2[%c0_1, %c0_2] : memref<1x64xf32, #tpu.memory_space<vmem>>, vector<1x64xf32>
    %c0_3 = arith.constant 0 : index
    %c0_4 = arith.constant 0 : index
    %2 = vector.load %arg3[%c0_3, %c0_4] : memref<1x64xf32, #tpu.memory_space<vmem>>, vector<1x64xf32>
    %cst = arith.constant dense<0.000000e+00> : vector<32xf32>
    %3 = vector.multi_reduction <add>, %0, %cst [1] : vector<32x64xf32> to vector<32xf32>
    %4 = vector.shape_cast %3 : vector<32xf32> to vector<32x1xf32>
    %cst_5 = arith.constant 6.400000e+01 : f32
    %5 = vector.broadcast %cst_5 : f32 to vector<32x1xf32>
    %6 = arith.divf %4, %5 : vector<32x1xf32>
    %7 = vector.broadcast %6 : vector<32x1xf32> to vector<32x64xf32>
    %8 = arith.subf %0, %7 : vector<32x64xf32>
    %9 = arith.mulf %8, %8 : vector<32x64xf32>
    %cst_6 = arith.constant dense<0.000000e+00> : vector<32xf32>
    %10 = vector.multi_reduction <add>, %9, %cst_6 [1] : vector<32x64xf32> to vector<32xf32>
    %11 = vector.shape_cast %10 : vector<32xf32> to vector<32x1xf32>
    %cst_7 = arith.constant 6.400000e+01 : f32
    %12 = vector.broadcast %cst_7 : f32 to vector<32x1xf32>
    %13 = arith.divf %11, %12 : vector<32x1xf32>
    %14 = vector.broadcast %6 : vector<32x1xf32> to vector<32x64xf32>
    %15 = arith.subf %0, %14 : vector<32x64xf32>
    %cst_8 = arith.constant 9.99999974E-6 : f32
    %16 = vector.broadcast %cst_8 : f32 to vector<32x1xf32>
    %17 = arith.addf %13, %16 : vector<32x1xf32>
    %18 = math.rsqrt %17 : vector<32x1xf32>
    %19 = vector.broadcast %18 : vector<32x1xf32> to vector<32x64xf32>
    %20 = arith.mulf %15, %19 : vector<32x64xf32>
    %21 = vector.broadcast %1 : vector<1x64xf32> to vector<32x64xf32>
    %22 = arith.mulf %20, %21 : vector<32x64xf32>
    %23 = vector.broadcast %2 : vector<1x64xf32> to vector<32x64xf32>
    %24 = arith.addf %22, %23 : vector<32x64xf32>
    %25 = arith.truncf %24 : vector<32x64xf32> to vector<32x64xbf16>
    %c0_9 = arith.constant 0 : index
    %c0_10 = arith.constant 0 : index
    %26 = vector.load %arg4[%c0_9, %c0_10] : memref<64x256xbf16, #tpu.memory_space<vmem>>, vector<64x256xbf16>
    %cst_11 = arith.constant dense<0.000000e+00> : vector<32x256xf32>
    %27 = tpu.matmul %25, %26, %cst_11 {dimension_numbers = #tpu.dot_dimension_numbers<[1], [0], [0], [1], [0, 0, 1, 1], [], []>} : vector<32x64xbf16>, vector<64x256xbf16>, vector<32x256xf32> -> vector<32x256xf32>
    %c0_12 = arith.constant 0 : index
    %c0_13 = arith.constant 0 : index
    %28 = vector.load %arg5[%c0_12, %c0_13] : memref<1x256xf32, #tpu.memory_space<vmem>>, vector<1x256xf32>
    %29 = vector.broadcast %28 : vector<1x256xf32> to vector<32x256xf32>
    %30 = arith.addf %27, %29 : vector<32x256xf32>
    %cst_14 = arith.constant 0.000000e+00 : f32
    %31 = vector.broadcast %cst_14 : f32 to vector<32x256xf32>
    %32 = arith.subf %31, %30 : vector<32x256xf32>
    %33 = math.exp %32 : vector<32x256xf32>
    %cst_15 = arith.constant 1.000000e+00 : f32
    %34 = vector.broadcast %cst_15 : f32 to vector<32x256xf32>
    %35 = arith.addf %34, %33 : vector<32x256xf32>
    %36 = tpu.reciprocal %35 {approx = true} : vector<32x256xf32> -> vector<32x256xf32>
    %37 = arith.mulf %30, %36 : vector<32x256xf32>
    %38 = arith.truncf %37 : vector<32x256xf32> to vector<32x256xbf16>
    %c0_16 = arith.constant 0 : index
    %c0_17 = arith.constant 0 : index
    %39 = vector.load %arg6[%c0_16, %c0_17] : memref<256x64xbf16, #tpu.memory_space<vmem>>, vector<256x64xbf16>
    %cst_18 = arith.constant dense<0.000000e+00> : vector<32x64xf32>
    %40 = tpu.matmul %38, %39, %cst_18 {dimension_numbers = #tpu.dot_dimension_numbers<[1], [0], [0], [1], [0, 0, 1, 1], [], []>} : vector<32x256xbf16>, vector<256x64xbf16>, vector<32x64xf32> -> vector<32x64xf32>
    %c0_19 = arith.constant 0 : index
    %c0_20 = arith.constant 0 : index
    %41 = vector.load %arg7[%c0_19, %c0_20] : memref<1x64xf32, #tpu.memory_space<vmem>>, vector<1x64xf32>
    %42 = vector.broadcast %41 : vector<1x64xf32> to vector<32x64xf32>
    %43 = arith.addf %40, %42 : vector<32x64xf32>
    %cst_21 = arith.constant 5.000000e-01 : f32
    %44 = vector.broadcast %cst_21 : f32 to vector<32x64xf32>
    %45 = arith.mulf %44, %43 : vector<32x64xf32>
    %46 = arith.addf %0, %45 : vector<32x64xf32>
    %c0_22 = arith.constant 0 : index
    %c0_23 = arith.constant 0 : index
    %47 = vector.load %arg8[%c0_22, %c0_23] : memref<32x64xf32, #tpu.memory_space<vmem>>, vector<32x64xf32>
    tpu.vector_store %arg8[%c0_22, %c0_23], %46 {strides = array<i32>} : memref<32x64xf32, #tpu.memory_space<vmem>>, vector<32x64xf32>,
    return
  }
  func.func @transform_0(%arg0: i32) -> (i32, i32) {
    %c0_i32 = arith.constant 0 : i32
    %c0_i32_0 = arith.constant 0 : i32
    return %arg0, %c0_i32 : i32, i32
  }
  func.func @transform_1(%arg0: i32) -> (i32, i32) {
    %c0_i32 = arith.constant 0 : i32
    %c0_i32_0 = arith.constant 0 : i32
    %c0_i32_1 = arith.constant 0 : i32
    return %c0_i32, %c0_i32_0 : i32, i32
  }
  func.func @transform_2(%arg0: i32) -> (i32, i32) {
    %c0_i32 = arith.constant 0 : i32
    %c0_i32_0 = arith.constant 0 : i32
    %c0_i32_1 = arith.constant 0 : i32
    return %c0_i32, %c0_i32_0 : i32, i32
  }
  func.func @transform_3(%arg0: i32) -> (i32, i32) {
    %c0_i32 = arith.constant 0 : i32
    %c0_i32_0 = arith.constant 0 : i32
    %c0_i32_1 = arith.constant 0 : i32
    return %c0_i32, %c0_i32_0 : i32, i32
  }
  func.func @transform_4(%arg0: i32) -> (i32, i32) {
    %c0_i32 = arith.constant 0 : i32
    %c0_i32_0 = arith.constant 0 : i32
    %c0_i32_1 = arith.constant 0 : i32
    return %c0_i32, %c0_i32_0 : i32, i32
  }
  func.func @transform_5(%arg0: i32) -> (i32, i32) {
    %c0_i32 = arith.constant 0 : i32
    %c0_i32_0 = arith.constant 0 : i32
    %c0_i32_1 = arith.constant 0 : i32
    return %c0_i32, %c0_i32_0 : i32, i32
  }
  func.func @transform_6(%arg0: i32) -> (i32, i32) {
    %c0_i32 = arith.constant 0 : i32
    %c0_i32_0 = arith.constant 0 : i32
    %c0_i32_1 = arith.constant 0 : i32
    return %c0_i32, %c0_i32_0 : i32, i32
  }
  func.func @transform_7(%arg0: i32) -> (i32, i32) {
    %c0_i32 = arith.constant 0 : i32
    %c0_i32_0 = arith.constant 0 : i32
    return %arg0, %c0_i32 : i32, i32
  }
}

module attributes {stable_mosaic.version = 11 : i64} {
  func.func @qkv_proj_kernel(%arg0: i32, %arg1: memref<32x64xf32, #tpu.memory_space<vmem>>, %arg2: memref<1x64xf32, #tpu.memory_space<vmem>>, %arg3: memref<1x64xf32, #tpu.memory_space<vmem>>, %arg4: memref<64x64xbf16, #tpu.memory_space<vmem>>, %arg5: memref<1x64xf32, #tpu.memory_space<vmem>>, %arg6: memref<64x64xbf16, #tpu.memory_space<vmem>>, %arg7: memref<1x64xf32, #tpu.memory_space<vmem>>, %arg8: memref<64x64xbf16, #tpu.memory_space<vmem>>, %arg9: memref<1x64xf32, #tpu.memory_space<vmem>>, %arg10: memref<32x64xbf16, #tpu.memory_space<vmem>>, %arg11: memref<32x64xbf16, #tpu.memory_space<vmem>>, %arg12: memref<32x64xbf16, #tpu.memory_space<vmem>>) attributes {dimension_semantics = [#tpu.dimension_semantics<parallel>], iteration_bounds = array<i64: 1>, scalar_prefetch = 0 : i64, scratch_operands = 0 : i64, tpu.core_type = #tpu.core_type<tc>, window_params = [{transform_indices = @transform_0, window_bounds = array<i64: 32, 64>}, {pipeline_mode = #tpu.pipeline_mode<synchronous>, transform_indices = @transform_1, window_bounds = array<i64: 1, 64>}, {pipeline_mode = #tpu.pipeline_mode<synchronous>, transform_indices = @transform_2, window_bounds = array<i64: 1, 64>}, {pipeline_mode = #tpu.pipeline_mode<synchronous>, transform_indices = @transform_3, window_bounds = array<i64: 64, 64>}, {pipeline_mode = #tpu.pipeline_mode<synchronous>, transform_indices = @transform_4, window_bounds = array<i64: 1, 64>}, {pipeline_mode = #tpu.pipeline_mode<synchronous>, transform_indices = @transform_5, window_bounds = array<i64: 64, 64>}, {pipeline_mode = #tpu.pipeline_mode<synchronous>, transform_indices = @transform_6, window_bounds = array<i64: 1, 64>}, {pipeline_mode = #tpu.pipeline_mode<synchronous>, transform_indices = @transform_7, window_bounds = array<i64: 64, 64>}, {pipeline_mode = #tpu.pipeline_mode<synchronous>, transform_indices = @transform_8, window_bounds = array<i64: 1, 64>}, {transform_indices = @transform_9, window_bounds = array<i64: 32, 64>}, {transform_indices = @transform_10, window_bounds = array<i64: 32, 64>}, {transform_indices = @transform_11, window_bounds = array<i64: 32, 64>}]} {
    %c0 = arith.constant 0 : index
    %c0_0 = arith.constant 0 : index
    %0 = vector.load %arg1[%c0, %c0_0] : memref<32x64xf32, #tpu.memory_space<vmem>>, vector<32x64xf32>
    %c0_1 = arith.constant 0 : index
    %c0_2 = arith.constant 0 : index
    %1 = vector.load %arg2[%c0_1, %c0_2] : memref<1x64xf32, #tpu.memory_space<vmem>>, vector<1x64xf32>
    %c0_3 = arith.constant 0 : index
    %c0_4 = arith.constant 0 : index
    %2 = vector.load %arg3[%c0_3, %c0_4] : memref<1x64xf32, #tpu.memory_space<vmem>>, vector<1x64xf32>
    %cst = arith.constant dense<0.000000e+00> : vector<32xf32>
    %3 = vector.multi_reduction <add>, %0, %cst [1] : vector<32x64xf32> to vector<32xf32>
    %4 = vector.shape_cast %3 : vector<32xf32> to vector<32x1xf32>
    %cst_5 = arith.constant 6.400000e+01 : f32
    %5 = vector.broadcast %cst_5 : f32 to vector<32x1xf32>
    %6 = arith.divf %4, %5 : vector<32x1xf32>
    %7 = vector.broadcast %6 : vector<32x1xf32> to vector<32x64xf32>
    %8 = arith.subf %0, %7 : vector<32x64xf32>
    %9 = arith.mulf %8, %8 : vector<32x64xf32>
    %cst_6 = arith.constant dense<0.000000e+00> : vector<32xf32>
    %10 = vector.multi_reduction <add>, %9, %cst_6 [1] : vector<32x64xf32> to vector<32xf32>
    %11 = vector.shape_cast %10 : vector<32xf32> to vector<32x1xf32>
    %cst_7 = arith.constant 6.400000e+01 : f32
    %12 = vector.broadcast %cst_7 : f32 to vector<32x1xf32>
    %13 = arith.divf %11, %12 : vector<32x1xf32>
    %14 = vector.broadcast %6 : vector<32x1xf32> to vector<32x64xf32>
    %15 = arith.subf %0, %14 : vector<32x64xf32>
    %cst_8 = arith.constant 9.99999974E-6 : f32
    %16 = vector.broadcast %cst_8 : f32 to vector<32x1xf32>
    %17 = arith.addf %13, %16 : vector<32x1xf32>
    %18 = math.rsqrt %17 : vector<32x1xf32>
    %19 = vector.broadcast %18 : vector<32x1xf32> to vector<32x64xf32>
    %20 = arith.mulf %15, %19 : vector<32x64xf32>
    %21 = vector.broadcast %1 : vector<1x64xf32> to vector<32x64xf32>
    %22 = arith.mulf %20, %21 : vector<32x64xf32>
    %23 = vector.broadcast %2 : vector<1x64xf32> to vector<32x64xf32>
    %24 = arith.addf %22, %23 : vector<32x64xf32>
    %25 = arith.truncf %24 : vector<32x64xf32> to vector<32x64xbf16>
    %c0_9 = arith.constant 0 : index
    %c0_10 = arith.constant 0 : index
    %26 = vector.load %arg4[%c0_9, %c0_10] : memref<64x64xbf16, #tpu.memory_space<vmem>>, vector<64x64xbf16>
    %cst_11 = arith.constant dense<0.000000e+00> : vector<32x64xf32>
    %27 = tpu.matmul %25, %26, %cst_11 {dimension_numbers = #tpu.dot_dimension_numbers<[1], [0], [0], [1], [0, 0, 1, 1], [], []>} : vector<32x64xbf16>, vector<64x64xbf16>, vector<32x64xf32> -> vector<32x64xf32>
    %c0_12 = arith.constant 0 : index
    %c0_13 = arith.constant 0 : index
    %28 = vector.load %arg5[%c0_12, %c0_13] : memref<1x64xf32, #tpu.memory_space<vmem>>, vector<1x64xf32>
    %29 = vector.broadcast %28 : vector<1x64xf32> to vector<32x64xf32>
    %30 = arith.addf %27, %29 : vector<32x64xf32>
    %31 = arith.truncf %30 : vector<32x64xf32> to vector<32x64xbf16>
    %c0_14 = arith.constant 0 : index
    %c0_15 = arith.constant 0 : index
    %32 = vector.load %arg10[%c0_14, %c0_15] : memref<32x64xbf16, #tpu.memory_space<vmem>>, vector<32x64xbf16>
    tpu.vector_store %arg10[%c0_14, %c0_15], %31 {strides = array<i32>} : memref<32x64xbf16, #tpu.memory_space<vmem>>, vector<32x64xbf16>,
    %c0_16 = arith.constant 0 : index
    %c0_17 = arith.constant 0 : index
    %33 = vector.load %arg6[%c0_16, %c0_17] : memref<64x64xbf16, #tpu.memory_space<vmem>>, vector<64x64xbf16>
    %cst_18 = arith.constant dense<0.000000e+00> : vector<32x64xf32>
    %34 = tpu.matmul %25, %33, %cst_18 {dimension_numbers = #tpu.dot_dimension_numbers<[1], [0], [0], [1], [0, 0, 1, 1], [], []>} : vector<32x64xbf16>, vector<64x64xbf16>, vector<32x64xf32> -> vector<32x64xf32>
    %c0_19 = arith.constant 0 : index
    %c0_20 = arith.constant 0 : index
    %35 = vector.load %arg7[%c0_19, %c0_20] : memref<1x64xf32, #tpu.memory_space<vmem>>, vector<1x64xf32>
    %36 = vector.broadcast %35 : vector<1x64xf32> to vector<32x64xf32>
    %37 = arith.addf %34, %36 : vector<32x64xf32>
    %38 = arith.truncf %37 : vector<32x64xf32> to vector<32x64xbf16>
    %c0_21 = arith.constant 0 : index
    %c0_22 = arith.constant 0 : index
    %39 = vector.load %arg11[%c0_21, %c0_22] : memref<32x64xbf16, #tpu.memory_space<vmem>>, vector<32x64xbf16>
    tpu.vector_store %arg11[%c0_21, %c0_22], %38 {strides = array<i32>} : memref<32x64xbf16, #tpu.memory_space<vmem>>, vector<32x64xbf16>,
    %c0_23 = arith.constant 0 : index
    %c0_24 = arith.constant 0 : index
    %40 = vector.load %arg8[%c0_23, %c0_24] : memref<64x64xbf16, #tpu.memory_space<vmem>>, vector<64x64xbf16>
    %cst_25 = arith.constant dense<0.000000e+00> : vector<32x64xf32>
    %41 = tpu.matmul %25, %40, %cst_25 {dimension_numbers = #tpu.dot_dimension_numbers<[1], [0], [0], [1], [0, 0, 1, 1], [], []>} : vector<32x64xbf16>, vector<64x64xbf16>, vector<32x64xf32> -> vector<32x64xf32>
    %c0_26 = arith.constant 0 : index
    %c0_27 = arith.constant 0 : index
    %42 = vector.load %arg9[%c0_26, %c0_27] : memref<1x64xf32, #tpu.memory_space<vmem>>, vector<1x64xf32>
    %43 = vector.broadcast %42 : vector<1x64xf32> to vector<32x64xf32>
    %44 = arith.addf %41, %43 : vector<32x64xf32>
    %45 = arith.truncf %44 : vector<32x64xf32> to vector<32x64xbf16>
    %c0_28 = arith.constant 0 : index
    %c0_29 = arith.constant 0 : index
    %46 = vector.load %arg12[%c0_28, %c0_29] : memref<32x64xbf16, #tpu.memory_space<vmem>>, vector<32x64xbf16>
    tpu.vector_store %arg12[%c0_28, %c0_29], %45 {strides = array<i32>} : memref<32x64xbf16, #tpu.memory_space<vmem>>, vector<32x64xbf16>,
    return
  }
  func.func @transform_0(%arg0: i32) -> (i32, i32) {
    %c0_i32 = arith.constant 0 : i32
    %c0_i32_0 = arith.constant 0 : i32
    return %arg0, %c0_i32 : i32, i32
  }
  func.func @transform_1(%arg0: i32) -> (i32, i32) {
    %c0_i32 = arith.constant 0 : i32
    %c0_i32_0 = arith.constant 0 : i32
    %c0_i32_1 = arith.constant 0 : i32
    return %c0_i32, %c0_i32_0 : i32, i32
  }
  func.func @transform_2(%arg0: i32) -> (i32, i32) {
    %c0_i32 = arith.constant 0 : i32
    %c0_i32_0 = arith.constant 0 : i32
    %c0_i32_1 = arith.constant 0 : i32
    return %c0_i32, %c0_i32_0 : i32, i32
  }
  func.func @transform_3(%arg0: i32) -> (i32, i32) {
    %c0_i32 = arith.constant 0 : i32
    %c0_i32_0 = arith.constant 0 : i32
    %c0_i32_1 = arith.constant 0 : i32
    return %c0_i32, %c0_i32_0 : i32, i32
  }
  func.func @transform_4(%arg0: i32) -> (i32, i32) {
    %c0_i32 = arith.constant 0 : i32
    %c0_i32_0 = arith.constant 0 : i32
    %c0_i32_1 = arith.constant 0 : i32
    return %c0_i32, %c0_i32_0 : i32, i32
  }
  func.func @transform_5(%arg0: i32) -> (i32, i32) {
    %c0_i32 = arith.constant 0 : i32
    %c0_i32_0 = arith.constant 0 : i32
    %c0_i32_1 = arith.constant 0 : i32
    return %c0_i32, %c0_i32_0 : i32, i32
  }
  func.func @transform_6(%arg0: i32) -> (i32, i32) {
    %c0_i32 = arith.constant 0 : i32
    %c0_i32_0 = arith.constant 0 : i32
    %c0_i32_1 = arith.constant 0 : i32
    return %c0_i32, %c0_i32_0 : i32, i32
  }
  func.func @transform_7(%arg0: i32) -> (i32, i32) {
    %c0_i32 = arith.constant 0 : i32
    %c0_i32_0 = arith.constant 0 : i32
    %c0_i32_1 = arith.constant 0 : i32
    return %c0_i32, %c0_i32_0 : i32, i32
  }
  func.func @transform_8(%arg0: i32) -> (i32, i32) {
    %c0_i32 = arith.constant 0 : i32
    %c0_i32_0 = arith.constant 0 : i32
    %c0_i32_1 = arith.constant 0 : i32
    return %c0_i32, %c0_i32_0 : i32, i32
  }
  func.func @transform_9(%arg0: i32) -> (i32, i32) {
    %c0_i32 = arith.constant 0 : i32
    %c0_i32_0 = arith.constant 0 : i32
    return %arg0, %c0_i32 : i32, i32
  }
  func.func @transform_10(%arg0: i32) -> (i32, i32) {
    %c0_i32 = arith.constant 0 : i32
    %c0_i32_0 = arith.constant 0 : i32
    return %arg0, %c0_i32 : i32, i32
  }
  func.func @transform_11(%arg0: i32) -> (i32, i32) {
    %c0_i32 = arith.constant 0 : i32
    %c0_i32_0 = arith.constant 0 : i32
    return %arg0, %c0_i32 : i32, i32
  }
}

module attributes {stable_mosaic.version = 11 : i64} {
  func.func @conv_module_kernel(%arg0: i32, %arg1: memref<1x16x64xf32, #tpu.memory_space<vmem>>, %arg2: memref<1x64xf32, #tpu.memory_space<vmem>>, %arg3: memref<1x64xf32, #tpu.memory_space<vmem>>, %arg4: memref<64x64xbf16, #tpu.memory_space<vmem>>, %arg5: memref<1x64xf32, #tpu.memory_space<vmem>>, %arg6: memref<64x64xbf16, #tpu.memory_space<vmem>>, %arg7: memref<1x64xf32, #tpu.memory_space<vmem>>, %arg8: memref<7x64xf32, #tpu.memory_space<vmem>>, %arg9: memref<1x64xf32, #tpu.memory_space<vmem>>, %arg10: memref<64x64xbf16, #tpu.memory_space<vmem>>, %arg11: memref<1x64xf32, #tpu.memory_space<vmem>>, %arg12: memref<1x16x64xf32, #tpu.memory_space<vmem>>, %arg13: memref<22x64xf32, #tpu.memory_space<vmem>>) attributes {dimension_semantics = [#tpu.dimension_semantics<parallel>], iteration_bounds = array<i64: 2>, scalar_prefetch = 0 : i64, scratch_operands = 1 : i64, tpu.core_type = #tpu.core_type<tc>, window_params = [{transform_indices = @transform_0, window_bounds = array<i64: 1, 16, 64>}, {pipeline_mode = #tpu.pipeline_mode<synchronous>, transform_indices = @transform_1, window_bounds = array<i64: 1, 64>}, {pipeline_mode = #tpu.pipeline_mode<synchronous>, transform_indices = @transform_2, window_bounds = array<i64: 1, 64>}, {pipeline_mode = #tpu.pipeline_mode<synchronous>, transform_indices = @transform_3, window_bounds = array<i64: 64, 64>}, {pipeline_mode = #tpu.pipeline_mode<synchronous>, transform_indices = @transform_4, window_bounds = array<i64: 1, 64>}, {pipeline_mode = #tpu.pipeline_mode<synchronous>, transform_indices = @transform_5, window_bounds = array<i64: 64, 64>}, {pipeline_mode = #tpu.pipeline_mode<synchronous>, transform_indices = @transform_6, window_bounds = array<i64: 1, 64>}, {pipeline_mode = #tpu.pipeline_mode<synchronous>, transform_indices = @transform_7, window_bounds = array<i64: 7, 64>}, {pipeline_mode = #tpu.pipeline_mode<synchronous>, transform_indices = @transform_8, window_bounds = array<i64: 1, 64>}, {pipeline_mode = #tpu.pipeline_mode<synchronous>, transform_indices = @transform_9, window_bounds = array<i64: 64, 64>}, {pipeline_mode = #tpu.pipeline_mode<synchronous>, transform_indices = @transform_10, window_bounds = array<i64: 1, 64>}, {transform_indices = @transform_11, window_bounds = array<i64: 1, 16, 64>}]} {
    %c0 = arith.constant 0 : index
    %c0_0 = arith.constant 0 : index
    %c0_1 = arith.constant 0 : index
    %0 = vector.load %arg1[%c0, %c0_0, %c0_1] : memref<1x16x64xf32, #tpu.memory_space<vmem>>, vector<1x16x64xf32>
    %1 = vector.shape_cast %0 : vector<1x16x64xf32> to vector<16x64xf32>
    %c0_2 = arith.constant 0 : index
    %c0_3 = arith.constant 0 : index
    %2 = vector.load %arg2[%c0_2, %c0_3] : memref<1x64xf32, #tpu.memory_space<vmem>>, vector<1x64xf32>
    %c0_4 = arith.constant 0 : index
    %c0_5 = arith.constant 0 : index
    %3 = vector.load %arg3[%c0_4, %c0_5] : memref<1x64xf32, #tpu.memory_space<vmem>>, vector<1x64xf32>
    %cst = arith.constant dense<0.000000e+00> : vector<16xf32>
    %4 = vector.multi_reduction <add>, %1, %cst [1] : vector<16x64xf32> to vector<16xf32>
    %5 = vector.shape_cast %4 : vector<16xf32> to vector<16x1xf32>
    %cst_6 = arith.constant 6.400000e+01 : f32
    %6 = vector.broadcast %cst_6 : f32 to vector<16x1xf32>
    %7 = arith.divf %5, %6 : vector<16x1xf32>
    %8 = vector.broadcast %7 : vector<16x1xf32> to vector<16x64xf32>
    %9 = arith.subf %1, %8 : vector<16x64xf32>
    %10 = arith.mulf %9, %9 : vector<16x64xf32>
    %cst_7 = arith.constant dense<0.000000e+00> : vector<16xf32>
    %11 = vector.multi_reduction <add>, %10, %cst_7 [1] : vector<16x64xf32> to vector<16xf32>
    %12 = vector.shape_cast %11 : vector<16xf32> to vector<16x1xf32>
    %cst_8 = arith.constant 6.400000e+01 : f32
    %13 = vector.broadcast %cst_8 : f32 to vector<16x1xf32>
    %14 = arith.divf %12, %13 : vector<16x1xf32>
    %15 = vector.broadcast %7 : vector<16x1xf32> to vector<16x64xf32>
    %16 = arith.subf %1, %15 : vector<16x64xf32>
    %cst_9 = arith.constant 9.99999974E-6 : f32
    %17 = vector.broadcast %cst_9 : f32 to vector<16x1xf32>
    %18 = arith.addf %14, %17 : vector<16x1xf32>
    %19 = math.rsqrt %18 : vector<16x1xf32>
    %20 = vector.broadcast %19 : vector<16x1xf32> to vector<16x64xf32>
    %21 = arith.mulf %16, %20 : vector<16x64xf32>
    %22 = vector.broadcast %2 : vector<1x64xf32> to vector<16x64xf32>
    %23 = arith.mulf %21, %22 : vector<16x64xf32>
    %24 = vector.broadcast %3 : vector<1x64xf32> to vector<16x64xf32>
    %25 = arith.addf %23, %24 : vector<16x64xf32>
    %26 = arith.truncf %25 : vector<16x64xf32> to vector<16x64xbf16>
    %c0_10 = arith.constant 0 : index
    %c0_11 = arith.constant 0 : index
    %27 = vector.load %arg4[%c0_10, %c0_11] : memref<64x64xbf16, #tpu.memory_space<vmem>>, vector<64x64xbf16>
    %cst_12 = arith.constant dense<0.000000e+00> : vector<16x64xf32>
    %28 = tpu.matmul %26, %27, %cst_12 {dimension_numbers = #tpu.dot_dimension_numbers<[1], [0], [0], [1], [0, 0, 1, 1], [], []>} : vector<16x64xbf16>, vector<64x64xbf16>, vector<16x64xf32> -> vector<16x64xf32>
    %c0_13 = arith.constant 0 : index
    %c0_14 = arith.constant 0 : index
    %29 = vector.load %arg5[%c0_13, %c0_14] : memref<1x64xf32, #tpu.memory_space<vmem>>, vector<1x64xf32>
    %30 = vector.broadcast %29 : vector<1x64xf32> to vector<16x64xf32>
    %31 = arith.addf %28, %30 : vector<16x64xf32>
    %c0_15 = arith.constant 0 : index
    %c0_16 = arith.constant 0 : index
    %32 = vector.load %arg6[%c0_15, %c0_16] : memref<64x64xbf16, #tpu.memory_space<vmem>>, vector<64x64xbf16>
    %cst_17 = arith.constant dense<0.000000e+00> : vector<16x64xf32>
    %33 = tpu.matmul %26, %32, %cst_17 {dimension_numbers = #tpu.dot_dimension_numbers<[1], [0], [0], [1], [0, 0, 1, 1], [], []>} : vector<16x64xbf16>, vector<64x64xbf16>, vector<16x64xf32> -> vector<16x64xf32>
    %c0_18 = arith.constant 0 : index
    %c0_19 = arith.constant 0 : index
    %34 = vector.load %arg7[%c0_18, %c0_19] : memref<1x64xf32, #tpu.memory_space<vmem>>, vector<1x64xf32>
    %35 = vector.broadcast %34 : vector<1x64xf32> to vector<16x64xf32>
    %36 = arith.addf %33, %35 : vector<16x64xf32>
    %cst_20 = arith.constant 0.000000e+00 : f32
    %37 = vector.broadcast %cst_20 : f32 to vector<16x64xf32>
    %38 = arith.subf %37, %36 : vector<16x64xf32>
    %39 = math.exp %38 : vector<16x64xf32>
    %cst_21 = arith.constant 1.000000e+00 : f32
    %40 = vector.broadcast %cst_21 : f32 to vector<16x64xf32>
    %41 = arith.addf %40, %39 : vector<16x64xf32>
    %42 = tpu.reciprocal %41 {approx = true} : vector<16x64xf32> -> vector<16x64xf32>
    %43 = arith.mulf %31, %42 : vector<16x64xf32>
    %cst_22 = arith.constant 0.000000e+00 : f32
    %44 = vector.broadcast %cst_22 : f32 to vector<3x64xf32>
    %c0_23 = arith.constant 0 : index
    %c0_24 = arith.constant 0 : index
    %45 = vector.load %arg13[%c0_23, %c0_24] : memref<22x64xf32, #tpu.memory_space<vmem>>, vector<3x64xf32>
    tpu.vector_store %arg13[%c0_23, %c0_24], %44 {strides = array<i32>} : memref<22x64xf32, #tpu.memory_space<vmem>>, vector<3x64xf32>,
    %cst_25 = arith.constant 0.000000e+00 : f32
    %46 = vector.broadcast %cst_25 : f32 to vector<3x64xf32>
    %c19 = arith.constant 19 : index
    %c0_26 = arith.constant 0 : index
    %47 = vector.load %arg13[%c19, %c0_26] : memref<22x64xf32, #tpu.memory_space<vmem>>, vector<3x64xf32>
    tpu.vector_store %arg13[%c19, %c0_26], %46 {strides = array<i32>} : memref<22x64xf32, #tpu.memory_space<vmem>>, vector<3x64xf32>,
    %c3 = arith.constant 3 : index
    %c0_27 = arith.constant 0 : index
    %48 = vector.load %arg13[%c3, %c0_27] : memref<22x64xf32, #tpu.memory_space<vmem>>, vector<16x64xf32>
    tpu.vector_store %arg13[%c3, %c0_27], %43 {strides = array<i32>} : memref<22x64xf32, #tpu.memory_space<vmem>>, vector<16x64xf32>,
    %cst_28 = arith.constant 0.000000e+00 : f32
    %49 = vector.broadcast %cst_28 : f32 to vector<16x64xf32>
    %c0_29 = arith.constant 0 : index
    %c0_30 = arith.constant 0 : index
    %50 = vector.load %arg13[%c0_29, %c0_30] : memref<22x64xf32, #tpu.memory_space<vmem>>, vector<16x64xf32>
    %c0_31 = arith.constant 0 : index
    %c0_32 = arith.constant 0 : index
    %51 = vector.load %arg8[%c0_31, %c0_32] : memref<7x64xf32, #tpu.memory_space<vmem>>, vector<1x64xf32>
    %52 = vector.broadcast %51 : vector<1x64xf32> to vector<16x64xf32>
    %53 = arith.mulf %50, %52 : vector<16x64xf32>
    %54 = arith.addf %49, %53 : vector<16x64xf32>
    %c1 = arith.constant 1 : index
    %c0_33 = arith.constant 0 : index
    %55 = vector.load %arg13[%c1, %c0_33] : memref<22x64xf32, #tpu.memory_space<vmem>>, vector<16x64xf32>
    %c1_34 = arith.constant 1 : index
    %c0_35 = arith.constant 0 : index
    %56 = vector.load %arg8[%c1_34, %c0_35] : memref<7x64xf32, #tpu.memory_space<vmem>>, vector<1x64xf32>
    %57 = vector.broadcast %56 : vector<1x64xf32> to vector<16x64xf32>
    %58 = arith.mulf %55, %57 : vector<16x64xf32>
    %59 = arith.addf %54, %58 : vector<16x64xf32>
    %c2 = arith.constant 2 : index
    %c0_36 = arith.constant 0 : index
    %60 = vector.load %arg13[%c2, %c0_36] : memref<22x64xf32, #tpu.memory_space<vmem>>, vector<16x64xf32>
    %c2_37 = arith.constant 2 : index
    %c0_38 = arith.constant 0 : index
    %61 = vector.load %arg8[%c2_37, %c0_38] : memref<7x64xf32, #tpu.memory_space<vmem>>, vector<1x64xf32>
    %62 = vector.broadcast %61 : vector<1x64xf32> to vector<16x64xf32>
    %63 = arith.mulf %60, %62 : vector<16x64xf32>
    %64 = arith.addf %59, %63 : vector<16x64xf32>
    %c3_39 = arith.constant 3 : index
    %c0_40 = arith.constant 0 : index
    %65 = vector.load %arg13[%c3_39, %c0_40] : memref<22x64xf32, #tpu.memory_space<vmem>>, vector<16x64xf32>
    %c3_41 = arith.constant 3 : index
    %c0_42 = arith.constant 0 : index
    %66 = vector.load %arg8[%c3_41, %c0_42] : memref<7x64xf32, #tpu.memory_space<vmem>>, vector<1x64xf32>
    %67 = vector.broadcast %66 : vector<1x64xf32> to vector<16x64xf32>
    %68 = arith.mulf %65, %67 : vector<16x64xf32>
    %69 = arith.addf %64, %68 : vector<16x64xf32>
    %c4 = arith.constant 4 : index
    %c0_43 = arith.constant 0 : index
    %70 = vector.load %arg13[%c4, %c0_43] : memref<22x64xf32, #tpu.memory_space<vmem>>, vector<16x64xf32>
    %c4_44 = arith.constant 4 : index
    %c0_45 = arith.constant 0 : index
    %71 = vector.load %arg8[%c4_44, %c0_45] : memref<7x64xf32, #tpu.memory_space<vmem>>, vector<1x64xf32>
    %72 = vector.broadcast %71 : vector<1x64xf32> to vector<16x64xf32>
    %73 = arith.mulf %70, %72 : vector<16x64xf32>
    %74 = arith.addf %69, %73 : vector<16x64xf32>
    %c5 = arith.constant 5 : index
    %c0_46 = arith.constant 0 : index
    %75 = vector.load %arg13[%c5, %c0_46] : memref<22x64xf32, #tpu.memory_space<vmem>>, vector<16x64xf32>
    %c5_47 = arith.constant 5 : index
    %c0_48 = arith.constant 0 : index
    %76 = vector.load %arg8[%c5_47, %c0_48] : memref<7x64xf32, #tpu.memory_space<vmem>>, vector<1x64xf32>
    %77 = vector.broadcast %76 : vector<1x64xf32> to vector<16x64xf32>
    %78 = arith.mulf %75, %77 : vector<16x64xf32>
    %79 = arith.addf %74, %78 : vector<16x64xf32>
    %c6 = arith.constant 6 : index
    %c0_49 = arith.constant 0 : index
    %80 = vector.load %arg13[%c6, %c0_49] : memref<22x64xf32, #tpu.memory_space<vmem>>, vector<16x64xf32>
    %c6_50 = arith.constant 6 : index
    %c0_51 = arith.constant 0 : index
    %81 = vector.load %arg8[%c6_50, %c0_51] : memref<7x64xf32, #tpu.memory_space<vmem>>, vector<1x64xf32>
    %82 = vector.broadcast %81 : vector<1x64xf32> to vector<16x64xf32>
    %83 = arith.mulf %80, %82 : vector<16x64xf32>
    %84 = arith.addf %79, %83 : vector<16x64xf32>
    %c0_52 = arith.constant 0 : index
    %c0_53 = arith.constant 0 : index
    %85 = vector.load %arg9[%c0_52, %c0_53] : memref<1x64xf32, #tpu.memory_space<vmem>>, vector<1x64xf32>
    %86 = vector.broadcast %85 : vector<1x64xf32> to vector<16x64xf32>
    %87 = arith.addf %84, %86 : vector<16x64xf32>
    %cst_54 = arith.constant 0.000000e+00 : f32
    %88 = vector.broadcast %cst_54 : f32 to vector<16x64xf32>
    %89 = arith.subf %88, %87 : vector<16x64xf32>
    %90 = math.exp %89 : vector<16x64xf32>
    %cst_55 = arith.constant 1.000000e+00 : f32
    %91 = vector.broadcast %cst_55 : f32 to vector<16x64xf32>
    %92 = arith.addf %91, %90 : vector<16x64xf32>
    %93 = tpu.reciprocal %92 {approx = true} : vector<16x64xf32> -> vector<16x64xf32>
    %94 = arith.mulf %87, %93 : vector<16x64xf32>
    %95 = arith.truncf %94 : vector<16x64xf32> to vector<16x64xbf16>
    %c0_56 = arith.constant 0 : index
    %c0_57 = arith.constant 0 : index
    %96 = vector.load %arg10[%c0_56, %c0_57] : memref<64x64xbf16, #tpu.memory_space<vmem>>, vector<64x64xbf16>
    %cst_58 = arith.constant dense<0.000000e+00> : vector<16x64xf32>
    %97 = tpu.matmul %95, %96, %cst_58 {dimension_numbers = #tpu.dot_dimension_numbers<[1], [0], [0], [1], [0, 0, 1, 1], [], []>} : vector<16x64xbf16>, vector<64x64xbf16>, vector<16x64xf32> -> vector<16x64xf32>
    %98 = arith.addf %1, %97 : vector<16x64xf32>
    %c0_59 = arith.constant 0 : index
    %c0_60 = arith.constant 0 : index
    %99 = vector.load %arg11[%c0_59, %c0_60] : memref<1x64xf32, #tpu.memory_space<vmem>>, vector<1x64xf32>
    %100 = vector.broadcast %99 : vector<1x64xf32> to vector<16x64xf32>
    %101 = arith.addf %98, %100 : vector<16x64xf32>
    %c0_61 = arith.constant 0 : index
    %c0_62 = arith.constant 0 : index
    %c0_63 = arith.constant 0 : index
    %102 = vector.load %arg12[%c0_61, %c0_62, %c0_63] : memref<1x16x64xf32, #tpu.memory_space<vmem>>, vector<1x16x64xf32>
    %103 = vector.shape_cast %102 : vector<1x16x64xf32> to vector<16x64xf32>
    %104 = vector.shape_cast %101 : vector<16x64xf32> to vector<1x16x64xf32>
    tpu.vector_store %arg12[%c0_61, %c0_62, %c0_63], %104 {strides = array<i32>} : memref<1x16x64xf32, #tpu.memory_space<vmem>>, vector<1x16x64xf32>,
    return
  }
  func.func @transform_0(%arg0: i32) -> (i32, i32, i32) {
    %c0_i32 = arith.constant 0 : i32
    %c0_i32_0 = arith.constant 0 : i32
    %c0_i32_1 = arith.constant 0 : i32
    return %arg0, %c0_i32, %c0_i32_0 : i32, i32, i32
  }
  func.func @transform_1(%arg0: i32) -> (i32, i32) {
    %c0_i32 = arith.constant 0 : i32
    %c0_i32_0 = arith.constant 0 : i32
    %c0_i32_1 = arith.constant 0 : i32
    return %c0_i32, %c0_i32_0 : i32, i32
  }
  func.func @transform_2(%arg0: i32) -> (i32, i32) {
    %c0_i32 = arith.constant 0 : i32
    %c0_i32_0 = arith.constant 0 : i32
    %c0_i32_1 = arith.constant 0 : i32
    return %c0_i32, %c0_i32_0 : i32, i32
  }
  func.func @transform_3(%arg0: i32) -> (i32, i32) {
    %c0_i32 = arith.constant 0 : i32
    %c0_i32_0 = arith.constant 0 : i32
    %c0_i32_1 = arith.constant 0 : i32
    return %c0_i32, %c0_i32_0 : i32, i32
  }
  func.func @transform_4(%arg0: i32) -> (i32, i32) {
    %c0_i32 = arith.constant 0 : i32
    %c0_i32_0 = arith.constant 0 : i32
    %c0_i32_1 = arith.constant 0 : i32
    return %c0_i32, %c0_i32_0 : i32, i32
  }
  func.func @transform_5(%arg0: i32) -> (i32, i32) {
    %c0_i32 = arith.constant 0 : i32
    %c0_i32_0 = arith.constant 0 : i32
    %c0_i32_1 = arith.constant 0 : i32
    return %c0_i32, %c0_i32_0 : i32, i32
  }
  func.func @transform_6(%arg0: i32) -> (i32, i32) {
    %c0_i32 = arith.constant 0 : i32
    %c0_i32_0 = arith.constant 0 : i32
    %c0_i32_1 = arith.constant 0 : i32
    return %c0_i32, %c0_i32_0 : i32, i32
  }
  func.func @transform_7(%arg0: i32) -> (i32, i32) {
    %c0_i32 = arith.constant 0 : i32
    %c0_i32_0 = arith.constant 0 : i32
    %c0_i32_1 = arith.constant 0 : i32
    return %c0_i32, %c0_i32_0 : i32, i32
  }
  func.func @transform_8(%arg0: i32) -> (i32, i32) {
    %c0_i32 = arith.constant 0 : i32
    %c0_i32_0 = arith.constant 0 : i32
    %c0_i32_1 = arith.constant 0 : i32
    return %c0_i32, %c0_i32_0 : i32, i32
  }
  func.func @transform_9(%arg0: i32) -> (i32, i32) {
    %c0_i32 = arith.constant 0 : i32
    %c0_i32_0 = arith.constant 0 : i32
    %c0_i32_1 = arith.constant 0 : i32
    return %c0_i32, %c0_i32_0 : i32, i32
  }
  func.func @transform_10(%arg0: i32) -> (i32, i32) {
    %c0_i32 = arith.constant 0 : i32
    %c0_i32_0 = arith.constant 0 : i32
    %c0_i32_1 = arith.constant 0 : i32
    return %c0_i32, %c0_i32_0 : i32, i32
  }
  func.func @transform_11(%arg0: i32) -> (i32, i32, i32) {
    %c0_i32 = arith.constant 0 : i32
    %c0_i32_0 = arith.constant 0 : i32
    %c0_i32_1 = arith.constant 0 : i32
    return %arg0, %c0_i32, %c0_i32_0 : i32, i32, i32
  }
}

module attributes {stable_mosaic.version = 11 : i64} {
  func.func @ffn_final_ln_kernel(%arg0: i32, %arg1: memref<32x64xf32, #tpu.memory_space<vmem>>, %arg2: memref<1x64xf32, #tpu.memory_space<vmem>>, %arg3: memref<1x64xf32, #tpu.memory_space<vmem>>, %arg4: memref<64x256xbf16, #tpu.memory_space<vmem>>, %arg5: memref<1x256xf32, #tpu.memory_space<vmem>>, %arg6: memref<256x64xbf16, #tpu.memory_space<vmem>>, %arg7: memref<1x64xf32, #tpu.memory_space<vmem>>, %arg8: memref<1x64xf32, #tpu.memory_space<vmem>>, %arg9: memref<1x64xf32, #tpu.memory_space<vmem>>, %arg10: memref<32x64xf32, #tpu.memory_space<vmem>>) attributes {dimension_semantics = [#tpu.dimension_semantics<parallel>], iteration_bounds = array<i64: 1>, scalar_prefetch = 0 : i64, scratch_operands = 0 : i64, tpu.core_type = #tpu.core_type<tc>, window_params = [{transform_indices = @transform_0, window_bounds = array<i64: 32, 64>}, {pipeline_mode = #tpu.pipeline_mode<synchronous>, transform_indices = @transform_1, window_bounds = array<i64: 1, 64>}, {pipeline_mode = #tpu.pipeline_mode<synchronous>, transform_indices = @transform_2, window_bounds = array<i64: 1, 64>}, {pipeline_mode = #tpu.pipeline_mode<synchronous>, transform_indices = @transform_3, window_bounds = array<i64: 64, 256>}, {pipeline_mode = #tpu.pipeline_mode<synchronous>, transform_indices = @transform_4, window_bounds = array<i64: 1, 256>}, {pipeline_mode = #tpu.pipeline_mode<synchronous>, transform_indices = @transform_5, window_bounds = array<i64: 256, 64>}, {pipeline_mode = #tpu.pipeline_mode<synchronous>, transform_indices = @transform_6, window_bounds = array<i64: 1, 64>}, {pipeline_mode = #tpu.pipeline_mode<synchronous>, transform_indices = @transform_7, window_bounds = array<i64: 1, 64>}, {pipeline_mode = #tpu.pipeline_mode<synchronous>, transform_indices = @transform_8, window_bounds = array<i64: 1, 64>}, {transform_indices = @transform_9, window_bounds = array<i64: 32, 64>}]} {
    %c0 = arith.constant 0 : index
    %c0_0 = arith.constant 0 : index
    %0 = vector.load %arg1[%c0, %c0_0] : memref<32x64xf32, #tpu.memory_space<vmem>>, vector<32x64xf32>
    %c0_1 = arith.constant 0 : index
    %c0_2 = arith.constant 0 : index
    %1 = vector.load %arg2[%c0_1, %c0_2] : memref<1x64xf32, #tpu.memory_space<vmem>>, vector<1x64xf32>
    %c0_3 = arith.constant 0 : index
    %c0_4 = arith.constant 0 : index
    %2 = vector.load %arg3[%c0_3, %c0_4] : memref<1x64xf32, #tpu.memory_space<vmem>>, vector<1x64xf32>
    %cst = arith.constant dense<0.000000e+00> : vector<32xf32>
    %3 = vector.multi_reduction <add>, %0, %cst [1] : vector<32x64xf32> to vector<32xf32>
    %4 = vector.shape_cast %3 : vector<32xf32> to vector<32x1xf32>
    %cst_5 = arith.constant 6.400000e+01 : f32
    %5 = vector.broadcast %cst_5 : f32 to vector<32x1xf32>
    %6 = arith.divf %4, %5 : vector<32x1xf32>
    %7 = vector.broadcast %6 : vector<32x1xf32> to vector<32x64xf32>
    %8 = arith.subf %0, %7 : vector<32x64xf32>
    %9 = arith.mulf %8, %8 : vector<32x64xf32>
    %cst_6 = arith.constant dense<0.000000e+00> : vector<32xf32>
    %10 = vector.multi_reduction <add>, %9, %cst_6 [1] : vector<32x64xf32> to vector<32xf32>
    %11 = vector.shape_cast %10 : vector<32xf32> to vector<32x1xf32>
    %cst_7 = arith.constant 6.400000e+01 : f32
    %12 = vector.broadcast %cst_7 : f32 to vector<32x1xf32>
    %13 = arith.divf %11, %12 : vector<32x1xf32>
    %14 = vector.broadcast %6 : vector<32x1xf32> to vector<32x64xf32>
    %15 = arith.subf %0, %14 : vector<32x64xf32>
    %cst_8 = arith.constant 9.99999974E-6 : f32
    %16 = vector.broadcast %cst_8 : f32 to vector<32x1xf32>
    %17 = arith.addf %13, %16 : vector<32x1xf32>
    %18 = math.rsqrt %17 : vector<32x1xf32>
    %19 = vector.broadcast %18 : vector<32x1xf32> to vector<32x64xf32>
    %20 = arith.mulf %15, %19 : vector<32x64xf32>
    %21 = vector.broadcast %1 : vector<1x64xf32> to vector<32x64xf32>
    %22 = arith.mulf %20, %21 : vector<32x64xf32>
    %23 = vector.broadcast %2 : vector<1x64xf32> to vector<32x64xf32>
    %24 = arith.addf %22, %23 : vector<32x64xf32>
    %25 = arith.truncf %24 : vector<32x64xf32> to vector<32x64xbf16>
    %c0_9 = arith.constant 0 : index
    %c0_10 = arith.constant 0 : index
    %26 = vector.load %arg4[%c0_9, %c0_10] : memref<64x256xbf16, #tpu.memory_space<vmem>>, vector<64x256xbf16>
    %cst_11 = arith.constant dense<0.000000e+00> : vector<32x256xf32>
    %27 = tpu.matmul %25, %26, %cst_11 {dimension_numbers = #tpu.dot_dimension_numbers<[1], [0], [0], [1], [0, 0, 1, 1], [], []>} : vector<32x64xbf16>, vector<64x256xbf16>, vector<32x256xf32> -> vector<32x256xf32>
    %c0_12 = arith.constant 0 : index
    %c0_13 = arith.constant 0 : index
    %28 = vector.load %arg5[%c0_12, %c0_13] : memref<1x256xf32, #tpu.memory_space<vmem>>, vector<1x256xf32>
    %29 = vector.broadcast %28 : vector<1x256xf32> to vector<32x256xf32>
    %30 = arith.addf %27, %29 : vector<32x256xf32>
    %cst_14 = arith.constant 0.000000e+00 : f32
    %31 = vector.broadcast %cst_14 : f32 to vector<32x256xf32>
    %32 = arith.subf %31, %30 : vector<32x256xf32>
    %33 = math.exp %32 : vector<32x256xf32>
    %cst_15 = arith.constant 1.000000e+00 : f32
    %34 = vector.broadcast %cst_15 : f32 to vector<32x256xf32>
    %35 = arith.addf %34, %33 : vector<32x256xf32>
    %36 = tpu.reciprocal %35 {approx = true} : vector<32x256xf32> -> vector<32x256xf32>
    %37 = arith.mulf %30, %36 : vector<32x256xf32>
    %38 = arith.truncf %37 : vector<32x256xf32> to vector<32x256xbf16>
    %c0_16 = arith.constant 0 : index
    %c0_17 = arith.constant 0 : index
    %39 = vector.load %arg6[%c0_16, %c0_17] : memref<256x64xbf16, #tpu.memory_space<vmem>>, vector<256x64xbf16>
    %cst_18 = arith.constant dense<0.000000e+00> : vector<32x64xf32>
    %40 = tpu.matmul %38, %39, %cst_18 {dimension_numbers = #tpu.dot_dimension_numbers<[1], [0], [0], [1], [0, 0, 1, 1], [], []>} : vector<32x256xbf16>, vector<256x64xbf16>, vector<32x64xf32> -> vector<32x64xf32>
    %c0_19 = arith.constant 0 : index
    %c0_20 = arith.constant 0 : index
    %41 = vector.load %arg7[%c0_19, %c0_20] : memref<1x64xf32, #tpu.memory_space<vmem>>, vector<1x64xf32>
    %42 = vector.broadcast %41 : vector<1x64xf32> to vector<32x64xf32>
    %43 = arith.addf %40, %42 : vector<32x64xf32>
    %cst_21 = arith.constant 5.000000e-01 : f32
    %44 = vector.broadcast %cst_21 : f32 to vector<32x64xf32>
    %45 = arith.mulf %44, %43 : vector<32x64xf32>
    %46 = arith.addf %0, %45 : vector<32x64xf32>
    %c0_22 = arith.constant 0 : index
    %c0_23 = arith.constant 0 : index
    %47 = vector.load %arg8[%c0_22, %c0_23] : memref<1x64xf32, #tpu.memory_space<vmem>>, vector<1x64xf32>
    %c0_24 = arith.constant 0 : index
    %c0_25 = arith.constant 0 : index
    %48 = vector.load %arg9[%c0_24, %c0_25] : memref<1x64xf32, #tpu.memory_space<vmem>>, vector<1x64xf32>
    %cst_26 = arith.constant dense<0.000000e+00> : vector<32xf32>
    %49 = vector.multi_reduction <add>, %46, %cst_26 [1] : vector<32x64xf32> to vector<32xf32>
    %50 = vector.shape_cast %49 : vector<32xf32> to vector<32x1xf32>
    %cst_27 = arith.constant 6.400000e+01 : f32
    %51 = vector.broadcast %cst_27 : f32 to vector<32x1xf32>
    %52 = arith.divf %50, %51 : vector<32x1xf32>
    %53 = vector.broadcast %52 : vector<32x1xf32> to vector<32x64xf32>
    %54 = arith.subf %46, %53 : vector<32x64xf32>
    %55 = arith.mulf %54, %54 : vector<32x64xf32>
    %cst_28 = arith.constant dense<0.000000e+00> : vector<32xf32>
    %56 = vector.multi_reduction <add>, %55, %cst_28 [1] : vector<32x64xf32> to vector<32xf32>
    %57 = vector.shape_cast %56 : vector<32xf32> to vector<32x1xf32>
    %cst_29 = arith.constant 6.400000e+01 : f32
    %58 = vector.broadcast %cst_29 : f32 to vector<32x1xf32>
    %59 = arith.divf %57, %58 : vector<32x1xf32>
    %60 = vector.broadcast %52 : vector<32x1xf32> to vector<32x64xf32>
    %61 = arith.subf %46, %60 : vector<32x64xf32>
    %cst_30 = arith.constant 9.99999974E-6 : f32
    %62 = vector.broadcast %cst_30 : f32 to vector<32x1xf32>
    %63 = arith.addf %59, %62 : vector<32x1xf32>
    %64 = math.rsqrt %63 : vector<32x1xf32>
    %65 = vector.broadcast %64 : vector<32x1xf32> to vector<32x64xf32>
    %66 = arith.mulf %61, %65 : vector<32x64xf32>
    %67 = vector.broadcast %47 : vector<1x64xf32> to vector<32x64xf32>
    %68 = arith.mulf %66, %67 : vector<32x64xf32>
    %69 = vector.broadcast %48 : vector<1x64xf32> to vector<32x64xf32>
    %70 = arith.addf %68, %69 : vector<32x64xf32>
    %c0_31 = arith.constant 0 : index
    %c0_32 = arith.constant 0 : index
    %71 = vector.load %arg10[%c0_31, %c0_32] : memref<32x64xf32, #tpu.memory_space<vmem>>, vector<32x64xf32>
    tpu.vector_store %arg10[%c0_31, %c0_32], %70 {strides = array<i32>} : memref<32x64xf32, #tpu.memory_space<vmem>>, vector<32x64xf32>,
    return
  }
  func.func @transform_0(%arg0: i32) -> (i32, i32) {
    %c0_i32 = arith.constant 0 : i32
    %c0_i32_0 = arith.constant 0 : i32
    return %arg0, %c0_i32 : i32, i32
  }
  func.func @transform_1(%arg0: i32) -> (i32, i32) {
    %c0_i32 = arith.constant 0 : i32
    %c0_i32_0 = arith.constant 0 : i32
    %c0_i32_1 = arith.constant 0 : i32
    return %c0_i32, %c0_i32_0 : i32, i32
  }
  func.func @transform_2(%arg0: i32) -> (i32, i32) {
    %c0_i32 = arith.constant 0 : i32
    %c0_i32_0 = arith.constant 0 : i32
    %c0_i32_1 = arith.constant 0 : i32
    return %c0_i32, %c0_i32_0 : i32, i32
  }
  func.func @transform_3(%arg0: i32) -> (i32, i32) {
    %c0_i32 = arith.constant 0 : i32
    %c0_i32_0 = arith.constant 0 : i32
    %c0_i32_1 = arith.constant 0 : i32
    return %c0_i32, %c0_i32_0 : i32, i32
  }
  func.func @transform_4(%arg0: i32) -> (i32, i32) {
    %c0_i32 = arith.constant 0 : i32
    %c0_i32_0 = arith.constant 0 : i32
    %c0_i32_1 = arith.constant 0 : i32
    return %c0_i32, %c0_i32_0 : i32, i32
  }
  func.func @transform_5(%arg0: i32) -> (i32, i32) {
    %c0_i32 = arith.constant 0 : i32
    %c0_i32_0 = arith.constant 0 : i32
    %c0_i32_1 = arith.constant 0 : i32
    return %c0_i32, %c0_i32_0 : i32, i32
  }
  func.func @transform_6(%arg0: i32) -> (i32, i32) {
    %c0_i32 = arith.constant 0 : i32
    %c0_i32_0 = arith.constant 0 : i32
    %c0_i32_1 = arith.constant 0 : i32
    return %c0_i32, %c0_i32_0 : i32, i32
  }
  func.func @transform_7(%arg0: i32) -> (i32, i32) {
    %c0_i32 = arith.constant 0 : i32
    %c0_i32_0 = arith.constant 0 : i32
    %c0_i32_1 = arith.constant 0 : i32
    return %c0_i32, %c0_i32_0 : i32, i32
  }
  func.func @transform_8(%arg0: i32) -> (i32, i32) {
    %c0_i32 = arith.constant 0 : i32
    %c0_i32_0 = arith.constant 0 : i32
    %c0_i32_1 = arith.constant 0 : i32
    return %c0_i32, %c0_i32_0 : i32, i32
  }
  func.func @transform_9(%arg0: i32) -> (i32, i32) {
    %c0_i32 = arith.constant 0 : i32
    %c0_i32_0 = arith.constant 0 : i32
    return %arg0, %c0_i32 : i32, i32
  }
}

module attributes {stable_mosaic.version = 11 : i64} {
  func.func @attn_fused_kernel(%arg0: i32, %arg1: memref<1x16x64xbf16, #tpu.memory_space<vmem>>, %arg2: memref<1x16x64xbf16, #tpu.memory_space<vmem>>, %arg3: memref<1x16x64xbf16, #tpu.memory_space<vmem>>, %arg4: memref<1x4x16x16xf32, #tpu.memory_space<vmem>>, %arg5: memref<1x64xbf16, #tpu.memory_space<vmem>>, %arg6: memref<1x16x64xf32, #tpu.memory_space<vmem>>, %arg7: memref<64x64xbf16, #tpu.memory_space<vmem>>, %arg8: memref<1x64xf32, #tpu.memory_space<vmem>>, %arg9: memref<1x16x64xf32, #tpu.memory_space<vmem>>) attributes {dimension_semantics = [#tpu.dimension_semantics<parallel>], iteration_bounds = array<i64: 2>, scalar_prefetch = 0 : i64, scratch_operands = 0 : i64, tpu.core_type = #tpu.core_type<tc>, window_params = [{transform_indices = @transform_0, window_bounds = array<i64: 1, 16, 64>}, {transform_indices = @transform_1, window_bounds = array<i64: 1, 16, 64>}, {transform_indices = @transform_2, window_bounds = array<i64: 1, 16, 64>}, {transform_indices = @transform_3, window_bounds = array<i64: 1, 4, 16, 16>}, {pipeline_mode = #tpu.pipeline_mode<synchronous>, transform_indices = @transform_4, window_bounds = array<i64: 1, 64>}, {transform_indices = @transform_5, window_bounds = array<i64: 1, 16, 64>}, {pipeline_mode = #tpu.pipeline_mode<synchronous>, transform_indices = @transform_6, window_bounds = array<i64: 64, 64>}, {pipeline_mode = #tpu.pipeline_mode<synchronous>, transform_indices = @transform_7, window_bounds = array<i64: 1, 64>}, {transform_indices = @transform_8, window_bounds = array<i64: 1, 16, 64>}]} {
    %c0 = arith.constant 0 : index
    %c0_0 = arith.constant 0 : index
    %c0_1 = arith.constant 0 : index
    %0 = vector.load %arg1[%c0, %c0_0, %c0_1] : memref<1x16x64xbf16, #tpu.memory_space<vmem>>, vector<1x16x64xbf16>
    %1 = vector.shape_cast %0 : vector<1x16x64xbf16> to vector<16x64xbf16>
    %c0_2 = arith.constant 0 : index
    %c0_3 = arith.constant 0 : index
    %c0_4 = arith.constant 0 : index
    %2 = vector.load %arg2[%c0_2, %c0_3, %c0_4] : memref<1x16x64xbf16, #tpu.memory_space<vmem>>, vector<1x16x64xbf16>
    %3 = vector.shape_cast %2 : vector<1x16x64xbf16> to vector<16x64xbf16>
    %c0_5 = arith.constant 0 : index
    %c0_6 = arith.constant 0 : index
    %c0_7 = arith.constant 0 : index
    %4 = vector.load %arg3[%c0_5, %c0_6, %c0_7] : memref<1x16x64xbf16, #tpu.memory_space<vmem>>, vector<1x16x64xbf16>
    %5 = vector.shape_cast %4 : vector<1x16x64xbf16> to vector<16x64xbf16>
    %c0_8 = arith.constant 0 : index
    %c0_9 = arith.constant 0 : index
    %6 = vector.load %arg5[%c0_8, %c0_9] : memref<1x64xbf16, #tpu.memory_space<vmem>>, vector<1x64xbf16>
    %cst = arith.constant 0.000000e+00 : f32
    %7 = vector.broadcast %cst : f32 to vector<16x64xf32>
    %8 = vector.extract_strided_slice %1 {offsets = [0, 0], sizes = [16, 16], strides = [1, 1]} : vector<16x64xbf16> to vector<16x16xbf16>
    %9 = vector.extract_strided_slice %6 {offsets = [0, 0], sizes = [1, 16], strides = [1, 1]} : vector<1x64xbf16> to vector<1x16xbf16>
    %10 = vector.broadcast %9 : vector<1x16xbf16> to vector<16x16xbf16>
    %11 = arith.addf %8, %10 : vector<16x16xbf16>
    %12 = vector.extract_strided_slice %3 {offsets = [0, 0], sizes = [16, 16], strides = [1, 1]} : vector<16x64xbf16> to vector<16x16xbf16>
    "tpu.trace_start"() <{level = 10 : i32, message = "qd,kd->qk"}> : () -> ()
    %cst_10 = arith.constant dense<0.000000e+00> : vector<16x16xf32>
    %13 = tpu.matmul %11, %12, %cst_10 {dimension_numbers = #tpu.dot_dimension_numbers<[1], [1], [0], [0], [0, 0, 1, 0], [], []>} : vector<16x16xbf16>, vector<16x16xbf16>, vector<16x16xf32> -> vector<16x16xf32>
    "tpu.trace_stop"() : () -> ()
    %c0_11 = arith.constant 0 : index
    %c0_12 = arith.constant 0 : index
    %c0_13 = arith.constant 0 : index
    %c0_14 = arith.constant 0 : index
    %14 = vector.load %arg4[%c0_11, %c0_12, %c0_13, %c0_14] : memref<1x4x16x16xf32, #tpu.memory_space<vmem>>, vector<1x1x16x16xf32>
    %15 = vector.shape_cast %14 : vector<1x1x16x16xf32> to vector<16x16xf32>
    %16 = arith.addf %13, %15 : vector<16x16xf32>
    %cst_15 = arith.constant 1.250000e-01 : f32
    %17 = vector.broadcast %cst_15 : f32 to vector<16x16xf32>
    %18 = arith.mulf %16, %17 : vector<16x16xf32>
    %cst_16 = arith.constant dense<0xFF800000> : vector<16xf32>
    %19 = vector.multi_reduction <maximumf>, %18, %cst_16 [1] : vector<16x16xf32> to vector<16xf32>
    %20 = vector.shape_cast %19 : vector<16xf32> to vector<16x1xf32>
    %21 = vector.broadcast %20 : vector<16x1xf32> to vector<16x16xf32>
    %22 = arith.subf %18, %21 : vector<16x16xf32>
    %23 = math.exp %22 : vector<16x16xf32>
    %cst_17 = arith.constant dense<0.000000e+00> : vector<16xf32>
    %24 = vector.multi_reduction <add>, %23, %cst_17 [1] : vector<16x16xf32> to vector<16xf32>
    %25 = vector.shape_cast %24 : vector<16xf32> to vector<16x1xf32>
    %26 = tpu.reciprocal %25 {approx = true} : vector<16x1xf32> -> vector<16x1xf32>
    %27 = vector.broadcast %26 : vector<16x1xf32> to vector<16x16xf32>
    %28 = arith.mulf %23, %27 : vector<16x16xf32>
    %29 = arith.truncf %28 : vector<16x16xf32> to vector<16x16xbf16>
    %30 = vector.extract_strided_slice %5 {offsets = [0, 0], sizes = [16, 16], strides = [1, 1]} : vector<16x64xbf16> to vector<16x16xbf16>
    %cst_18 = arith.constant dense<0.000000e+00> : vector<16x16xf32>
    %31 = tpu.matmul %29, %30, %cst_18 {dimension_numbers = #tpu.dot_dimension_numbers<[1], [0], [0], [1], [0, 0, 1, 1], [], []>} : vector<16x16xbf16>, vector<16x16xbf16>, vector<16x16xf32> -> vector<16x16xf32>
    %32 = arith.truncf %31 : vector<16x16xf32> to vector<16x16xbf16>
    %c0_19 = arith.constant 0 : index
    %c0_20 = arith.constant 0 : index
    %33 = vector.load %arg7[%c0_19, %c0_20] : memref<64x64xbf16, #tpu.memory_space<vmem>>, vector<16x64xbf16>
    %cst_21 = arith.constant dense<0.000000e+00> : vector<16x64xf32>
    %34 = tpu.matmul %32, %33, %cst_21 {dimension_numbers = #tpu.dot_dimension_numbers<[1], [0], [0], [1], [0, 0, 1, 1], [], []>} : vector<16x16xbf16>, vector<16x64xbf16>, vector<16x64xf32> -> vector<16x64xf32>
    %35 = arith.addf %7, %34 : vector<16x64xf32>
    %36 = vector.extract_strided_slice %1 {offsets = [0, 16], sizes = [16, 16], strides = [1, 1]} : vector<16x64xbf16> to vector<16x16xbf16>
    %37 = vector.extract_strided_slice %6 {offsets = [0, 16], sizes = [1, 16], strides = [1, 1]} : vector<1x64xbf16> to vector<1x16xbf16>
    %38 = vector.broadcast %37 : vector<1x16xbf16> to vector<16x16xbf16>
    %39 = arith.addf %36, %38 : vector<16x16xbf16>
    %40 = vector.extract_strided_slice %3 {offsets = [0, 16], sizes = [16, 16], strides = [1, 1]} : vector<16x64xbf16> to vector<16x16xbf16>
    "tpu.trace_start"() <{level = 10 : i32, message = "qd,kd->qk"}> : () -> ()
    %cst_22 = arith.constant dense<0.000000e+00> : vector<16x16xf32>
    %41 = tpu.matmul %39, %40, %cst_22 {dimension_numbers = #tpu.dot_dimension_numbers<[1], [1], [0], [0], [0, 0, 1, 0], [], []>} : vector<16x16xbf16>, vector<16x16xbf16>, vector<16x16xf32> -> vector<16x16xf32>
    "tpu.trace_stop"() : () -> ()
    %c0_23 = arith.constant 0 : index
    %c1 = arith.constant 1 : index
    %c0_24 = arith.constant 0 : index
    %c0_25 = arith.constant 0 : index
    %42 = vector.load %arg4[%c0_23, %c1, %c0_24, %c0_25] : memref<1x4x16x16xf32, #tpu.memory_space<vmem>>, vector<1x1x16x16xf32>
    %43 = vector.shape_cast %42 : vector<1x1x16x16xf32> to vector<16x16xf32>
    %44 = arith.addf %41, %43 : vector<16x16xf32>
    %cst_26 = arith.constant 1.250000e-01 : f32
    %45 = vector.broadcast %cst_26 : f32 to vector<16x16xf32>
    %46 = arith.mulf %44, %45 : vector<16x16xf32>
    %cst_27 = arith.constant dense<0xFF800000> : vector<16xf32>
    %47 = vector.multi_reduction <maximumf>, %46, %cst_27 [1] : vector<16x16xf32> to vector<16xf32>
    %48 = vector.shape_cast %47 : vector<16xf32> to vector<16x1xf32>
    %49 = vector.broadcast %48 : vector<16x1xf32> to vector<16x16xf32>
    %50 = arith.subf %46, %49 : vector<16x16xf32>
    %51 = math.exp %50 : vector<16x16xf32>
    %cst_28 = arith.constant dense<0.000000e+00> : vector<16xf32>
    %52 = vector.multi_reduction <add>, %51, %cst_28 [1] : vector<16x16xf32> to vector<16xf32>
    %53 = vector.shape_cast %52 : vector<16xf32> to vector<16x1xf32>
    %54 = tpu.reciprocal %53 {approx = true} : vector<16x1xf32> -> vector<16x1xf32>
    %55 = vector.broadcast %54 : vector<16x1xf32> to vector<16x16xf32>
    %56 = arith.mulf %51, %55 : vector<16x16xf32>
    %57 = arith.truncf %56 : vector<16x16xf32> to vector<16x16xbf16>
    %58 = vector.extract_strided_slice %5 {offsets = [0, 16], sizes = [16, 16], strides = [1, 1]} : vector<16x64xbf16> to vector<16x16xbf16>
    %cst_29 = arith.constant dense<0.000000e+00> : vector<16x16xf32>
    %59 = tpu.matmul %57, %58, %cst_29 {dimension_numbers = #tpu.dot_dimension_numbers<[1], [0], [0], [1], [0, 0, 1, 1], [], []>} : vector<16x16xbf16>, vector<16x16xbf16>, vector<16x16xf32> -> vector<16x16xf32>
    %60 = arith.truncf %59 : vector<16x16xf32> to vector<16x16xbf16>
    %c16 = arith.constant 16 : index
    %c0_30 = arith.constant 0 : index
    %61 = vector.load %arg7[%c16, %c0_30] : memref<64x64xbf16, #tpu.memory_space<vmem>>, vector<16x64xbf16>
    %cst_31 = arith.constant dense<0.000000e+00> : vector<16x64xf32>
    %62 = tpu.matmul %60, %61, %cst_31 {dimension_numbers = #tpu.dot_dimension_numbers<[1], [0], [0], [1], [0, 0, 1, 1], [], []>} : vector<16x16xbf16>, vector<16x64xbf16>, vector<16x64xf32> -> vector<16x64xf32>
    %63 = arith.addf %35, %62 : vector<16x64xf32>
    %64 = vector.extract_strided_slice %1 {offsets = [0, 32], sizes = [16, 16], strides = [1, 1]} : vector<16x64xbf16> to vector<16x16xbf16>
    %65 = vector.extract_strided_slice %6 {offsets = [0, 32], sizes = [1, 16], strides = [1, 1]} : vector<1x64xbf16> to vector<1x16xbf16>
    %66 = vector.broadcast %65 : vector<1x16xbf16> to vector<16x16xbf16>
    %67 = arith.addf %64, %66 : vector<16x16xbf16>
    %68 = vector.extract_strided_slice %3 {offsets = [0, 32], sizes = [16, 16], strides = [1, 1]} : vector<16x64xbf16> to vector<16x16xbf16>
    "tpu.trace_start"() <{level = 10 : i32, message = "qd,kd->qk"}> : () -> ()
    %cst_32 = arith.constant dense<0.000000e+00> : vector<16x16xf32>
    %69 = tpu.matmul %67, %68, %cst_32 {dimension_numbers = #tpu.dot_dimension_numbers<[1], [1], [0], [0], [0, 0, 1, 0], [], []>} : vector<16x16xbf16>, vector<16x16xbf16>, vector<16x16xf32> -> vector<16x16xf32>
    "tpu.trace_stop"() : () -> ()
    %c0_33 = arith.constant 0 : index
    %c2 = arith.constant 2 : index
    %c0_34 = arith.constant 0 : index
    %c0_35 = arith.constant 0 : index
    %70 = vector.load %arg4[%c0_33, %c2, %c0_34, %c0_35] : memref<1x4x16x16xf32, #tpu.memory_space<vmem>>, vector<1x1x16x16xf32>
    %71 = vector.shape_cast %70 : vector<1x1x16x16xf32> to vector<16x16xf32>
    %72 = arith.addf %69, %71 : vector<16x16xf32>
    %cst_36 = arith.constant 1.250000e-01 : f32
    %73 = vector.broadcast %cst_36 : f32 to vector<16x16xf32>
    %74 = arith.mulf %72, %73 : vector<16x16xf32>
    %cst_37 = arith.constant dense<0xFF800000> : vector<16xf32>
    %75 = vector.multi_reduction <maximumf>, %74, %cst_37 [1] : vector<16x16xf32> to vector<16xf32>
    %76 = vector.shape_cast %75 : vector<16xf32> to vector<16x1xf32>
    %77 = vector.broadcast %76 : vector<16x1xf32> to vector<16x16xf32>
    %78 = arith.subf %74, %77 : vector<16x16xf32>
    %79 = math.exp %78 : vector<16x16xf32>
    %cst_38 = arith.constant dense<0.000000e+00> : vector<16xf32>
    %80 = vector.multi_reduction <add>, %79, %cst_38 [1] : vector<16x16xf32> to vector<16xf32>
    %81 = vector.shape_cast %80 : vector<16xf32> to vector<16x1xf32>
    %82 = tpu.reciprocal %81 {approx = true} : vector<16x1xf32> -> vector<16x1xf32>
    %83 = vector.broadcast %82 : vector<16x1xf32> to vector<16x16xf32>
    %84 = arith.mulf %79, %83 : vector<16x16xf32>
    %85 = arith.truncf %84 : vector<16x16xf32> to vector<16x16xbf16>
    %86 = vector.extract_strided_slice %5 {offsets = [0, 32], sizes = [16, 16], strides = [1, 1]} : vector<16x64xbf16> to vector<16x16xbf16>
    %cst_39 = arith.constant dense<0.000000e+00> : vector<16x16xf32>
    %87 = tpu.matmul %85, %86, %cst_39 {dimension_numbers = #tpu.dot_dimension_numbers<[1], [0], [0], [1], [0, 0, 1, 1], [], []>} : vector<16x16xbf16>, vector<16x16xbf16>, vector<16x16xf32> -> vector<16x16xf32>
    %88 = arith.truncf %87 : vector<16x16xf32> to vector<16x16xbf16>
    %c32 = arith.constant 32 : index
    %c0_40 = arith.constant 0 : index
    %89 = vector.load %arg7[%c32, %c0_40] : memref<64x64xbf16, #tpu.memory_space<vmem>>, vector<16x64xbf16>
    %cst_41 = arith.constant dense<0.000000e+00> : vector<16x64xf32>
    %90 = tpu.matmul %88, %89, %cst_41 {dimension_numbers = #tpu.dot_dimension_numbers<[1], [0], [0], [1], [0, 0, 1, 1], [], []>} : vector<16x16xbf16>, vector<16x64xbf16>, vector<16x64xf32> -> vector<16x64xf32>
    %91 = arith.addf %63, %90 : vector<16x64xf32>
    %92 = vector.extract_strided_slice %1 {offsets = [0, 48], sizes = [16, 16], strides = [1, 1]} : vector<16x64xbf16> to vector<16x16xbf16>
    %93 = vector.extract_strided_slice %6 {offsets = [0, 48], sizes = [1, 16], strides = [1, 1]} : vector<1x64xbf16> to vector<1x16xbf16>
    %94 = vector.broadcast %93 : vector<1x16xbf16> to vector<16x16xbf16>
    %95 = arith.addf %92, %94 : vector<16x16xbf16>
    %96 = vector.extract_strided_slice %3 {offsets = [0, 48], sizes = [16, 16], strides = [1, 1]} : vector<16x64xbf16> to vector<16x16xbf16>
    "tpu.trace_start"() <{level = 10 : i32, message = "qd,kd->qk"}> : () -> ()
    %cst_42 = arith.constant dense<0.000000e+00> : vector<16x16xf32>
    %97 = tpu.matmul %95, %96, %cst_42 {dimension_numbers = #tpu.dot_dimension_numbers<[1], [1], [0], [0], [0, 0, 1, 0], [], []>} : vector<16x16xbf16>, vector<16x16xbf16>, vector<16x16xf32> -> vector<16x16xf32>
    "tpu.trace_stop"() : () -> ()
    %c0_43 = arith.constant 0 : index
    %c3 = arith.constant 3 : index
    %c0_44 = arith.constant 0 : index
    %c0_45 = arith.constant 0 : index
    %98 = vector.load %arg4[%c0_43, %c3, %c0_44, %c0_45] : memref<1x4x16x16xf32, #tpu.memory_space<vmem>>, vector<1x1x16x16xf32>
    %99 = vector.shape_cast %98 : vector<1x1x16x16xf32> to vector<16x16xf32>
    %100 = arith.addf %97, %99 : vector<16x16xf32>
    %cst_46 = arith.constant 1.250000e-01 : f32
    %101 = vector.broadcast %cst_46 : f32 to vector<16x16xf32>
    %102 = arith.mulf %100, %101 : vector<16x16xf32>
    %cst_47 = arith.constant dense<0xFF800000> : vector<16xf32>
    %103 = vector.multi_reduction <maximumf>, %102, %cst_47 [1] : vector<16x16xf32> to vector<16xf32>
    %104 = vector.shape_cast %103 : vector<16xf32> to vector<16x1xf32>
    %105 = vector.broadcast %104 : vector<16x1xf32> to vector<16x16xf32>
    %106 = arith.subf %102, %105 : vector<16x16xf32>
    %107 = math.exp %106 : vector<16x16xf32>
    %cst_48 = arith.constant dense<0.000000e+00> : vector<16xf32>
    %108 = vector.multi_reduction <add>, %107, %cst_48 [1] : vector<16x16xf32> to vector<16xf32>
    %109 = vector.shape_cast %108 : vector<16xf32> to vector<16x1xf32>
    %110 = tpu.reciprocal %109 {approx = true} : vector<16x1xf32> -> vector<16x1xf32>
    %111 = vector.broadcast %110 : vector<16x1xf32> to vector<16x16xf32>
    %112 = arith.mulf %107, %111 : vector<16x16xf32>
    %113 = arith.truncf %112 : vector<16x16xf32> to vector<16x16xbf16>
    %114 = vector.extract_strided_slice %5 {offsets = [0, 48], sizes = [16, 16], strides = [1, 1]} : vector<16x64xbf16> to vector<16x16xbf16>
    %cst_49 = arith.constant dense<0.000000e+00> : vector<16x16xf32>
    %115 = tpu.matmul %113, %114, %cst_49 {dimension_numbers = #tpu.dot_dimension_numbers<[1], [0], [0], [1], [0, 0, 1, 1], [], []>} : vector<16x16xbf16>, vector<16x16xbf16>, vector<16x16xf32> -> vector<16x16xf32>
    %116 = arith.truncf %115 : vector<16x16xf32> to vector<16x16xbf16>
    %c48 = arith.constant 48 : index
    %c0_50 = arith.constant 0 : index
    %117 = vector.load %arg7[%c48, %c0_50] : memref<64x64xbf16, #tpu.memory_space<vmem>>, vector<16x64xbf16>
    %cst_51 = arith.constant dense<0.000000e+00> : vector<16x64xf32>
    %118 = tpu.matmul %116, %117, %cst_51 {dimension_numbers = #tpu.dot_dimension_numbers<[1], [0], [0], [1], [0, 0, 1, 1], [], []>} : vector<16x16xbf16>, vector<16x64xbf16>, vector<16x64xf32> -> vector<16x64xf32>
    %119 = arith.addf %91, %118 : vector<16x64xf32>
    %c0_52 = arith.constant 0 : index
    %c0_53 = arith.constant 0 : index
    %c0_54 = arith.constant 0 : index
    %120 = vector.load %arg6[%c0_52, %c0_53, %c0_54] : memref<1x16x64xf32, #tpu.memory_space<vmem>>, vector<1x16x64xf32>
    %121 = vector.shape_cast %120 : vector<1x16x64xf32> to vector<16x64xf32>
    %122 = arith.addf %121, %119 : vector<16x64xf32>
    %c0_55 = arith.constant 0 : index
    %c0_56 = arith.constant 0 : index
    %123 = vector.load %arg8[%c0_55, %c0_56] : memref<1x64xf32, #tpu.memory_space<vmem>>, vector<1x64xf32>
    %124 = vector.broadcast %123 : vector<1x64xf32> to vector<16x64xf32>
    %125 = arith.addf %122, %124 : vector<16x64xf32>
    %c0_57 = arith.constant 0 : index
    %c0_58 = arith.constant 0 : index
    %c0_59 = arith.constant 0 : index
    %126 = vector.load %arg9[%c0_57, %c0_58, %c0_59] : memref<1x16x64xf32, #tpu.memory_space<vmem>>, vector<1x16x64xf32>
    %127 = vector.shape_cast %126 : vector<1x16x64xf32> to vector<16x64xf32>
    %128 = vector.shape_cast %125 : vector<16x64xf32> to vector<1x16x64xf32>
    tpu.vector_store %arg9[%c0_57, %c0_58, %c0_59], %128 {strides = array<i32>} : memref<1x16x64xf32, #tpu.memory_space<vmem>>, vector<1x16x64xf32>,
    return
  }
  func.func @transform_0(%arg0: i32) -> (i32, i32, i32) {
    %c0_i32 = arith.constant 0 : i32
    %c0_i32_0 = arith.constant 0 : i32
    %c0_i32_1 = arith.constant 0 : i32
    return %arg0, %c0_i32, %c0_i32_0 : i32, i32, i32
  }
  func.func @transform_1(%arg0: i32) -> (i32, i32, i32) {
    %c0_i32 = arith.constant 0 : i32
    %c0_i32_0 = arith.constant 0 : i32
    %c0_i32_1 = arith.constant 0 : i32
    return %arg0, %c0_i32, %c0_i32_0 : i32, i32, i32
  }
  func.func @transform_2(%arg0: i32) -> (i32, i32, i32) {
    %c0_i32 = arith.constant 0 : i32
    %c0_i32_0 = arith.constant 0 : i32
    %c0_i32_1 = arith.constant 0 : i32
    return %arg0, %c0_i32, %c0_i32_0 : i32, i32, i32
  }
  func.func @transform_3(%arg0: i32) -> (i32, i32, i32, i32) {
    %c0_i32 = arith.constant 0 : i32
    %c0_i32_0 = arith.constant 0 : i32
    %c0_i32_1 = arith.constant 0 : i32
    %c0_i32_2 = arith.constant 0 : i32
    return %arg0, %c0_i32, %c0_i32_0, %c0_i32_1 : i32, i32, i32, i32
  }
  func.func @transform_4(%arg0: i32) -> (i32, i32) {
    %c0_i32 = arith.constant 0 : i32
    %c0_i32_0 = arith.constant 0 : i32
    %c0_i32_1 = arith.constant 0 : i32
    return %c0_i32, %c0_i32_0 : i32, i32
  }
  func.func @transform_5(%arg0: i32) -> (i32, i32, i32) {
    %c0_i32 = arith.constant 0 : i32
    %c0_i32_0 = arith.constant 0 : i32
    %c0_i32_1 = arith.constant 0 : i32
    return %arg0, %c0_i32, %c0_i32_0 : i32, i32, i32
  }
  func.func @transform_6(%arg0: i32) -> (i32, i32) {
    %c0_i32 = arith.constant 0 : i32
    %c0_i32_0 = arith.constant 0 : i32
    %c0_i32_1 = arith.constant 0 : i32
    return %c0_i32, %c0_i32_0 : i32, i32
  }
  func.func @transform_7(%arg0: i32) -> (i32, i32) {
    %c0_i32 = arith.constant 0 : i32
    %c0_i32_0 = arith.constant 0 : i32
    %c0_i32_1 = arith.constant 0 : i32
    return %c0_i32, %c0_i32_0 : i32, i32
  }
  func.func @transform_8(%arg0: i32) -> (i32, i32, i32) {
    %c0_i32 = arith.constant 0 : i32
    %c0_i32_0 = arith.constant 0 : i32
    %c0_i32_1 = arith.constant 0 : i32
    return %arg0, %c0_i32, %c0_i32_0 : i32, i32, i32
  }
}

</mosaic_0001>

<bundles_post_ra>
// kernel: conformer_block_forward.5
= control target key start
LH: loop header
LB: loop body
LE: loop exit
PB: predicated region body
PF: predicated region fallthrough
CT: control target
= control target key end

     0   :  { %vm33_vm0 = vcmask 523264   ;;  %v606_v29 = vmov 0   ;;  %s806_s0 = inlined_call_operand.vmem [shape: f32[32,64], index: 0, kind: input, shape index: {}]   ;;  %s807_s3 = inlined_call_operand.vmem [shape: bf16[64,256], index: 3, kind: input, shape index: {}]   ;;  %s808_s1 = inlined_call_operand.vmem [shape: f32[1,64], index: 1, kind: input, shape index: {}]   ;;  %s809_s2 = inlined_call_operand.vmem [shape: f32[1,64], index: 2, kind: input, shape index: {}]   ;;  %s810_s5 = inlined_call_operand.vmem [shape: bf16[256,64], index: 5, kind: input, shape index: {}]   ;;  %s811_s4 = inlined_call_operand.vmem [shape: f32[1,256], index: 4, kind: input, shape index: {}]   ;;  %s812_s6 = inlined_call_operand.vmem [shape: f32[1,64], index: 6, kind: input, shape index: {}]   ;;  %s813_s7 = inlined_call_operand.vmem [shape: f32[32,64], index: 7, kind: output, shape index: {}]  }
   0x1   :  { %v650_v0 = vld [vmem:[%s806_s0] sm:$0xff]  ;;  %v655_v1 = vld [vmem:[%s806_s0 + $0x10] sm:$0xff]  ;;  %v660_v2 = vld [vmem:[%s806_s0 + $0x8] sm:$0xff]  ;;  %207 = vmatprep.mubr.bf16.mxu0 %v606_v29 }
   0x2   :  { %v34_v3 = vsel %vm33_vm0, %v650_v0, 0.0  ;;  %v40_v4 = vsel %vm33_vm0, %v655_v1, 0.0  ;;  %v669_v5 = vld [vmem:[%s806_s0 + $0x18] sm:$0xff]  ;;  %v37_v6 = vsel %vm33_vm0, %v660_v2, 0.0  ;;  %v541_v31 = vld [vmem:[%s807_s3 + $0x24] ss:$8 sps:$4 sm:$0xff]  }
   0x3   :  { %35 = vadd.xlane.f32.xlu0 %v34_v3  ;;  %41 = vadd.xlane.f32.xlu1 %v40_v4  ;;  %v43_v7 = vsel %vm33_vm0, %v669_v5, 0.0  ;;  %v538_v28 = vld [vmem:[%s807_s3 + $0x34] ss:$8 sps:$4 sm:$0xff]   ;;  %v540_v30 = vld [vmem:[%s807_s3 + $0x30] ss:$8 sps:$4 sm:$0xff]  }
   0x4   :  { %183 = vmatprep.subr.bf16.mxu0 %v538_v28  ;;  %v543_v32 = vld [vmem:[%s807_s3 + $0x20] ss:$8 sps:$4 sm:$0xff]   ;;  %v544_v33 = vld [vmem:[%s807_s3 + $0x14] ss:$8 sps:$4 sm:$0xff]   ;;  %v546_v34 = vld [vmem:[%s807_s3 + $0x10] ss:$8 sps:$4 sm:$0xff]  }
   0x5   :  { %184 = vmatpush1.bf16.msra.mxu0 %v540_v30  ;;  %v547_v35 = vld [vmem:[%s807_s3 + $0x4] ss:$8 sps:$4 sm:$0xff]   ;;  %v549_v36 = vld [vmem:[%s807_s3] ss:$8 sps:$4 sm:$0xff]  }
   0x6   :  { %185 = vmatprep.subr.bf16.mxu0 %v541_v31  ;;  %v480_v51 = vld [vmem:[%s808_s1] ss:$0 sm:$0xff] }
   0x7   :  { %38 = vadd.xlane.f32.xlu0 %v37_v6  ;;  %44 = vadd.xlane.f32.xlu1 %v43_v7  ;;  %v481_v56 = vld [vmem:[%s809_s2] ss:$0 sm:$0xff] }
   0x8   :  { %v117_v28 = vld [vmem:[%s811_s4] sm:$0x3] }
   0x9   :  { %186 = vmatpush1.bf16.msra.mxu0 %v543_v32 }
   0xa   :  { %187 = vmatprep.subr.bf16.mxu0 %v544_v33 }
   0xd   :  { %188 = vmatpush1.bf16.msra.mxu0 %v546_v34 }
   0xe   :  { %189 = vmatprep.subr.bf16.mxu0 %v547_v35 }
  0x11   :  { %190 = vmatpush1.bf16.msra.mxu0 %v549_v36 }
  0x8c   :  { %v36_v8 = vpop.xlane.xlu0 %35  ;;  %v42_v9 = vpop.xlane.xlu1 %41 }
  0x8d   :  { %v47_v10 = vmul.f32 0.015625, %v36_v8  ;;  %v49_v11 = vmul.f32 0.015625, %v42_v9  ;;  %v550_v9 = vld [vmem:[%s810_s5 + $0x78] sm:$0xff]  }
  0x8e   :  { %509 = vmatprep.subr.bf16.mxu1 %v550_v9 }
  0x8f   :  { %v51_v12 = vsub.f32 %v650_v0, %v47_v10  ;;  %v677_v13 = vsub.f32 %v655_v1, %v49_v11  ;;  %v551_v10 = vld [vmem:[%s810_s5 + $0x38] sm:$0xff]   ;;  %v552_v11 = vld [vmem:[%s810_s5 + $0x70] sm:$0xff]  }
  0x90   :  { %v39_v14 = vpop.xlane.xlu0 %38  ;;  %v45_v15 = vpop.xlane.xlu1 %44  ;;  %510 = vmatpush3.bf16.msra.mxu1 %v551_v10 }
  0x91   :  { %v48_v16 = vmul.f32 0.015625, %v39_v14  ;;  %v50_v17 = vmul.f32 0.015625, %v45_v15  ;;  %v55_v18 = vmul.f32 %v51_v12, %v51_v12  ;;  %v57_v19 = vmul.f32 %v677_v13, %v677_v13  ;;  %511 = vmatprep.subr.bf16.mxu1 %v552_v11  ;;  %v555_v14 = vld [vmem:[%s810_s5 + $0x28] sm:$0xff]   ;;  %v556_v15 = vld [vmem:[%s810_s5 + $0x60] sm:$0xff]  }
  0x93   :  { %v52_v20 = vsub.f32 %v660_v2, %v48_v16  ;;  %v54_v21 = vsub.f32 %v669_v5, %v50_v17  ;;  %v59_v22 = vsel %vm33_vm0, %v55_v18, 0.0  ;;  %v65_v23 = vsel %vm33_vm0, %v57_v19, 0.0  ;;  %v557_v16 = vld [vmem:[%s810_s5 + $0x20] sm:$0xff]   ;;  %v558_v17 = vld [vmem:[%s810_s5 + $0x58] sm:$0xff]   ;;  %v560_v19 = vld [vmem:[%s810_s5 + $0x50] sm:$0xff]  }
  0x94   :  { %60 = vadd.xlane.f32.xlu0 %v59_v22  ;;  %v559_v18 = vld [vmem:[%s810_s5 + $0x18] sm:$0xff]   ;;  %v563_v22 = vld [vmem:[%s810_s5 + $0x8] sm:$0xff]  }
  0x95   :  { %v56_v24 = vmul.f32 %v52_v20, %v52_v20  ;;  %v58_v25 = vmul.f32 %v54_v21, %v54_v21 }
  0x97   :  { %v62_v26 = vsel %vm33_vm0, %v56_v24, 0.0  ;;  %v68_v27 = vsel %vm33_vm0, %v58_v25, 0.0  ;;  %v565_v24 = vld [vmem:[%s810_s5] sm:$0xff]   ;;  %v119_v25 = vlaneseq }
  0x98   :  { %66 = vadd.xlane.f32.xlu0 %v65_v23  ;;  %63 = vadd.xlane.f32.xlu1 %v62_v26  ;;  %v564_v23 = vld [vmem:[%s810_s5 + $0x40] sm:$0xff]  }
  0x99   :  { %v120_v26 = vshrl.u32 %v119_v25, 7 }
  0x9c   :  { %69 = vadd.xlane.f32.xlu1 %v68_v27  ;;  %v121_v27 = vsub.s32 0, %v120_v26 }
  0x9e   :  { %v122_v30 = vrot.slane %v117_v28, %v121_v27 }
 0x11d   :  { %v61_v37 = vpop.xlane.xlu0 %60 }
 0x11e   :  { %v71_v38 = vmul.f32 0.015625, %v61_v37 }
 0x120   :  { %v75_v39 = vadd.f32 1e-05, %v71_v38 }
 0x121   :  { %v64_v40 = vpop.xlane.xlu1 %63  ;;  %v67_v41 = vpop.xlane.xlu0 %66 }
 0x122   :  { %566 = vrsqrt.f32 %v75_v39  ;;  %v72_v42 = vmul.f32 0.015625, %v64_v40  ;;  %v73_v43 = vmul.f32 0.015625, %v67_v41 }
 0x124   :  { %v76_v44 = vadd.f32 1e-05, %v72_v42  ;;  %v77_v45 = vadd.f32 1e-05, %v73_v43 }
 0x125   :  { %v70_v46 = vpop.xlane.xlu1 %69 }
 0x126   :  { %568 = vrsqrt.f32 %v76_v44  ;;  %v74_v47 = vmul.f32 0.015625, %v70_v46 }
 0x127   :  { %570 = vrsqrt.f32 %v77_v45 }
 0x128   :  { %v78_v48 = vadd.f32 1e-05, %v74_v47 }
 0x12a   :  { %572 = vrsqrt.f32 %v78_v48 }
 0x12f   :  { %v567_v49 = vpop.eup %566 }
 0x130   :  { %v83_v50 = vmul.f32 %v567_v49, %v51_v12  ;;  %v553_v12 = vld [vmem:[%s810_s5 + $0x30] sm:$0xff]  }
 0x131   :  { %512 = vmatpush3.bf16.msra.mxu1 %v553_v12 }
 0x132   :  { %v93_v54 = vmul.f32 %v480_v51, %v83_v50 }
 0x133   :  { %v569_v52 = vpop.eup %568 }
 0x134   :  { %v84_v53 = vmul.f32 %v569_v52, %v52_v20  ;;  %v571_v55 = vpop.eup %570  ;;  %v103_v59 = vadd.f32 %v481_v56, %v93_v54  ;;  %v561_v20 = vld [vmem:[%s810_s5 + $0x10] sm:$0xff]  }
 0x135   :  { %v85_v61 = vmul.f32 %v571_v55, %v677_v13  ;;  %v554_v13 = vld [vmem:[%s810_s5 + $0x68] sm:$0xff]  }
 0x136   :  { %v94_v57 = vmul.f32 %v480_v51, %v84_v53  ;;  %513 = vmatprep.subr.bf16.mxu1 %v554_v13 }
 0x137   :  { %v573_v58 = vpop.eup %572  ;;  %v95_v4 = vmul.f32 %v480_v51, %v85_v61  ;;  %514 = vmatpush3.bf16.msra.mxu1 %v555_v14 }
 0x138   :  { %v104_v60 = vadd.f32 %v481_v56, %v94_v57  ;;  %v86_v62 = vmul.f32 %v573_v58, %v54_v21  ;;  %515 = vmatprep.subr.bf16.mxu1 %v556_v15  ;;  %v562_v21 = vld [vmem:[%s810_s5 + $0x48] sm:$0xff]  }
 0x139   :  { %v105_v7 = vadd.f32 %v481_v56, %v95_v4 }
 0x13a   :  { %v107_v63 = vpack.c.bf16 %v104_v60, %v103_v59  ;;  %v96_v3 = vmul.f32 %v480_v51, %v86_v62 }
 0x13b   :  { %516 = vmatpush3.bf16.msra.mxu1 %v557_v16 }
 0x13c   :  { %490 = vmatmul.mubr.msk.bf16.vlgmr.msra.gmra.mxu0 %vm33_vm0, %v107_v63  ;;  %v106_v6 = vadd.f32 %v481_v56, %v96_v3  ;;  %517 = vmatprep.subr.bf16.mxu1 %v558_v17 }
 0x13d   :  { %217 = vmatprep.mubr.bf16.mxu0 %v606_v29  ;;  %v125_v29 = vsub.s32 1, %v120_v26 }
 0x13e   :  { %v108_v8 = vpack.c.bf16 %v106_v6, %v105_v7 }
 0x13f   :  { %518 = vmatpush3.bf16.msra.mxu1 %v559_v18  ;;  %v126_v31 = vrot.slane %v117_v28, %v125_v29 }
 0x140   :  { %519 = vmatprep.subr.bf16.mxu1 %v560_v19 }
 0x143   :  { %520 = vmatpush3.bf16.msra.mxu1 %v561_v20 }
 0x144   :  { %491 = vmatmul.mubr.msk.bf16.gmra.mxu0 %vm33_vm0, %v108_v8  ;;  %521 = vmatprep.subr.bf16.mxu1 %v562_v21 }
 0x147   :  { %522 = vmatpush3.bf16.msra.mxu1 %v563_v22 }
 0x148   :  { %523 = vmatprep.subr.bf16.mxu1 %v564_v23 }
 0x14b   :  { %524 = vmatpush3.bf16.msra.mxu1 %v565_v24 }
 0x1fc   :  { %v209_v32 = vpop.f32.mrf.mxu0 }
 0x1fd   :  { %v771_v33 = vadd.f32 %v209_v32, %v122_v30 }
 0x1fe   :  { %v211_v34 = vpop.f32.mrf.mxu0 }
 0x1ff   :  { %v228_v35 = vsub.f32 0.0, %v771_v33  ;;  %v774_v36 = vadd.f32 %v211_v34, %v126_v31 }
 0x200   :  { %v213_v37 = vpop.f32.mrf.mxu0 }
 0x201   :  { %v236_v38 = vmul.f32 1.442695, %v228_v35  ;;  %v229_v39 = vsub.f32 0.0, %v774_v36  ;;  %v214_v40 = vadd.f32 %v213_v37, %v122_v30 }
 0x202   :  { %v215_v41 = vpop.f32.mrf.mxu0 }
 0x203   :  { %v238_v42 = vmul.f32 1.442695, %v229_v39  ;;  %v230_v43 = vsub.f32 0.0, %v214_v40  ;;  %v216_v44 = vadd.f32 %v215_v41, %v126_v31  ;;  %574 = vpow2.f32 %v236_v38 }
 0x204   :  { %v219_v45 = vpop.f32.mrf.mxu0 }
 0x205   :  { %576 = vpow2.f32 %v238_v42  ;;  %v240_v46 = vmul.f32 1.442695, %v230_v43  ;;  %v231_v47 = vsub.f32 0.0, %v216_v44  ;;  %v777_v48 = vadd.f32 %v219_v45, %v122_v30 }
 0x206   :  { %v221_v49 = vpop.f32.mrf.mxu0 }
 0x207   :  { %578 = vpow2.f32 %v240_v46  ;;  %v242_v50 = vmul.f32 1.442695, %v231_v47  ;;  %v232_v51 = vsub.f32 0.0, %v777_v48  ;;  %v222_v52 = vadd.f32 %v221_v49, %v126_v31 }
 0x208   :  { %v223_v53 = vpop.f32.mrf.mxu0 }
 0x209   :  { %580 = vpow2.f32 %v242_v50  ;;  %v244_v54 = vmul.f32 1.442695, %v232_v51  ;;  %v233_v55 = vsub.f32 0.0, %v222_v52  ;;  %v224_v56 = vadd.f32 %v223_v53, %v122_v30 }
 0x20a   :  { %v225_v57 = vpop.f32.mrf.mxu0 }
 0x20b   :  { %v246_v58 = vmul.f32 1.442695, %v233_v55  ;;  %v234_v59 = vsub.f32 0.0, %v224_v56  ;;  %v226_v60 = vadd.f32 %v225_v57, %v126_v31  ;;  %582 = vpow2.f32 %v244_v54 }
 0x20d   :  { %584 = vpow2.f32 %v246_v58  ;;  %v248_v61 = vmul.f32 1.442695, %v234_v59  ;;  %v235_v62 = vsub.f32 0.0, %v226_v60 }
 0x20f   :  { %586 = vpow2.f32 %v248_v61  ;;  %v250_v63 = vmul.f32 1.442695, %v235_v62 }
 0x210   :  { %v575_v3 = vpop.eup %574 }
 0x211   :  { %588 = vpow2.f32 %v250_v63  ;;  %v252_v8 = vadd.f32 1.0, %v575_v3 }
 0x212   :  { %v577_v4 = vpop.eup %576 }
 0x213   :  { %v253_v6 = vadd.f32 1.0, %v577_v4 }
 0x214   :  { %v579_v7 = vpop.eup %578 }
 0x215   :  { %v254_v9 = vadd.f32 1.0, %v579_v7  ;;  %590 = vrcp.f32 %v253_v6 }
 0x216   :  { %v581_v10 = vpop.eup %580 }
 0x217   :  { %592 = vrcp.f32 %v254_v9  ;;  %v255_v11 = vadd.f32 1.0, %v581_v10 }
 0x218   :  { %594 = vrcp.f32 %v252_v8  ;;  %v583_v12 = vpop.eup %582 }
 0x219   :  { %596 = vrcp.f32 %v255_v11  ;;  %v256_v16 = vadd.f32 1.0, %v583_v12 }
 0x21a   :  { %v585_v13 = vpop.eup %584 }
 0x21b   :  { %v257_v14 = vadd.f32 1.0, %v585_v13 }
 0x21c   :  { %v587_v15 = vpop.eup %586 }
 0x21d   :  { %v258_v17 = vadd.f32 1.0, %v587_v15  ;;  %598 = vrcp.f32 %v257_v14 }
 0x21e   :  { %v589_v18 = vpop.eup %588 }
 0x21f   :  { %600 = vrcp.f32 %v258_v17  ;;  %v259_v19 = vadd.f32 1.0, %v589_v18 }
 0x220   :  { %602 = vrcp.f32 %v256_v16 }
 0x221   :  { %604 = vrcp.f32 %v259_v19 }
 0x222   :  { %v591_v20 = vpop.eup %590 }
 0x223   :  { %v269_v25 = vmul.f32 %v591_v20, %v774_v36 }
 0x224   :  { %v593_v21 = vpop.eup %592 }
 0x225   :  { %v595_v22 = vpop.eup %594  ;;  %v270_v24 = vmul.f32 %v593_v21, %v214_v40 }
 0x226   :  { %v597_v23 = vpop.eup %596  ;;  %v268_v27 = vmul.f32 %v595_v22, %v771_v33  ;;  %v492_v33 = vld [vmem:[%s812_s6] ss:$0 sm:$0xff] }
 0x227   :  { %v271_v26 = vmul.f32 %v597_v23, %v216_v44 }
 0x228   :  { %v276_v29 = vpack.c.bf16 %v270_v24, %v268_v27 }
 0x229   :  { %v277_v28 = vpack.c.bf16 %v271_v26, %v269_v25 }
 0x22a   :  { %v599_v30 = vpop.eup %598 }
 0x22b   :  { %447 = vmatprep.mubr.bf16.mxu1 %v277_v28  ;;  %v273_v37 = vmul.f32 %v599_v30, %v222_v52 }
 0x22c   :  { %v601_v31 = vpop.eup %600  ;;  %448 = vmatmul.mubr.bf16.vlgmr.msra.gmra.mxu1 %v276_v29 }
 0x22d   :  { %v603_v32 = vpop.eup %602  ;;  %v274_v35 = vmul.f32 %v601_v31, %v224_v56 }
 0x22e   :  { %v605_v34 = vpop.eup %604  ;;  %v272_v39 = vmul.f32 %v603_v32, %v777_v48 }
 0x22f   :  { %v275_v38 = vmul.f32 %v605_v34, %v226_v60 }
 0x230   :  { %v278_v40 = vpack.c.bf16 %v274_v35, %v272_v39 }
 0x231   :  { %v279_v41 = vpack.c.bf16 %v275_v38, %v273_v37 }
 0x233   :  { %455 = vmatprep.mubr.bf16.mxu1 %v279_v41 }
 0x234   :  { %456 = vmatmul.mubr.bf16.gmra.mxu1 %v278_v40 }
 0x2ec   :  { %v525_v36 = vpop.f32.mrf.mxu1 }
 0x2ee   :  { %v526_v42 = vpop.f32.mrf.mxu1 }
 0x2ef   :  { %v527_v43 = vadd.f32 %v526_v42, %v525_v36 }
 0x2f0   :  { %v528_v44 = vpop.f32.mrf.mxu1 }
 0x2f1   :  { %v450_v45 = vadd.f32 %v527_v43, %v492_v33 }
 0x2f2   :  { %v529_v46 = vpop.f32.mrf.mxu1 }
 0x2f3   :  { %v464_v47 = vmul.f32 0.5, %v450_v45  ;;  %v530_v49 = vadd.f32 %v529_v46, %v528_v44 }
 0x2f4   :  { %v531_v50 = vpop.f32.mrf.mxu1 }
 0x2f5   :  { %v468_v51 = vadd.f32 %v464_v47, %v650_v0  ;;  %v453_v48 = vadd.f32 %v530_v49, %v492_v33 }
 0x2f6   :  { %v532_v52 = vpop.f32.mrf.mxu1 }
 0x2f7   :  { %472 = vst.msk [vmem:[%s813_s7] sm:$0xff] %vm33_vm0, %v468_v51  ;;  %v465_v53 = vmul.f32 0.5, %v453_v48  ;;  %v533_v54 = vadd.f32 %v532_v52, %v531_v50 }
 0x2f8   :  { %v534_v55 = vpop.f32.mrf.mxu1 }
 0x2f9   :  { %v469_v56 = vadd.f32 %v465_v53, %v660_v2  ;;  %v458_v57 = vadd.f32 %v533_v54, %v492_v33 }
 0x2fa   :  { %v535_v58 = vpop.f32.mrf.mxu1 }
 0x2fb   :  { %473 = vst.msk [vmem:[%s813_s7 + $0x8] sm:$0xff] %vm33_vm0, %v469_v56  ;;  %v466_v0 = vmul.f32 0.5, %v458_v57  ;;  %v536_v59 = vadd.f32 %v535_v58, %v534_v55 }
 0x2fd   :  { %v470_v60 = vadd.f32 %v466_v0, %v655_v1  ;;  %v461_v61 = vadd.f32 %v536_v59, %v492_v33 }
 0x2ff   :  { %474 = vst.msk [vmem:[%s813_s7 + $0x10] sm:$0xff] %vm33_vm0, %v470_v60  ;;  %v467_v62 = vmul.f32 0.5, %v461_v61 }
 0x301   :  { %v471_v2 = vadd.f32 %v467_v62, %v669_v5 }
 0x303   :  { %475 = vst.msk [vmem:[%s813_s7 + $0x18] sm:$0xff] %vm33_vm0, %v471_v2 }

// kernel: conformer_block_forward.6
= control target key start
LH: loop header
LB: loop body
LE: loop exit
PB: predicated region body
PF: predicated region fallthrough
CT: control target
= control target key end

     0   :  { %vm42_vm0 = vcmask 523264   ;;  %vm228_vm1 = vcmask 519168   ;;  %s787_s0 = inlined_call_operand.vmem [shape: f32[32,64], index: 0, kind: input, shape index: {}]   ;;  %s788_s3 = inlined_call_operand.vmem [shape: bf16[64,64], index: 3, kind: input, shape index: {}]   ;;  %s789_s5 = inlined_call_operand.vmem [shape: bf16[64,64], index: 5, kind: input, shape index: {}]   ;;  %s790_s7 = inlined_call_operand.vmem [shape: bf16[64,64], index: 7, kind: input, shape index: {}]   ;;  %s791_s1 = inlined_call_operand.vmem [shape: f32[1,64], index: 1, kind: input, shape index: {}]   ;;  %s792_s2 = inlined_call_operand.vmem [shape: f32[1,64], index: 2, kind: input, shape index: {}]   ;;  %s793_s4 = inlined_call_operand.vmem [shape: f32[1,64], index: 4, kind: input, shape index: {}]   ;;  %s794_s6 = inlined_call_operand.vmem [shape: f32[1,64], index: 6, kind: input, shape index: {}]   ;;  %s795_s9 = inlined_call_operand.vmem [shape: bf16[32,64], index: 9, kind: output, shape index: {0}]   ;;  %s796_s10 = inlined_call_operand.vmem [shape: bf16[32,64], index: 10, kind: output, shape index: {1}]   ;;  %s797_s8 = inlined_call_operand.vmem [shape: f32[1,64], index: 8, kind: input, shape index: {}]   ;;  %s798_s11 = inlined_call_operand.vmem [shape: bf16[32,64], index: 11, kind: output, shape index: {2}]  }
   0x1   :  { %v36_v0 = vld [vmem:[%s787_s0] sm:$0xff]  ;;  %v38_v1 = vld [vmem:[%s787_s0 + $0x10] sm:$0xff]  ;;  %v37_v2 = vld [vmem:[%s787_s0 + $0x8] sm:$0xff] }
   0x2   :  { %v43_v3 = vsel %vm42_vm0, %v36_v0, 0.0  ;;  %v49_v4 = vsel %vm42_vm0, %v38_v1, 0.0  ;;  %v39_v5 = vld [vmem:[%s787_s0 + $0x18] sm:$0xff]  ;;  %v46_v6 = vsel %vm42_vm0, %v37_v2, 0.0  ;;  %v564_v30 = vld [vmem:[%s788_s3 + $0x10] sm:$0xff]   ;;  %v566_v32 = vld [vmem:[%s788_s3 + $0x8] sm:$0xff]  }
   0x3   :  { %44 = vadd.xlane.f32.xlu0 %v43_v3  ;;  %50 = vadd.xlane.f32.xlu1 %v49_v4  ;;  %v52_v7 = vsel %vm42_vm0, %v39_v5, 0.0  ;;  %v562_v28 = vld [vmem:[%s788_s3 + $0x18] sm:$0xff]   ;;  %v565_v31 = vld [vmem:[%s789_s5 + $0x10] sm:$0xff]   ;;  %v567_v33 = vld [vmem:[%s789_s5 + $0x8] sm:$0xff]  }
   0x4   :  { %v563_v29 = vld [vmem:[%s789_s5 + $0x18] sm:$0xff]   ;;  %526 = vmatprep.subr.bf16.mxu0 %v562_v28  ;;  %v568_v34 = vld [vmem:[%s788_s3] sm:$0xff]  }
   0x5   :  { %527 = vmatpush3.bf16.msra.mxu0 %v562_v28  ;;  %538 = vmatprep.subr.bf16.mxu1 %v563_v29  ;;  %v569_v35 = vld [vmem:[%s789_s5] sm:$0xff]   ;;  %v570_v36 = vld [vmem:[%s790_s7 + $0x18] sm:$0xff]  }
   0x6   :  { %539 = vmatpush3.bf16.msra.mxu1 %v563_v29  ;;  %528 = vmatprep.subr.bf16.mxu0 %v564_v30  ;;  %v461_v51 = vld [vmem:[%s791_s1] ss:$0 sm:$0xff] }
   0x7   :  { %47 = vadd.xlane.f32.xlu0 %v46_v6  ;;  %53 = vadd.xlane.f32.xlu1 %v52_v7  ;;  %v462_v56 = vld [vmem:[%s792_s2] ss:$0 sm:$0xff]  ;;  %v572_v6 = vld [vmem:[%s790_s7 + $0x8] sm:$0xff]  }
   0x8   :  { %540 = vmatprep.subr.bf16.mxu1 %v565_v31  ;;  %v573_v7 = vld [vmem:[%s790_s7] sm:$0xff]  }
   0x9   :  { %529 = vmatpush3.bf16.msra.mxu0 %v564_v30 }
   0xa   :  { %541 = vmatpush3.bf16.msra.mxu1 %v565_v31  ;;  %530 = vmatprep.subr.bf16.mxu0 %v566_v32 }
   0xb   :  { %542 = vmatprep.subr.bf16.mxu1 %v567_v33 }
   0xd   :  { %531 = vmatpush3.bf16.msra.mxu0 %v566_v32 }
   0xe   :  { %543 = vmatpush3.bf16.msra.mxu1 %v567_v33  ;;  %532 = vmatprep.subr.bf16.mxu0 %v568_v34 }
   0xf   :  { %544 = vmatprep.subr.bf16.mxu1 %v569_v35 }
  0x11   :  { %533 = vmatpush3.bf16.msra.mxu0 %v568_v34  ;;  %v485_v34 = vld [vmem:[%s797_s8] ss:$0 sm:$0xff] }
  0x12   :  { %545 = vmatpush3.bf16.msra.mxu1 %v569_v35  ;;  %550 = vmatprep.subr.bf16.mxu0 %v570_v36 }
  0x8c   :  { %v45_v8 = vpop.xlane.xlu0 %44  ;;  %v51_v9 = vpop.xlane.xlu1 %50 }
  0x8d   :  { %v56_v10 = vmul.f32 0.015625, %v45_v8  ;;  %v58_v11 = vmul.f32 0.015625, %v51_v9  ;;  %v463_v8 = vld [vmem:[%s793_s4] ss:$0 sm:$0xff] }
  0x8e   :  { %v474_v9 = vld [vmem:[%s794_s6] ss:$0 sm:$0xff] }
  0x8f   :  { %v658_v12 = vsub.f32 %v36_v0, %v56_v10  ;;  %v660_v13 = vsub.f32 %v38_v1, %v58_v11 }
  0x90   :  { %v48_v14 = vpop.xlane.xlu0 %47  ;;  %v54_v15 = vpop.xlane.xlu1 %53 }
  0x91   :  { %v57_v16 = vmul.f32 0.015625, %v48_v14  ;;  %v59_v17 = vmul.f32 0.015625, %v54_v15  ;;  %v64_v18 = vmul.f32 %v658_v12, %v658_v12  ;;  %v66_v19 = vmul.f32 %v660_v13, %v660_v13 }
  0x93   :  { %v666_v20 = vsub.f32 %v37_v2, %v57_v16  ;;  %v668_v21 = vsub.f32 %v39_v5, %v59_v17  ;;  %v68_v22 = vsel %vm42_vm0, %v64_v18, 0.0  ;;  %v74_v23 = vsel %vm42_vm0, %v66_v19, 0.0  ;;  %v571_v5 = vld [vmem:[%s790_s7 + $0x10] sm:$0xff]  }
  0x94   :  { %69 = vadd.xlane.f32.xlu0 %v68_v22 }
  0x95   :  { %v65_v24 = vmul.f32 %v666_v20, %v666_v20  ;;  %v67_v25 = vmul.f32 %v668_v21, %v668_v21 }
  0x97   :  { %v71_v26 = vsel %vm42_vm0, %v65_v24, 0.0  ;;  %v77_v27 = vsel %vm42_vm0, %v67_v25, 0.0 }
  0x98   :  { %75 = vadd.xlane.f32.xlu0 %v74_v23  ;;  %72 = vadd.xlane.f32.xlu1 %v71_v26 }
  0x9c   :  { %78 = vadd.xlane.f32.xlu1 %v77_v27 }
 0x11d   :  { %v70_v37 = vpop.xlane.xlu0 %69 }
 0x11e   :  { %v80_v38 = vmul.f32 0.015625, %v70_v37 }
 0x120   :  { %v84_v39 = vadd.f32 1e-05, %v80_v38 }
 0x121   :  { %v73_v40 = vpop.xlane.xlu1 %72  ;;  %v76_v41 = vpop.xlane.xlu0 %75 }
 0x122   :  { %574 = vrsqrt.f32 %v84_v39  ;;  %v81_v42 = vmul.f32 0.015625, %v73_v40  ;;  %v82_v43 = vmul.f32 0.015625, %v76_v41 }
 0x124   :  { %v85_v44 = vadd.f32 1e-05, %v81_v42  ;;  %v86_v45 = vadd.f32 1e-05, %v82_v43 }
 0x125   :  { %v79_v46 = vpop.xlane.xlu1 %78 }
 0x126   :  { %576 = vrsqrt.f32 %v85_v44  ;;  %v83_v47 = vmul.f32 0.015625, %v79_v46 }
 0x127   :  { %578 = vrsqrt.f32 %v86_v45 }
 0x128   :  { %v87_v48 = vadd.f32 1e-05, %v83_v47 }
 0x12a   :  { %580 = vrsqrt.f32 %v87_v48 }
 0x12f   :  { %v575_v49 = vpop.eup %574 }
 0x130   :  { %v92_v50 = vmul.f32 %v575_v49, %v658_v12 }
 0x132   :  { %v102_v55 = vmul.f32 %v461_v51, %v92_v50 }
 0x133   :  { %v577_v52 = vpop.eup %576 }
 0x134   :  { %v579_v53 = vpop.eup %578  ;;  %v93_v54 = vmul.f32 %v577_v52, %v666_v20  ;;  %v112_v60 = vadd.f32 %v462_v56, %v102_v55 }
 0x135   :  { %v94_v57 = vmul.f32 %v579_v53, %v660_v13 }
 0x136   :  { %v103_v58 = vmul.f32 %v461_v51, %v93_v54 }
 0x137   :  { %v581_v59 = vpop.eup %580  ;;  %v104_v63 = vmul.f32 %v461_v51, %v94_v57 }
 0x138   :  { %v113_v61 = vadd.f32 %v462_v56, %v103_v58  ;;  %v95_v62 = vmul.f32 %v581_v59, %v668_v21 }
 0x139   :  { %v114_v2 = vadd.f32 %v462_v56, %v104_v63 }
 0x13a   :  { %v116_v0 = vpack.c.bf16 %v113_v61, %v112_v60  ;;  %v105_v1 = vmul.f32 %v461_v51, %v95_v62 }
 0x13c   :  { %534 = vmatprep.mubr.msk.bf16.mxu0 %vm42_vm0, %v116_v0  ;;  %546 = vmatprep.mubr.msk.bf16.mxu1 %vm42_vm0, %v116_v0  ;;  %v115_v3 = vadd.f32 %v462_v56, %v105_v1 }
 0x13e   :  { %v117_v4 = vpack.c.bf16 %v115_v3, %v114_v2 }
 0x140   :  { %535 = vmatmul.mubr.msk.bf16.vlgmr.msra.gmra.mxu0 %vm42_vm0, %v117_v4  ;;  %547 = vmatmul.mubr.msk.bf16.vlgmr.msra.gmra.mxu1 %vm42_vm0, %v117_v4 }
 0x141   :  { %551 = vmatpush3.bf16.msra.mxu0 %v570_v36  ;;  %558 = vmatprep.mubr.msk.bf16.mxu0 %vm42_vm0, %v116_v0 }
 0x142   :  { %552 = vmatprep.subr.bf16.mxu0 %v571_v5 }
 0x145   :  { %553 = vmatpush3.bf16.msra.mxu0 %v571_v5 }
 0x146   :  { %554 = vmatprep.subr.bf16.mxu0 %v572_v6 }
 0x149   :  { %555 = vmatpush3.bf16.msra.mxu0 %v572_v6 }
 0x14a   :  { %556 = vmatprep.subr.bf16.mxu0 %v573_v7 }
 0x14d   :  { %557 = vmatpush3.bf16.msra.mxu0 %v573_v7 }
 0x150   :  { %559 = vmatmul.mubr.msk.bf16.vlgmr.msra.gmra.mxu0 %vm42_vm0, %v117_v4 }
 0x200   :  { %v536_v10 = vpop.f32.mrf.mxu0  ;;  %v548_v11 = vpop.f32.mrf.mxu1 }
 0x201   :  { %v206_v12 = vadd.f32 %v536_v10, %v463_v8  ;;  %v315_v13 = vadd.f32 %v548_v11, %v474_v9 }
 0x202   :  { %v197_v14 = vpop.f32.mrf.mxu0  ;;  %v306_v15 = vpop.f32.mrf.mxu1 }
 0x203   :  { %v498_v16 = vpack.c.bf16 %v206_v12, %v206_v12  ;;  %v502_v17 = vpack.c.bf16 %v315_v13, %v315_v13  ;;  %v198_v18 = vadd.f32 %v463_v8, %v197_v14  ;;  %v307_v19 = vadd.f32 %v474_v9, %v306_v15 }
 0x204   :  { %v537_v20 = vpop.f32.mrf.mxu0  ;;  %v549_v21 = vpop.f32.mrf.mxu1 }
 0x205   :  { %231 = vst.msk [vmem:[%s795_s9 + $0x8] sm:$0xf] %vm228_vm1, %v498_v16  ;;  %339 = vst.msk [vmem:[%s796_s10 + $0x8] sm:$0xf] %vm228_vm1, %v502_v17  ;;  %v496_v22 = vpack.c.bf16 %v198_v18, %v198_v18  ;;  %v500_v23 = vpack.c.bf16 %v307_v19, %v307_v19  ;;  %v209_v24 = vadd.f32 %v537_v20, %v463_v8 }
 0x206   :  { %v318_v25 = vadd.f32 %v549_v21, %v474_v9  ;;  %v200_v26 = vpop.f32.mrf.mxu0  ;;  %v309_v27 = vpop.f32.mrf.mxu1 }
 0x207   :  { %229 = vst.msk [vmem:[%s795_s9] sm:$0xf] %vm228_vm1, %v496_v22  ;;  %337 = vst.msk [vmem:[%s796_s10] sm:$0xf] %vm228_vm1, %v500_v23  ;;  %v499_v28 = vpack.c.bf16 %v209_v24, %v209_v24  ;;  %v201_v30 = vadd.f32 %v463_v8, %v200_v26  ;;  %v310_v31 = vadd.f32 %v474_v9, %v309_v27 }
 0x208   :  { %v503_v29 = vpack.c.bf16 %v318_v25, %v318_v25 }
 0x209   :  { %232 = vst.msk [vmem:[%s795_s9 + $0xc] sm:$0xf] %vm228_vm1, %v499_v28  ;;  %v497_v32 = vpack.c.bf16 %v201_v30, %v201_v30  ;;  %v501_v33 = vpack.c.bf16 %v310_v31, %v310_v31 }
 0x20a   :  { %340 = vst.msk [vmem:[%s796_s10 + $0xc] sm:$0xf] %vm228_vm1, %v503_v29 }
 0x20b   :  { %230 = vst.msk [vmem:[%s795_s9 + $0x4] sm:$0xf] %vm228_vm1, %v497_v32  ;;  %338 = vst.msk [vmem:[%s796_s10 + $0x4] sm:$0xf] %vm228_vm1, %v501_v33 }
 0x210   :  { %v560_v35 = vpop.f32.mrf.mxu0 }
 0x211   :  { %v423_v36 = vadd.f32 %v560_v35, %v485_v34 }
 0x212   :  { %v414_v37 = vpop.f32.mrf.mxu0 }
 0x213   :  { %v506_v38 = vpack.c.bf16 %v423_v36, %v423_v36  ;;  %v415_v39 = vadd.f32 %v485_v34, %v414_v37 }
 0x214   :  { %v561_v40 = vpop.f32.mrf.mxu0 }
 0x215   :  { %447 = vst.msk [vmem:[%s798_s11 + $0x8] sm:$0xf] %vm228_vm1, %v506_v38  ;;  %v504_v41 = vpack.c.bf16 %v415_v39, %v415_v39  ;;  %v426_v42 = vadd.f32 %v561_v40, %v485_v34 }
 0x216   :  { %v417_v43 = vpop.f32.mrf.mxu0 }
 0x217   :  { %445 = vst.msk [vmem:[%s798_s11] sm:$0xf] %vm228_vm1, %v504_v41  ;;  %v507_v44 = vpack.c.bf16 %v426_v42, %v426_v42  ;;  %v418_v45 = vadd.f32 %v485_v34, %v417_v43 }
 0x219   :  { %448 = vst.msk [vmem:[%s798_s11 + $0xc] sm:$0xf] %vm228_vm1, %v507_v44  ;;  %v505_v46 = vpack.c.bf16 %v418_v45, %v418_v45 }
 0x21b   :  { %446 = vst.msk [vmem:[%s798_s11 + $0x4] sm:$0xf] %vm228_vm1, %v505_v46 }

// kernel: conformer_block_forward.9
= control target key start
LH: loop header
LB: loop body
LE: loop exit
PB: predicated region body
PF: predicated region fallthrough
CT: control target
= control target key end

     0   :  { %vm40_vm0 = vcmask 523264   ;;  %s952_s0 = inlined_call_operand.vmem [shape: f32[32,64], index: 0, kind: input, shape index: {}]   ;;  %s953_s1 = inlined_call_operand.vmem [shape: f32[1,64], index: 1, kind: input, shape index: {}]   ;;  %s954_s2 = inlined_call_operand.vmem [shape: f32[1,64], index: 2, kind: input, shape index: {}]   ;;  %s955_s3 = inlined_call_operand.vmem [shape: bf16[64,256], index: 3, kind: input, shape index: {}]   ;;  %s956_s4 = inlined_call_operand.vmem [shape: f32[1,256], index: 4, kind: input, shape index: {}]   ;;  %s957_s5 = inlined_call_operand.vmem [shape: bf16[256,64], index: 5, kind: input, shape index: {}]   ;;  %s958_s6 = inlined_call_operand.vmem [shape: f32[1,64], index: 6, kind: input, shape index: {}]   ;;  %s959_s7 = inlined_call_operand.vmem [shape: f32[1,64], index: 7, kind: input, shape index: {}]   ;;  %s960_s8 = inlined_call_operand.vmem [shape: f32[1,64], index: 8, kind: input, shape index: {}]   ;;  %s961_s9 = inlined_call_operand.hbm [shape: f32[32,64], index: 9, kind: output, shape index: {}]  }
   0x1   :  { %v791_v0 = vld [vmem:[%s952_s0] sm:$0xff]  ;;  %v796_v1 = vld [vmem:[%s952_s0 + $0x10] sm:$0xff]  ;;  %v801_v2 = vld [vmem:[%s952_s0 + $0x8] sm:$0xff] }
   0x2   :  { %v41_v3 = vsel %vm40_vm0, %v791_v0, 0.0  ;;  %v47_v4 = vsel %vm40_vm0, %v796_v1, 0.0  ;;  %v810_v5 = vld [vmem:[%s952_s0 + $0x18] sm:$0xff]  ;;  %v44_v6 = vsel %vm40_vm0, %v801_v2, 0.0 }
   0x3   :  { %42 = vadd.xlane.f32.xlu0 %v41_v3  ;;  %48 = vadd.xlane.f32.xlu1 %v47_v4  ;;  %v50_v7 = vsel %vm40_vm0, %v810_v5, 0.0 }
   0x7   :  { %45 = vadd.xlane.f32.xlu0 %v44_v6  ;;  %51 = vadd.xlane.f32.xlu1 %v50_v7 }
   0x8   :  { %14 = vsyncpa [#allocation3], 0  ;;  %v636_v28 = vld [vmem:[%s955_s3 + $0x34] ss:$8 sps:$4 sm:$0xff]   ;;  %v638_v29 = vld [vmem:[%s955_s3 + $0x30] ss:$8 sps:$4 sm:$0xff]  }
   0x9   :  { %v639_v30 = vld [vmem:[%s955_s3 + $0x24] ss:$8 sps:$4 sm:$0xff]   ;;  %190 = vmatprep.subr.bf16.mxu0 %v636_v28  ;;  %v641_v31 = vld [vmem:[%s955_s3 + $0x20] ss:$8 sps:$4 sm:$0xff]   ;;  %v734_v32 = vmov 0  }
   0xa   :  { %191 = vmatpush1.bf16.msra.mxu0 %v638_v29  ;;  %214 = vmatprep.mubr.bf16.mxu0 %v734_v32  ;;  %v642_v33 = vld [vmem:[%s955_s3 + $0x14] ss:$8 sps:$4 sm:$0xff]   ;;  %v644_v34 = vld [vmem:[%s955_s3 + $0x10] ss:$8 sps:$4 sm:$0xff]   ;;  %v645_v35 = vld [vmem:[%s955_s3 + $0x4] ss:$8 sps:$4 sm:$0xff]  }
   0xb   :  { %192 = vmatprep.subr.bf16.mxu0 %v639_v30  ;;  %v647_v36 = vld [vmem:[%s955_s3] ss:$8 sps:$4 sm:$0xff]  }
   0xc   :  { %v573_v51 = vld [vmem:[%s953_s1] ss:$0 sm:$0xff] }
   0xd   :  { %v574_v56 = vld [vmem:[%s954_s2] ss:$0 sm:$0xff] }
   0xe   :  { %193 = vmatpush1.bf16.msra.mxu0 %v641_v31  ;;  %v124_v28 = vld [vmem:[%s956_s4] sm:$0x3] }
   0xf   :  { %194 = vmatprep.subr.bf16.mxu0 %v642_v33 }
  0x12   :  { %195 = vmatpush1.bf16.msra.mxu0 %v644_v34 }
  0x13   :  { %196 = vmatprep.subr.bf16.mxu0 %v645_v35 }
  0x16   :  { %197 = vmatpush1.bf16.msra.mxu0 %v647_v36 }
  0x8c   :  { %v43_v8 = vpop.xlane.xlu0 %42  ;;  %v49_v9 = vpop.xlane.xlu1 %48 }
  0x8d   :  { %v54_v10 = vmul.f32 0.015625, %v43_v8  ;;  %v56_v11 = vmul.f32 0.015625, %v49_v9  ;;  %v648_v9 = vld [vmem:[%s957_s5 + $0x78] sm:$0xff]  }
  0x8e   :  { %604 = vmatprep.subr.bf16.mxu1 %v648_v9 }
  0x8f   :  { %v58_v12 = vsub.f32 %v791_v0, %v54_v10  ;;  %v818_v13 = vsub.f32 %v796_v1, %v56_v11  ;;  %v649_v10 = vld [vmem:[%s957_s5 + $0x38] sm:$0xff]   ;;  %v650_v11 = vld [vmem:[%s957_s5 + $0x70] sm:$0xff]  }
  0x90   :  { %v46_v14 = vpop.xlane.xlu0 %45  ;;  %v52_v15 = vpop.xlane.xlu1 %51  ;;  %605 = vmatpush3.bf16.msra.mxu1 %v649_v10 }
  0x91   :  { %v55_v16 = vmul.f32 0.015625, %v46_v14  ;;  %v57_v17 = vmul.f32 0.015625, %v52_v15  ;;  %v62_v18 = vmul.f32 %v58_v12, %v58_v12  ;;  %v64_v19 = vmul.f32 %v818_v13, %v818_v13  ;;  %606 = vmatprep.subr.bf16.mxu1 %v650_v11  ;;  %v653_v14 = vld [vmem:[%s957_s5 + $0x28] sm:$0xff]   ;;  %v654_v15 = vld [vmem:[%s957_s5 + $0x60] sm:$0xff]  }
  0x93   :  { %v59_v20 = vsub.f32 %v801_v2, %v55_v16  ;;  %v61_v21 = vsub.f32 %v810_v5, %v57_v17  ;;  %v66_v22 = vsel %vm40_vm0, %v62_v18, 0.0  ;;  %v72_v23 = vsel %vm40_vm0, %v64_v19, 0.0  ;;  %v655_v16 = vld [vmem:[%s957_s5 + $0x20] sm:$0xff]   ;;  %v656_v17 = vld [vmem:[%s957_s5 + $0x58] sm:$0xff]   ;;  %v658_v19 = vld [vmem:[%s957_s5 + $0x50] sm:$0xff]  }
  0x94   :  { %67 = vadd.xlane.f32.xlu0 %v66_v22  ;;  %v657_v18 = vld [vmem:[%s957_s5 + $0x18] sm:$0xff]   ;;  %v661_v22 = vld [vmem:[%s957_s5 + $0x8] sm:$0xff]  }
  0x95   :  { %v63_v24 = vmul.f32 %v59_v20, %v59_v20  ;;  %v65_v25 = vmul.f32 %v61_v21, %v61_v21 }
  0x97   :  { %v69_v26 = vsel %vm40_vm0, %v63_v24, 0.0  ;;  %v75_v27 = vsel %vm40_vm0, %v65_v25, 0.0  ;;  %v663_v24 = vld [vmem:[%s957_s5] sm:$0xff]   ;;  %v126_v25 = vlaneseq }
  0x98   :  { %73 = vadd.xlane.f32.xlu0 %v72_v23  ;;  %70 = vadd.xlane.f32.xlu1 %v69_v26  ;;  %v662_v23 = vld [vmem:[%s957_s5 + $0x40] sm:$0xff]  }
  0x99   :  { %v127_v26 = vshrl.u32 %v126_v25, 7 }
  0x9b   :  { %v132_v29 = vsub.s32 1, %v127_v26 }
  0x9c   :  { %76 = vadd.xlane.f32.xlu1 %v75_v27  ;;  %v128_v27 = vsub.s32 0, %v127_v26 }
  0x9d   :  { %v133_v31 = vrot.slane %v124_v28, %v132_v29 }
  0x9e   :  { %v129_v30 = vrot.slane %v124_v28, %v128_v27 }
 0x11d   :  { %v68_v37 = vpop.xlane.xlu0 %67 }
 0x11e   :  { %v78_v38 = vmul.f32 0.015625, %v68_v37 }
 0x120   :  { %v82_v39 = vadd.f32 1e-05, %v78_v38 }
 0x121   :  { %v71_v40 = vpop.xlane.xlu1 %70  ;;  %v74_v41 = vpop.xlane.xlu0 %73 }
 0x122   :  { %664 = vrsqrt.f32 %v82_v39  ;;  %v79_v42 = vmul.f32 0.015625, %v71_v40  ;;  %v80_v43 = vmul.f32 0.015625, %v74_v41 }
 0x124   :  { %v83_v44 = vadd.f32 1e-05, %v79_v42  ;;  %v84_v45 = vadd.f32 1e-05, %v80_v43 }
 0x125   :  { %v77_v46 = vpop.xlane.xlu1 %76 }
 0x126   :  { %666 = vrsqrt.f32 %v83_v44  ;;  %v81_v47 = vmul.f32 0.015625, %v77_v46 }
 0x127   :  { %668 = vrsqrt.f32 %v84_v45 }
 0x128   :  { %v85_v48 = vadd.f32 1e-05, %v81_v47 }
 0x12a   :  { %670 = vrsqrt.f32 %v85_v48 }
 0x12f   :  { %v665_v49 = vpop.eup %664 }
 0x130   :  { %v90_v50 = vmul.f32 %v665_v49, %v58_v12  ;;  %v651_v12 = vld [vmem:[%s957_s5 + $0x30] sm:$0xff]  }
 0x131   :  { %607 = vmatpush3.bf16.msra.mxu1 %v651_v12 }
 0x132   :  { %v100_v54 = vmul.f32 %v573_v51, %v90_v50 }
 0x133   :  { %v667_v52 = vpop.eup %666 }
 0x134   :  { %v91_v53 = vmul.f32 %v667_v52, %v59_v20  ;;  %v669_v55 = vpop.eup %668  ;;  %v110_v59 = vadd.f32 %v574_v56, %v100_v54  ;;  %v659_v20 = vld [vmem:[%s957_s5 + $0x10] sm:$0xff]  }
 0x135   :  { %v92_v61 = vmul.f32 %v669_v55, %v818_v13  ;;  %v652_v13 = vld [vmem:[%s957_s5 + $0x68] sm:$0xff]  }
 0x136   :  { %v101_v57 = vmul.f32 %v573_v51, %v91_v53  ;;  %608 = vmatprep.subr.bf16.mxu1 %v652_v13 }
 0x137   :  { %v671_v58 = vpop.eup %670  ;;  %v102_v4 = vmul.f32 %v573_v51, %v92_v61  ;;  %609 = vmatpush3.bf16.msra.mxu1 %v653_v14 }
 0x138   :  { %v111_v60 = vadd.f32 %v574_v56, %v101_v57  ;;  %v93_v62 = vmul.f32 %v671_v58, %v61_v21  ;;  %610 = vmatprep.subr.bf16.mxu1 %v654_v15  ;;  %v660_v21 = vld [vmem:[%s957_s5 + $0x48] sm:$0xff]  }
 0x139   :  { %v112_v7 = vadd.f32 %v574_v56, %v102_v4 }
 0x13a   :  { %v114_v63 = vpack.c.bf16 %v111_v60, %v110_v59  ;;  %v103_v3 = vmul.f32 %v573_v51, %v93_v62 }
 0x13b   :  { %611 = vmatpush3.bf16.msra.mxu1 %v655_v16 }
 0x13c   :  { %583 = vmatmul.mubr.msk.bf16.vlgmr.msra.gmra.mxu0 %vm40_vm0, %v114_v63  ;;  %v113_v6 = vadd.f32 %v574_v56, %v103_v3  ;;  %612 = vmatprep.subr.bf16.mxu1 %v656_v17 }
 0x13d   :  { %224 = vmatprep.mubr.bf16.mxu0 %v734_v32 }
 0x13e   :  { %v115_v8 = vpack.c.bf16 %v113_v6, %v112_v7 }
 0x13f   :  { %613 = vmatpush3.bf16.msra.mxu1 %v657_v18 }
 0x140   :  { %614 = vmatprep.subr.bf16.mxu1 %v658_v19 }
 0x143   :  { %615 = vmatpush3.bf16.msra.mxu1 %v659_v20 }
 0x144   :  { %584 = vmatmul.mubr.msk.bf16.gmra.mxu0 %vm40_vm0, %v115_v8  ;;  %616 = vmatprep.subr.bf16.mxu1 %v660_v21 }
 0x147   :  { %617 = vmatpush3.bf16.msra.mxu1 %v661_v22 }
 0x148   :  { %618 = vmatprep.subr.bf16.mxu1 %v662_v23 }
 0x14b   :  { %619 = vmatpush3.bf16.msra.mxu1 %v663_v24 }
 0x1fc   :  { %v216_v32 = vpop.f32.mrf.mxu0 }
 0x1fd   :  { %v912_v33 = vadd.f32 %v216_v32, %v129_v30 }
 0x1fe   :  { %v218_v34 = vpop.f32.mrf.mxu0 }
 0x1ff   :  { %v235_v35 = vsub.f32 0.0, %v912_v33  ;;  %v915_v36 = vadd.f32 %v218_v34, %v133_v31 }
 0x200   :  { %v220_v37 = vpop.f32.mrf.mxu0 }
 0x201   :  { %v243_v38 = vmul.f32 1.442695, %v235_v35  ;;  %v236_v39 = vsub.f32 0.0, %v915_v36  ;;  %v221_v40 = vadd.f32 %v220_v37, %v129_v30 }
 0x202   :  { %v222_v41 = vpop.f32.mrf.mxu0 }
 0x203   :  { %v245_v42 = vmul.f32 1.442695, %v236_v39  ;;  %v237_v43 = vsub.f32 0.0, %v221_v40  ;;  %v223_v44 = vadd.f32 %v222_v41, %v133_v31  ;;  %672 = vpow2.f32 %v243_v38 }
 0x204   :  { %v226_v45 = vpop.f32.mrf.mxu0 }
 0x205   :  { %674 = vpow2.f32 %v245_v42  ;;  %v247_v46 = vmul.f32 1.442695, %v237_v43  ;;  %v238_v47 = vsub.f32 0.0, %v223_v44  ;;  %v918_v48 = vadd.f32 %v226_v45, %v129_v30 }
 0x206   :  { %v228_v49 = vpop.f32.mrf.mxu0 }
 0x207   :  { %676 = vpow2.f32 %v247_v46  ;;  %v249_v50 = vmul.f32 1.442695, %v238_v47  ;;  %v239_v51 = vsub.f32 0.0, %v918_v48  ;;  %v229_v52 = vadd.f32 %v228_v49, %v133_v31 }
 0x208   :  { %v230_v53 = vpop.f32.mrf.mxu0 }
 0x209   :  { %678 = vpow2.f32 %v249_v50  ;;  %v251_v54 = vmul.f32 1.442695, %v239_v51  ;;  %v240_v55 = vsub.f32 0.0, %v229_v52  ;;  %v231_v56 = vadd.f32 %v230_v53, %v129_v30 }
 0x20a   :  { %v232_v57 = vpop.f32.mrf.mxu0 }
 0x20b   :  { %v253_v58 = vmul.f32 1.442695, %v240_v55  ;;  %v241_v59 = vsub.f32 0.0, %v231_v56  ;;  %v233_v60 = vadd.f32 %v232_v57, %v133_v31  ;;  %680 = vpow2.f32 %v251_v54 }
 0x20d   :  { %682 = vpow2.f32 %v253_v58  ;;  %v255_v61 = vmul.f32 1.442695, %v241_v59  ;;  %v242_v62 = vsub.f32 0.0, %v233_v60 }
 0x20f   :  { %684 = vpow2.f32 %v255_v61  ;;  %v257_v63 = vmul.f32 1.442695, %v242_v62 }
 0x210   :  { %v673_v3 = vpop.eup %672 }
 0x211   :  { %686 = vpow2.f32 %v257_v63  ;;  %v259_v8 = vadd.f32 1.0, %v673_v3 }
 0x212   :  { %v675_v4 = vpop.eup %674 }
 0x213   :  { %v260_v6 = vadd.f32 1.0, %v675_v4 }
 0x214   :  { %v677_v7 = vpop.eup %676 }
 0x215   :  { %v261_v9 = vadd.f32 1.0, %v677_v7  ;;  %688 = vrcp.f32 %v260_v6 }
 0x216   :  { %v679_v10 = vpop.eup %678 }
 0x217   :  { %690 = vrcp.f32 %v261_v9  ;;  %v262_v11 = vadd.f32 1.0, %v679_v10 }
 0x218   :  { %692 = vrcp.f32 %v259_v8  ;;  %v681_v12 = vpop.eup %680 }
 0x219   :  { %694 = vrcp.f32 %v262_v11  ;;  %v263_v16 = vadd.f32 1.0, %v681_v12 }
 0x21a   :  { %v683_v13 = vpop.eup %682 }
 0x21b   :  { %v264_v14 = vadd.f32 1.0, %v683_v13 }
 0x21c   :  { %v685_v15 = vpop.eup %684 }
 0x21d   :  { %v265_v17 = vadd.f32 1.0, %v685_v15  ;;  %696 = vrcp.f32 %v264_v14 }
 0x21e   :  { %v687_v18 = vpop.eup %686 }
 0x21f   :  { %698 = vrcp.f32 %v265_v17  ;;  %v266_v19 = vadd.f32 1.0, %v687_v18 }
 0x220   :  { %700 = vrcp.f32 %v263_v16 }
 0x221   :  { %702 = vrcp.f32 %v266_v19 }
 0x222   :  { %v689_v20 = vpop.eup %688 }
 0x223   :  { %v276_v25 = vmul.f32 %v689_v20, %v915_v36 }
 0x224   :  { %v691_v21 = vpop.eup %690 }
 0x225   :  { %v693_v22 = vpop.eup %692  ;;  %v277_v24 = vmul.f32 %v691_v21, %v221_v40 }
 0x226   :  { %v695_v23 = vpop.eup %694  ;;  %v275_v27 = vmul.f32 %v693_v22, %v912_v33  ;;  %v585_v33 = vld [vmem:[%s958_s6] ss:$0 sm:$0xff] }
 0x227   :  { %v278_v26 = vmul.f32 %v695_v23, %v223_v44 }
 0x228   :  { %v283_v29 = vpack.c.bf16 %v277_v24, %v275_v27 }
 0x229   :  { %v284_v28 = vpack.c.bf16 %v278_v26, %v276_v25 }
 0x22a   :  { %v697_v30 = vpop.eup %696 }
 0x22b   :  { %454 = vmatprep.mubr.bf16.mxu1 %v284_v28  ;;  %v280_v37 = vmul.f32 %v697_v30, %v229_v52 }
 0x22c   :  { %v699_v31 = vpop.eup %698  ;;  %455 = vmatmul.mubr.bf16.vlgmr.msra.gmra.mxu1 %v283_v29 }
 0x22d   :  { %v701_v32 = vpop.eup %700  ;;  %v281_v35 = vmul.f32 %v699_v31, %v231_v56 }
 0x22e   :  { %v703_v34 = vpop.eup %702  ;;  %v279_v39 = vmul.f32 %v701_v32, %v918_v48 }
 0x22f   :  { %v282_v38 = vmul.f32 %v703_v34, %v233_v60 }
 0x230   :  { %v285_v40 = vpack.c.bf16 %v281_v35, %v279_v39 }
 0x231   :  { %v286_v41 = vpack.c.bf16 %v282_v38, %v280_v37 }
 0x233   :  { %462 = vmatprep.mubr.bf16.mxu1 %v286_v41  ;;  %v602_v41 = vld [vmem:[%s959_s7] ss:$0 sm:$0xff]  ;;  %s735_s7 = smov [#allocation2]  }
 0x234   :  { %463 = vmatmul.mubr.bf16.gmra.mxu1 %v285_v40  ;;  %s562_s23 = sshll.u32 %s735_s7, 4  ;;  %s563_s23 = int_to_ptr.vmem [resolvable:$true] %s562_s23 }
 0x235   :  { %p717_p1 = scmp.lt.s32.totalorder %s563_s23, %s563_s23 }
 0x2ec   :  { %v620_v36 = vpop.f32.mrf.mxu1 }
 0x2ee   :  { %v621_v42 = vpop.f32.mrf.mxu1 }
 0x2ef   :  { %v622_v43 = vadd.f32 %v621_v42, %v620_v36  ;;  %v603_v36 = vld [vmem:[%s960_s8] ss:$0 sm:$0xff]  ;;  %s712_s8 = scalar_lea.vmem %s563_s23, 512 }
 0x2f0   :  { %v623_v44 = vpop.f32.mrf.mxu1  ;;  %p713_p0 = scmp.ne.s32.totalorder %s563_s23, %s712_s8  ;;  %p718_p2 = scmp.lt.s32.totalorder %s712_s8, %s712_s8 }
 0x2f1   :  { %v457_v45 = vadd.f32 %v622_v43, %v585_v33 }
 0x2f2   :  { %v624_v46 = vpop.f32.mrf.mxu1  ;;  %p719_p3 = por %p718_p2, %p717_p1 }
 0x2f3   :  { %v471_v47 = vmul.f32 0.5, %v457_v45  ;;  %v625_v49 = vadd.f32 %v624_v46, %v623_v44 }
 0x2f4   :  { %v626_v50 = vpop.f32.mrf.mxu1  ;;  %p720_p4 = pnand %p719_p3, %p713_p0 }
 0x2f5   :  { %v460_v51 = vadd.f32 %v625_v49, %v585_v33  ;;  %v475_v48 = vadd.f32 %v471_v47, %v791_v0 }
 0x2f6   :  { %v627_v52 = vpop.f32.mrf.mxu1 }
 0x2f7   :  { %v472_v53 = vmul.f32 0.5, %v460_v51  ;;  %v628_v54 = vadd.f32 %v627_v52, %v626_v50  ;;  %v481_v55 = vsel %vm40_vm0, %v475_v48, 0.0 }
 0x2f8   :  { %482 = vadd.xlane.f32.xlu0 %v481_v55  ;;  %v629_v56 = vpop.f32.mrf.mxu1 }
 0x2f9   :  { %v465_v57 = vadd.f32 %v628_v54, %v585_v33  ;;  %v476_v58 = vadd.f32 %v472_v53, %v801_v2 }
 0x2fa   :  { %v630_v59 = vpop.f32.mrf.mxu1 }
 0x2fb   :  { %v473_v60 = vmul.f32 0.5, %v465_v57  ;;  %v631_v61 = vadd.f32 %v630_v59, %v629_v56  ;;  %v484_v62 = vsel %vm40_vm0, %v476_v58, 0.0 }
 0x2fc   :  { %485 = vadd.xlane.f32.xlu1 %v484_v62 }
 0x2fd   :  { %v468_v63 = vadd.f32 %v631_v61, %v585_v33  ;;  %v477_v3 = vadd.f32 %v473_v60, %v796_v1 }
 0x2ff   :  { %v474_v0 = vmul.f32 0.5, %v468_v63  ;;  %v487_v4 = vsel %vm40_vm0, %v477_v3, 0.0 }
 0x300   :  { %488 = vadd.xlane.f32.xlu0 %v487_v4 }
 0x301   :  { %v478_v6 = vadd.f32 %v474_v0, %v810_v5 }
 0x303   :  { %v490_v7 = vsel %vm40_vm0, %v478_v6, 0.0 }
 0x304   :  { %491 = vadd.xlane.f32.xlu1 %v490_v7 }
 0x381   :  { %v483_v8 = vpop.xlane.xlu0 %482 }
 0x382   :  { %v493_v2 = vmul.f32 0.015625, %v483_v8 }
 0x384   :  { %v497_v9 = vsub.f32 %v475_v48, %v493_v2 }
 0x385   :  { %v486_v10 = vpop.xlane.xlu1 %485 }
 0x386   :  { %v494_v11 = vmul.f32 0.015625, %v486_v10  ;;  %v501_v12 = vmul.f32 %v497_v9, %v497_v9 }
 0x388   :  { %v498_v13 = vsub.f32 %v476_v58, %v494_v11  ;;  %v505_v14 = vsel %vm40_vm0, %v501_v12, 0.0 }
 0x389   :  { %506 = vadd.xlane.f32.xlu0 %v505_v14  ;;  %v489_v1 = vpop.xlane.xlu0 %488 }
 0x38a   :  { %v495_v15 = vmul.f32 0.015625, %v489_v1  ;;  %v502_v16 = vmul.f32 %v498_v13, %v498_v13 }
 0x38c   :  { %v499_v17 = vsub.f32 %v477_v3, %v495_v15  ;;  %v508_v18 = vsel %vm40_vm0, %v502_v16, 0.0 }
 0x38d   :  { %509 = vadd.xlane.f32.xlu1 %v508_v18  ;;  %v492_v5 = vpop.xlane.xlu1 %491 }
 0x38e   :  { %v496_v19 = vmul.f32 0.015625, %v492_v5  ;;  %v503_v20 = vmul.f32 %v499_v17, %v499_v17 }
 0x390   :  { %v500_v21 = vsub.f32 %v478_v6, %v496_v19  ;;  %v511_v22 = vsel %vm40_vm0, %v503_v20, 0.0 }
 0x391   :  { %512 = vadd.xlane.f32.xlu0 %v511_v22 }
 0x392   :  { %v504_v23 = vmul.f32 %v500_v21, %v500_v21 }
 0x394   :  { %v514_v24 = vsel %vm40_vm0, %v504_v23, 0.0 }
 0x395   :  { %515 = vadd.xlane.f32.xlu1 %v514_v24 }
 0x412   :  { %v507_v25 = vpop.xlane.xlu0 %506 }
 0x413   :  { %v517_v26 = vmul.f32 0.015625, %v507_v25 }
 0x415   :  { %v521_v27 = vadd.f32 1e-05, %v517_v26 }
 0x416   :  { %v510_v28 = vpop.xlane.xlu1 %509 }
 0x417   :  { %704 = vrsqrt.f32 %v521_v27  ;;  %v518_v29 = vmul.f32 0.015625, %v510_v28 }
 0x419   :  { %v522_v30 = vadd.f32 1e-05, %v518_v29 }
 0x41a   :  { %v513_v31 = vpop.xlane.xlu0 %512 }
 0x41b   :  { %706 = vrsqrt.f32 %v522_v30  ;;  %v519_v32 = vmul.f32 0.015625, %v513_v31 }
 0x41d   :  { %v523_v34 = vadd.f32 1e-05, %v519_v32 }
 0x41e   :  { %v516_v35 = vpop.xlane.xlu1 %515 }
 0x41f   :  { %708 = vrsqrt.f32 %v523_v34  ;;  %v520_v37 = vmul.f32 0.015625, %v516_v35 }
 0x421   :  { %v524_v38 = vadd.f32 1e-05, %v520_v37 }
 0x423   :  { %710 = vrsqrt.f32 %v524_v38 }
 0x424   :  { %v705_v39 = vpop.eup %704 }
 0x425   :  { %v529_v40 = vmul.f32 %v705_v39, %v497_v9 }
 0x427   :  { %v539_v33 = vmul.f32 %v602_v41, %v529_v40 }
 0x428   :  { %v707_v42 = vpop.eup %706 }
 0x429   :  { %v530_v43 = vmul.f32 %v707_v42, %v498_v13  ;;  %v549_v44 = vadd.f32 %v603_v36, %v539_v33 }
 0x42b   :  { %v540_v45 = vmul.f32 %v602_v41, %v530_v43  ;;  %553 = vst.msk [vmem:[#allocation2] sm:$0xff] %vm40_vm0, %v549_v44 }
 0x42c   :  { %v709_v46 = vpop.eup %708 }
 0x42d   :  { %v531_v47 = vmul.f32 %v709_v46, %v499_v17  ;;  %v550_v49 = vadd.f32 %v603_v36, %v540_v45 }
 0x42f   :  { %v541_v50 = vmul.f32 %v602_v41, %v531_v47  ;;  %554 = vst.msk [vmem:[#allocation2 + $0x8] sm:$0xff] %vm40_vm0, %v550_v49 }
 0x430   :  { %v711_v51 = vpop.eup %710 }
 0x431   :  { %v532_v48 = vmul.f32 %v711_v51, %v500_v21  ;;  %v551_v52 = vadd.f32 %v603_v36, %v541_v50 }
 0x433   :  { %v542_v53 = vmul.f32 %v602_v41, %v532_v48  ;;  %555 = vst.msk [vmem:[#allocation2 + $0x10] sm:$0xff] %vm40_vm0, %v551_v52 }
 0x435   :  { %v552_v54 = vadd.f32 %v603_v36, %v542_v53 }
 0x437   :  { %556 = vst.msk [vmem:[#allocation2 + $0x18] sm:$0xff] %vm40_vm0, %v552_v54 }
 0x438   :  { %723 = shalt.err (!%p720_p4)
}
 0x439   :  { %s736_s24 = smov 128   ;;  %s737_s25 = smov 8  }
 0x43a   :  { %568 = dma.vmem_to_hbm [thread:$0]  %s563_s23, 512, %s961_s9, [#allocation3], %s736_s24, %s736_s24, %s737_s25  }
 0x43b   :  { %732 = dma.done.wait [#allocation3], 512  }
 0x43c   :  { %733 = vsyncadd [#allocation3], 4294966784 }
 0x43d   :  { %572 = vsyncpa [#allocation3], 1 }

// kernel: conformer_block_forward.8
= control target key start
LH: loop header
LB: loop body
LE: loop exit
PB: predicated region body
PF: predicated region fallthrough
CT: control target
= control target key end

     0   :  { %s1064_s17 = smov 0   ;;  %s1187_s0 = inlined_call_operand.vmem [shape: f32[2,16,64], index: 0, kind: input, shape index: {}]   ;;  %s1188_s1 = inlined_call_operand.vmem [shape: f32[1,64], index: 1, kind: input, shape index: {}]   ;;  %s1189_s2 = inlined_call_operand.vmem [shape: f32[1,64], index: 2, kind: input, shape index: {}]   ;;  %s1190_s3 = inlined_call_operand.vmem [shape: bf16[64,64], index: 3, kind: input, shape index: {}]   ;;  %s1191_s4 = inlined_call_operand.vmem [shape: f32[1,64], index: 4, kind: input, shape index: {}]   ;;  %s1192_s5 = inlined_call_operand.vmem [shape: bf16[64,64], index: 5, kind: input, shape index: {}]   ;;  %s1193_s6 = inlined_call_operand.vmem [shape: f32[1,64], index: 6, kind: input, shape index: {}]   ;;  %s1194_s7 = inlined_call_operand.vmem [shape: f32[7,64], index: 7, kind: input, shape index: {}]   ;;  %s1195_s8 = inlined_call_operand.vmem [shape: f32[1,64], index: 8, kind: input, shape index: {}]   ;;  %s1196_s9 = inlined_call_operand.vmem [shape: bf16[64,64], index: 9, kind: input, shape index: {}]   ;;  %s1197_s10 = inlined_call_operand.vmem [shape: f32[1,64], index: 10, kind: input, shape index: {}]   ;;  %s1198_s11 = inlined_call_operand.vmem [shape: f32[2,16,64], index: 11, kind: output, shape index: {}]  }
   0x1 LB: > { %s860_s18 = sadd.s32 4294967295, %s1000_s17   ;;  %p864_p0 = scmp.ge.s32.totalorder %s1000_s17, 1  ;;  %s1000_s17 = sphi %s1064_s17, %s21_s17  }
   0x2   : > { %p337_p1 = scmp.lt.s32.totalorder %s1000_s17, 3 }
   0x4   : > { %p338_p2 = pnand %p864_p0, %p337_p1 }
   0x5   : > { %p377_p3 = scmp.lt.s32.totalorder (!%p338_p2), %s860_s18, 1 }
   0x6   : > { %341 = sbr.rel (%p338_p2) target bundleno = 829 (0x33d), region = 64 }
   0xb   : > { %s1200_s18 = smov (!%p377_p3, %s860_s18), 1  ;;  %vm392_vm0 = vcmask 523264   ;;  %v962_v14 = vld [vmem:[%s1190_s3 + $0x18] sm:$0xff]   ;;  %v1002_v16 = vmov 0.0   ;;  %v964_v17 = vld [vmem:[%s1190_s3 + $0x10] sm:$0xff]   ;;  %vm1003_vm1 = vmmov 0  }
   0xc   : > { %s899_s19 = sshll.u32 %s1200_s18, 4  ;;  %v963_v15 = vld [vmem:[%s1192_s5 + $0x18] sm:$0xff]   ;;  %916 = vmatprep.subr.bf16.mxu0 %v1002_v16  ;;  %928 = vmatprep.subr.bf16.mxu1 %v1002_v16  ;;  %v965_v18 = vld [vmem:[%s1192_s5 + $0x10] sm:$0xff]   ;;  %v966_v19 = vld [vmem:[%s1190_s3 + $0x8] sm:$0xff]   ;;  %vm612_vm2 = vcmask 518144  }
   0xd   : > { %s381_s22 = scalar_lea.vmem %s1187_s0, %s899_s19  ;;  %917 = vmatpush3.bf16.msra.mxu0 %v962_v14  ;;  %929 = vmatpush3.bf16.msra.mxu1 %v963_v15  ;;  %v967_v20 = vld [vmem:[%s1192_s5 + $0x8] sm:$0xff]   ;;  %v968_v21 = vld [vmem:[%s1190_s3] sm:$0xff]   ;;  %613 = vst.msk [vmem:[#allocation2] sm:$0x7] %vm612_vm2, %v1002_v16  ;;  %614 = vst.msk [vmem:[#allocation2 + $0x13] sm:$0x7] %vm612_vm2, %v1002_v16  ;;  %s386_s27 = scalar_lea.vmem %s1198_s11, %s899_s19 }
   0xe   : > { %v1080_v0 = vld [vmem:[%s381_s22] sm:$0xff]  ;;  %v1082_v1 = vld [vmem:[%s381_s22 + $0x8] sm:$0xff]  ;;  %918 = vmatprep.subr.bf16.mxu0 %v1002_v16  ;;  %930 = vmatprep.subr.bf16.mxu1 %v1002_v16  ;;  %v970_v40 = vld [vmem:[%s1196_s9 + $0x18] sm:$0xff]  }
   0xf   : > { %v393_v2 = vsel %vm392_vm0, %v1080_v0, 0.0  ;;  %v396_v3 = vsel %vm392_vm0, %v1082_v1, 0.0  ;;  %924 = vmatprep.mubr.msk.bf16.mxu0 %vm1003_vm1, %v1002_v16  ;;  %936 = vmatprep.mubr.msk.bf16.mxu1 %vm1003_vm1, %v1002_v16  ;;  %v969_v22 = vld [vmem:[%s1192_s5] sm:$0xff]   ;;  %v971_v41 = vld [vmem:[%s1196_s9 + $0x10] sm:$0xff]   ;;  %v972_v42 = vld [vmem:[%s1196_s9 + $0x8] sm:$0xff]  }
  0x10   : > { %394 = vadd.xlane.f32.xlu0 %v393_v2  ;;  %v869_v31 = vld [vmem:[%s1188_s1] ss:$0 sm:$0xff] }
  0x11   : > { %919 = vmatpush3.bf16.msra.mxu0 %v964_v17  ;;  %931 = vmatpush3.bf16.msra.mxu1 %v965_v18  ;;  %v870_v35 = vld [vmem:[%s1189_s2] ss:$0 sm:$0xff]  ;;  %v886_v17 = vld [vmem:[%s1194_s7 + $0x3] ss:$0 sm:$0xff] }
  0x12   : > { %920 = vmatprep.subr.bf16.mxu0 %v1002_v16  ;;  %932 = vmatprep.subr.bf16.mxu1 %v1002_v16  ;;  %v973_v43 = vld [vmem:[%s1196_s9] sm:$0xff]  }
  0x13   : > { %v877_v44 = vld [vmem:[%s1193_s6] ss:$0 sm:$0xff] }
  0x14   : > { %397 = vadd.xlane.f32.xlu0 %v396_v3  ;;  %v871_v63 = vld [vmem:[%s1191_s4] ss:$0 sm:$0xff] }
  0x15   : > { %921 = vmatpush3.bf16.msra.mxu0 %v966_v19  ;;  %933 = vmatpush3.bf16.msra.mxu1 %v967_v20  ;;  %v887_v20 = vld [vmem:[%s1194_s7 + $0x4] ss:$0 sm:$0xff] }
  0x16   : > { %922 = vmatprep.subr.bf16.mxu0 %v1002_v16  ;;  %934 = vmatprep.subr.bf16.mxu1 %v1002_v16 }
  0x19   : > { %923 = vmatpush3.bf16.msra.mxu0 %v968_v21  ;;  %935 = vmatpush3.bf16.msra.mxu1 %v969_v22 }
  0x1a   : > { %940 = vmatprep.subr.bf16.mxu0 %v1002_v16 }
  0x99   : > { %v395_v4 = vpop.xlane.xlu0 %394 }
  0x9a   : > { %v400_v5 = vmul.f32 0.015625, %v395_v4 }
  0x9c   : > { %v402_v6 = vsub.f32 %v1080_v0, %v400_v5 }
  0x9d   : > { %v398_v7 = vpop.xlane.xlu0 %397 }
  0x9e   : > { %v401_v8 = vmul.f32 0.015625, %v398_v7  ;;  %v404_v9 = vmul.f32 %v402_v6, %v402_v6 }
  0xa0   : > { %v403_v10 = vsub.f32 %v1082_v1, %v401_v8  ;;  %v406_v11 = vsel %vm392_vm0, %v404_v9, 0.0  ;;  %v883_v8 = vld [vmem:[%s1194_s7] ss:$0 sm:$0xff]  ;;  %v884_v9 = vld [vmem:[%s1194_s7 + $0x1] ss:$0 sm:$0xff] }
  0xa1   : > { %407 = vadd.xlane.f32.xlu1 %v406_v11 }
  0xa2   : > { %v405_v12 = vmul.f32 %v403_v10, %v403_v10 }
  0xa4   : > { %v409_v13 = vsel %vm392_vm0, %v405_v12, 0.0 }
  0xa5   : > { %410 = vadd.xlane.f32.xlu1 %v409_v13 }
 0x12a   : > { %v408_v23 = vpop.xlane.xlu1 %407 }
 0x12b   : > { %v412_v24 = vmul.f32 0.015625, %v408_v23 }
 0x12d   : > { %v414_v25 = vadd.f32 1e-05, %v412_v24 }
 0x12e   : > { %v411_v26 = vpop.xlane.xlu1 %410 }
 0x12f   : > { %974 = vrsqrt.f32 %v414_v25  ;;  %v413_v27 = vmul.f32 0.015625, %v411_v26 }
 0x131   : > { %v415_v28 = vadd.f32 1e-05, %v413_v27 }
 0x133   : > { %976 = vrsqrt.f32 %v415_v28 }
 0x13c   : > { %v975_v29 = vpop.eup %974 }
 0x13d   : > { %v418_v30 = vmul.f32 %v975_v29, %v402_v6 }
 0x13f   : > { %v426_v34 = vmul.f32 %v869_v31, %v418_v30 }
 0x140   : > { %v977_v32 = vpop.eup %976 }
 0x141   : > { %v419_v33 = vmul.f32 %v977_v32, %v403_v10  ;;  %v434_v37 = vadd.f32 %v870_v35, %v426_v34  ;;  %v885_v10 = vld [vmem:[%s1194_s7 + $0x2] ss:$0 sm:$0xff] }
 0x143   : > { %v427_v36 = vmul.f32 %v869_v31, %v419_v33  ;;  %v888_v31 = vld [vmem:[%s1194_s7 + $0x5] ss:$0 sm:$0xff] }
 0x145   : > { %v435_v38 = vadd.f32 %v870_v35, %v427_v36 }
 0x147   : > { %v436_v39 = vpack.c.bf16 %v435_v38, %v434_v37  ;;  %v889_v38 = vld [vmem:[%s1194_s7 + $0x6] ss:$0 sm:$0xff] }
 0x149   : > { %925 = vmatmul.mubr.msk.bf16.vlgmr.msra.gmra.mxu0 %vm392_vm0, %v436_v39  ;;  %937 = vmatmul.mubr.msk.bf16.vlgmr.msra.gmra.mxu1 %vm392_vm0, %v436_v39 }
 0x14a   : > { %948 = vmatprep.mubr.msk.bf16.mxu0 %vm1003_vm1, %v1002_v16  ;;  %941 = vmatpush3.bf16.msra.mxu0 %v970_v40 }
 0x14b   : > { %942 = vmatprep.subr.bf16.mxu0 %v1002_v16 }
 0x14e   : > { %943 = vmatpush3.bf16.msra.mxu0 %v971_v41 }
 0x14f   : > { %944 = vmatprep.subr.bf16.mxu0 %v1002_v16 }
 0x152   : > { %945 = vmatpush3.bf16.msra.mxu0 %v972_v42 }
 0x153   : > { %946 = vmatprep.subr.bf16.mxu0 %v1002_v16 }
 0x156   : > { %947 = vmatpush3.bf16.msra.mxu0 %v973_v43 }
 0x209   : > { %v513_v45 = vpop.f32.mrf.mxu0  ;;  %v593_v46 = vpop.f32.mrf.mxu1 }
 0x20a   : > { %v594_v47 = vadd.f32 %v877_v44, %v593_v46  ;;  %v514_v2 = vadd.f32 %v871_v63, %v513_v45 }
 0x20b   : > { %v926_v48 = vpop.f32.mrf.mxu0  ;;  %v938_v49 = vpop.f32.mrf.mxu1 }
 0x20c   : > { %v600_v50 = vsub.f32 0.0, %v594_v47  ;;  %v890_v49 = vld [vmem:[%s1195_s8] ss:$0 sm:$0xff] }
 0x20d   : > { %v516_v51 = vpop.f32.mrf.mxu0  ;;  %v596_v52 = vpop.f32.mrf.mxu1 }
 0x20e   : > { %v602_v53 = vmul.f32 1.442695, %v600_v50  ;;  %v597_v54 = vadd.f32 %v877_v44, %v596_v52  ;;  %v517_v5 = vadd.f32 %v871_v63, %v516_v51 }
 0x20f   : > { %v927_v55 = vpop.f32.mrf.mxu0  ;;  %v939_v56 = vpop.f32.mrf.mxu1 }
 0x210   : > { %978 = vpow2.f32 %v602_v53  ;;  %v601_v57 = vsub.f32 0.0, %v597_v54 }
 0x212   : > { %v604_v58 = vmul.f32 1.442695, %v601_v57 }
 0x214   : > { %980 = vpow2.f32 %v604_v58 }
 0x21d   : > { %v979_v59 = vpop.eup %978 }
 0x21e   : > { %v606_v60 = vadd.f32 1.0, %v979_v59 }
 0x220   : > { %982 = vrcp.f32 %v606_v60 }
 0x221   : > { %v981_v61 = vpop.eup %980 }
 0x222   : > { %v607_v62 = vadd.f32 1.0, %v981_v61 }
 0x224   : > { %984 = vrcp.f32 %v607_v62 }
 0x22d   : > { %v983_v3 = vpop.eup %982 }
 0x22e   : > { %v610_v4 = vmul.f32 %v983_v3, %v514_v2 }
 0x230   : > { %615 = vst.msk [vmem:[#allocation2 + $0x3] sm:$0xff] %vm392_vm0, %v610_v4 }
 0x231   : > { %v985_v6 = vpop.eup %984 }
 0x232   : > { %v611_v7 = vmul.f32 %v985_v6, %v517_v5 }
 0x234   : > { %616 = vst.msk [vmem:[#allocation2 + $0xb] sm:$0xff] %vm392_vm0, %v611_v7 }
 0x237   : > { %v617_v11 = vld [vmem:[#allocation2] sm:$0xff] }
 0x238   : > { %v628_v12 = vld [vmem:[#allocation2 + $0x1] sm:$0xff]  ;;  %v624_v14 = vmul.f32 %v883_v8, %v617_v11 }
 0x239   : > { %v639_v13 = vld [vmem:[#allocation2 + $0x2] sm:$0xff]  ;;  %v635_v15 = vmul.f32 %v884_v9, %v628_v12 }
 0x23a   : > { %v650_v16 = vld [vmem:[#allocation2 + $0x3] sm:$0xff]  ;;  %v646_v19 = vmul.f32 %v885_v10, %v639_v13 }
 0x23b   : > { %v637_v18 = vadd.f32 %v635_v15, %v624_v14  ;;  %v618_v21 = vld [vmem:[#allocation2 + $0x8] sm:$0xff]  ;;  %v657_v27 = vmul.f32 %v886_v17, %v650_v16 }
 0x23c   : > { %v629_v22 = vld [vmem:[#allocation2 + $0x9] sm:$0xff]  ;;  %v625_v24 = vmul.f32 %v883_v8, %v618_v21 }
 0x23d   : > { %v640_v23 = vld [vmem:[#allocation2 + $0xa] sm:$0xff]  ;;  %v636_v25 = vmul.f32 %v884_v9, %v629_v22  ;;  %v648_v26 = vadd.f32 %v646_v19, %v637_v18 }
 0x23e   : > { %v661_v28 = vld [vmem:[#allocation2 + $0x4] sm:$0xff]  ;;  %v647_v33 = vmul.f32 %v885_v10, %v640_v23  ;;  %v662_v36 = vld [vmem:[#allocation2 + $0xc] sm:$0xff]  ;;  %v896_v10 = vld [vmem:[%s1197_s10] ss:$0 sm:$0xff] }
 0x23f   : > { %v651_v29 = vld [vmem:[#allocation2 + $0xb] sm:$0xff]  ;;  %v638_v32 = vadd.f32 %v636_v25, %v625_v24  ;;  %v659_v34 = vadd.f32 %v657_v27, %v648_v26  ;;  %v668_v35 = vmul.f32 %v887_v20, %v661_v28  ;;  %v669_v45 = vmul.f32 %v887_v20, %v662_v36 }
 0x240   : > { %v672_v30 = vld [vmem:[#allocation2 + $0x5] sm:$0xff]  ;;  %v658_v40 = vmul.f32 %v886_v17, %v651_v29  ;;  %v673_v43 = vld [vmem:[#allocation2 + $0xd] sm:$0xff] }
 0x241   : > { %v683_v37 = vld [vmem:[#allocation2 + $0x6] sm:$0xff]  ;;  %v649_v39 = vadd.f32 %v647_v33, %v638_v32  ;;  %v670_v41 = vadd.f32 %v668_v35, %v659_v34  ;;  %v679_v42 = vmul.f32 %v888_v31, %v672_v30  ;;  %v684_v48 = vld [vmem:[#allocation2 + $0xe] sm:$0xff]  ;;  %v680_v51 = vmul.f32 %v888_v31, %v673_v43 }
 0x242   : > { %v690_v47 = vmul.f32 %v889_v38, %v683_v37  ;;  %v691_v54 = vmul.f32 %v889_v38, %v684_v48 }
 0x243   : > { %v660_v44 = vadd.f32 %v658_v40, %v649_v39  ;;  %v681_v46 = vadd.f32 %v679_v42, %v670_v41 }
 0x245   : > { %v671_v50 = vadd.f32 %v669_v45, %v660_v44  ;;  %v692_v52 = vadd.f32 %v690_v47, %v681_v46 }
 0x247   : > { %v682_v53 = vadd.f32 %v680_v51, %v671_v50  ;;  %v701_v55 = vadd.f32 %v890_v49, %v692_v52 }
 0x249   : > { %v693_v56 = vadd.f32 %v691_v54, %v682_v53  ;;  %v703_v57 = vsub.f32 0.0, %v701_v55 }
 0x24b   : > { %v702_v58 = vadd.f32 %v890_v49, %v693_v56  ;;  %v705_v59 = vmul.f32 1.442695, %v703_v57 }
 0x24d   : > { %v704_v60 = vsub.f32 0.0, %v702_v58  ;;  %986 = vpow2.f32 %v705_v59 }
 0x24f   : > { %v707_v61 = vmul.f32 1.442695, %v704_v60 }
 0x251   : > { %988 = vpow2.f32 %v707_v61 }
 0x25a   : > { %v987_v62 = vpop.eup %986 }
 0x25b   : > { %v709_v63 = vadd.f32 1.0, %v987_v62 }
 0x25d   : > { %990 = vrcp.f32 %v709_v63 }
 0x25e   : > { %v989_v2 = vpop.eup %988 }
 0x25f   : > { %v710_v3 = vadd.f32 1.0, %v989_v2 }
 0x261   : > { %992 = vrcp.f32 %v710_v3 }
 0x26a   : > { %v991_v4 = vpop.eup %990 }
 0x26b   : > { %v713_v6 = vmul.f32 %v991_v4, %v701_v55 }
 0x26e   : > { %v993_v5 = vpop.eup %992 }
 0x26f   : > { %v714_v7 = vmul.f32 %v993_v5, %v702_v58 }
 0x271   : > { %v715_v8 = vpack.c.bf16 %v714_v7, %v713_v6 }
 0x273   : > { %949 = vmatmul.mubr.msk.bf16.vlgmr.msra.gmra.mxu0 %vm392_vm0, %v715_v8 }
 0x333   : > { %v785_v9 = vpop.f32.mrf.mxu0 }
 0x334   : > { %v792_v11 = vadd.f32 %v785_v9, %v1080_v0 }
 0x335   : > { %v950_v12 = vpop.f32.mrf.mxu0 }
 0x336   : > { %v801_v13 = vadd.f32 %v896_v10, %v792_v11 }
 0x337   : > { %v788_v14 = vpop.f32.mrf.mxu0 }
 0x338   : > { %803 = vst.msk [vmem:[%s386_s27] sm:$0xff] %vm392_vm0, %v801_v13  ;;  %v793_v15 = vadd.f32 %v788_v14, %v1082_v1 }
 0x339   : > { %v951_v16 = vpop.f32.mrf.mxu0 }
 0x33a   : > { %v802_v17 = vadd.f32 %v896_v10, %v793_v15 }
 0x33c   : > { %804 = vst.msk [vmem:[%s386_s27 + $0x8] sm:$0xff] %vm392_vm0, %v802_v17 }
 0x33d PF: > { %s21_s17 = sadd.s32 1, %s1000_s17  }
 0x33e   : > { %p18_p4 = scmp.ge.s32.totalorder %s21_s17, 4  }
 0x340   :  { %20 = sbr.rel (!%p18_p4) target bundleno = 1 (0x1), region = 94 }

// kernel: conformer_block_forward.7
= control target key start
LH: loop header
LB: loop body
LE: loop exit
PB: predicated region body
PF: predicated region fallthrough
CT: control target
= control target key end

     0   :  { %s1512_s27 = smov 0   ;;  %s1686_s0 = inlined_call_operand.vmem [shape: bf16[2,16,64], index: 0, kind: input, shape index: {}]   ;;  %s1687_s1 = inlined_call_operand.vmem [shape: bf16[2,16,64], index: 1, kind: input, shape index: {}]   ;;  %s1688_s2 = inlined_call_operand.vmem [shape: bf16[2,16,64], index: 2, kind: input, shape index: {}]   ;;  %s1689_s3 = inlined_call_operand.vmem [shape: f32[2,4,16,16], index: 3, kind: input, shape index: {}]   ;;  %s1690_s4 = inlined_call_operand.vmem [shape: bf16[1,64], index: 4, kind: input, shape index: {}]   ;;  %s1691_s5 = inlined_call_operand.vmem [shape: f32[2,16,64], index: 5, kind: input, shape index: {}]   ;;  %s1692_s6 = inlined_call_operand.vmem [shape: bf16[64,64], index: 6, kind: input, shape index: {}]   ;;  %s1693_s7 = inlined_call_operand.vmem [shape: f32[1,64], index: 7, kind: input, shape index: {}]   ;;  %s1694_s8 = inlined_call_operand.vmem [shape: f32[2,16,64], index: 8, kind: output, shape index: {}]  }
   0x1 LB: > { %s1255_s28 = sadd.s32 4294967295, %s1460_s27   ;;  %p1259_p0 = scmp.ge.s32.totalorder %s1460_s27, 1  ;;  %s1460_s27 = sphi %s1512_s27, %s18_s27  }
   0x2   : > { %p302_p1 = scmp.lt.s32.totalorder %s1460_s27, 3 }
   0x4   : > { %p303_p2 = pnand %p1259_p0, %p302_p1 }
   0x5   : > { %p356_p3 = scmp.lt.s32.totalorder (!%p303_p2), %s1255_s28, 1  ;;  %s1464_s20 = smov (!%p303_p2), 112  }
   0x6   : > { %306 = sbr.rel (%p303_p2) target bundleno = 2711 (0xa97), region = 52  ;;  %s1465_s26 = smov (!%p303_p2), 96  }
   0xb   : > { %v393_v0 = vld [vmem:[%s1690_s4] sm:$0x1]  ;;  %v397_v1 = vlaneseq  ;;  %v1462_v2 = vmov 0.0   ;;  %vm1463_vm0 = vmmov 0   ;;  %s1696_s28 = smov (!%p356_p3, %s1255_s28), 1  ;;  %vm419_vm1 = vcmask 130048  }
   0xc   : > { %1331 = vmatprep.subr.bf16.mxu0 %v1462_v2  ;;  %1333 = vmatprep.mubr.msk.bf16.mxu0 %vm1463_vm0, %v1462_v2  ;;  %v395_v3 = vpack.i.b16 %v393_v0, %v393_v0  ;;  %s1532_s9 = sshll.u32 %s1696_s28, 3  ;;  %s1304_s16 = sshll.u32 %s1696_s28, 6  ;;  %vm1149_vm2 = vcmask 523264  }
   0xd   : > { %v398_v4 = vshrl.u32 %v397_v1, 7  ;;  %1337 = vmatprep.subr.bf16.mxu1 %v1462_v2  ;;  %1339 = vmatprep.mubr.msk.bf16.mxu1 %vm1463_vm0, %v1462_v2  ;;  %s365_s12 = scalar_lea.vmem %s1687_s1, %s1532_s9  ;;  %s360_s15 = scalar_lea.vmem %s1686_s0, %s1532_s9 }
   0xe   : > { %v1542_v6 = vld [vmem:[%s365_s12] sm:$0xff]   ;;  %s1557_s19 = scalar_lea.vmem %s1689_s3, %s1304_s16  ;;  %s370_s23 = scalar_lea.vmem %s1688_s2, %s1532_s9 }
   0xf   : > { %v399_v5 = vsub.s32 0, %v398_v4  ;;  %v387_v8 = vld [vmem:[%s360_s15] sm:$0xf]  ;;  %v388_v9 = vld [vmem:[%s360_s15 + $0x4] sm:$0xf]  ;;  %v424_v10 = vsel %vm419_vm1, %v1542_v6, 0 }
  0x10   : > { %1332 = vmatpush3.bf16.xpose.msra.mxu0 %v424_v10  ;;  %v407_v15 = vld [vmem:[%s1557_s19] sm:$0xff]  ;;  %v408_v19 = vld [vmem:[%s1557_s19 + $0x8] sm:$0xff]  ;;  %v1278_v53 = vld [vmem:[%s1557_s19 + $0x10] sm:$0xff]  ;;  %s1466_s9 = smov 80   ;;  %s1305_s14 = sshll.u32 %s1696_s28, 4 }
  0x11   : > { %v400_v7 = vrot.slane %v395_v3, %v399_v5  ;;  %1349 = vmatprep.subr.bf16.mxu0 %v1462_v2  ;;  %v1571_v37 = vld [vmem:[%s370_s23] sm:$0xff]   ;;  %v1279_v57 = vld [vmem:[%s1557_s19 + $0x18] sm:$0xff]  ;;  %s380_s17 = scalar_lea.vmem %s1691_s5, %s1305_s14  ;;  %s385_s22 = scalar_lea.vmem %s1694_s8, %s1305_s14 }
  0x12   : > { %1338 = vmatpush3.bf16.msra.mxu1 %v1571_v37 }
  0x13   : > { %v1272_v11 = vcombine.low %v400_v7, %v400_v7  ;;  %1343 = vmatprep.subr.bf16.mxu1 %v1462_v2 }
  0x15   : > { %v405_v12 = vadd.bf16 %v1272_v11, %v387_v8  ;;  %v406_v13 = vadd.bf16 %v1272_v11, %v388_v9 }
  0x17   : > { %v1547_v14 = vcombine.low %v405_v12, %v406_v13  ;;  %v1419_v13 = vld [vmem:[%s1692_s6 + $0x8] sm:$0xff]  }
  0x19   : > { %1334 = vmatmul.mubr.msk.bf16.vlgmr.msra.gmra.mxu0 %vm419_vm1, %v1547_v14 }
  0x1a   : > { %1351 = vmatprep.mubr.msk.bf16.mxu0 %vm1463_vm0, %v1462_v2 }
  0xd9   : > { %v460_v16 = vpop.f32.mrf.mxu0 }
  0xda   : > { %v461_v17 = vadd.f32 %v460_v16, %v407_v15 }
  0xdb   : > { %v1335_v18 = vpop.f32.mrf.mxu0 }
  0xdc   : > { %v467_v20 = vmul.f32 0.125, %v461_v17 }
  0xdd   : > { %v463_v21 = vpop.f32.mrf.mxu0 }
  0xde   : > { %v464_v22 = vadd.f32 %v463_v21, %v408_v19  ;;  %v469_v23 = vsel %vm419_vm1, %v467_v20, -inf }
  0xdf   : > { %470 = vmax.xlane.f32.xlu0 %v469_v23  ;;  %v1336_v24 = vpop.f32.mrf.mxu0 }
  0xe0   : > { %v468_v25 = vmul.f32 0.125, %v464_v22  ;;  %v1418_v22 = vld [vmem:[%s1692_s6] sm:$0xff]  }
  0xe2   : > { %v472_v26 = vsel %vm419_vm1, %v468_v25, -inf }
  0xe3   : > { %473 = vmax.xlane.f32.xlu0 %v472_v26 }
  0xf9   : > { %550 = vrot.lane.b32.xlu0 %v1542_v6, %s1464_s20 }
 0x168   : > { %v471_v27 = vpop.xlane.xlu0 %470 }
 0x169   : > { %v475_v28 = vsub.f32 %v467_v20, %v471_v27 }
 0x16b   : > { %v477_v29 = vmul.f32 1.442695, %v475_v28 }
 0x16c   : > { %v474_v30 = vpop.xlane.xlu0 %473 }
 0x16d   : > { %1422 = vpow2.f32 %v477_v29  ;;  %v476_v31 = vsub.f32 %v468_v25, %v474_v30 }
 0x16f   : > { %v479_v32 = vmul.f32 1.442695, %v476_v31 }
 0x170   : > { %v551_v42 = vpop.permute.xlu0 %550 }
 0x171   : > { %1424 = vpow2.f32 %v479_v32  ;;  %v556_v45 = vsel %vm419_vm1, %v551_v42, 0 }
 0x17a   : > { %v1423_v33 = vpop.eup %1422 }
 0x17b   : > { %v481_v34 = vsel %vm419_vm1, %v1423_v33, 0.0 }
 0x17c   : > { %482 = vadd.xlane.f32.xlu1 %v481_v34 }
 0x17e   : > { %v1425_v35 = vpop.eup %1424 }
 0x17f   : > { %v484_v36 = vsel %vm419_vm1, %v1425_v35, 0.0 }
 0x180   : > { %485 = vadd.xlane.f32.xlu1 %v484_v36 }
 0x191   : > { %548 = vrot.lane.b32.xlu1 %v1547_v14, %s1464_s20 }
 0x205   : > { %v483_v38 = vpop.xlane.xlu1 %482 }
 0x206   : > { %1426 = vrcp.f32 %v483_v38 }
 0x209   : > { %v486_v39 = vpop.xlane.xlu1 %485 }
 0x20a   : > { %1428 = vrcp.f32 %v486_v39 }
 0x20d   : > { %v549_v47 = vpop.permute.xlu1 %548 }
 0x213   : > { %v1427_v40 = vpop.eup %1426 }
 0x214   : > { %v489_v43 = vmul.f32 %v1427_v40, %v1423_v33 }
 0x217   : > { %v1429_v41 = vpop.eup %1428 }
 0x218   : > { %v490_v44 = vmul.f32 %v1429_v41, %v1425_v35  ;;  %v1286_v41 = vld [vmem:[%s1557_s19 + $0x20] sm:$0xff] }
 0x21a   : > { %v491_v46 = vpack.c.bf16 %v490_v44, %v489_v43 }
 0x21c   : > { %1340 = vmatmul.mubr.msk.bf16.vlgmr.msra.gmra.mxu1 %vm419_vm1, %v491_v46 }
 0x21d   : > { %1344 = vmatpush3.bf16.xpose.msra.mxu1 %v556_v45  ;;  %1345 = vmatprep.mubr.msk.bf16.mxu1 %vm1463_vm0, %v1462_v2  ;;  %v1287_v45 = vld [vmem:[%s1557_s19 + $0x28] sm:$0xff] }
 0x21e   : > { %1355 = vmatprep.subr.bf16.mxu1 %v1462_v2 }
 0x224   : > { %1346 = vmatmul.mubr.msk.bf16.vlgmr.msra.gmra.mxu1 %vm419_vm1, %v549_v47 }
 0x225   : > { %1357 = vmatprep.mubr.msk.bf16.mxu1 %vm1463_vm0, %v1462_v2  ;;  %1356 = vmatpush3.bf16.msra.mxu1 %v1419_v13 }
 0x226   : > { %1367 = vmatprep.subr.bf16.mxu1 %v1462_v2 }
 0x2dc   : > { %v535_v48 = vpop.f32.mrf.mxu1 }
 0x2de   : > { %v1341_v49 = vpop.f32.mrf.mxu1 }
 0x2e0   : > { %v538_v50 = vpop.f32.mrf.mxu1 }
 0x2e1   : > { %v542_v51 = vpack.c.bf16 %v538_v50, %v535_v48 }
 0x2e2   : > { %v1342_v52 = vpop.f32.mrf.mxu1 }
 0x2e4   : > { %v592_v54 = vpop.f32.mrf.mxu1 }
 0x2e5   : > { %v593_v55 = vadd.f32 %v1278_v53, %v592_v54 }
 0x2e6   : > { %v1347_v56 = vpop.f32.mrf.mxu1 }
 0x2e7   : > { %v599_v58 = vmul.f32 0.125, %v593_v55 }
 0x2e8   : > { %v595_v59 = vpop.f32.mrf.mxu1 }
 0x2e9   : > { %v596_v60 = vadd.f32 %v1279_v57, %v595_v59  ;;  %v601_v61 = vsel %vm419_vm1, %v599_v58, -inf }
 0x2ea   : > { %602 = vmax.xlane.f32.xlu1 %v601_v61  ;;  %v1348_v62 = vpop.f32.mrf.mxu1 }
 0x2eb   : > { %v600_v63 = vmul.f32 0.125, %v596_v60 }
 0x2ed   : > { %v604_v0 = vsel %vm419_vm1, %v600_v63, -inf }
 0x2ee   : > { %605 = vmax.xlane.f32.xlu0 %v604_v0 }
 0x373   : > { %v603_v1 = vpop.xlane.xlu1 %602 }
 0x374   : > { %v607_v3 = vsub.f32 %v599_v58, %v603_v1 }
 0x376   : > { %v609_v4 = vmul.f32 1.442695, %v607_v3 }
 0x377   : > { %v606_v5 = vpop.xlane.xlu0 %605 }
 0x378   : > { %1430 = vpow2.f32 %v609_v4  ;;  %v608_v7 = vsub.f32 %v600_v63, %v606_v5 }
 0x37a   : > { %v611_v8 = vmul.f32 1.442695, %v608_v7 }
 0x37c   : > { %1432 = vpow2.f32 %v611_v8 }
 0x385   : > { %v1431_v9 = vpop.eup %1430 }
 0x386   : > { %v613_v10 = vsel %vm419_vm1, %v1431_v9, 0.0 }
 0x387   : > { %614 = vadd.xlane.f32.xlu0 %v613_v10  ;;  %v1420_v10 = vld [vmem:[%s1692_s6 + $0x10] sm:$0xff]  }
 0x389   : > { %v1433_v11 = vpop.eup %1432 }
 0x38a   : > { %v616_v12 = vsel %vm419_vm1, %v1433_v11, 0.0 }
 0x38b   : > { %617 = vadd.xlane.f32.xlu1 %v616_v12 }
 0x39c   : > { %779 = vrot.lane.b32.xlu1 %v1542_v6, %s1465_s26 }
 0x39d   : > { %624 = vrot.lane.b32.xlu0 %v1571_v37, %s1464_s20 }
 0x3a0   : > { %777 = vrot.lane.b32.xlu1 %v1547_v14, %s1465_s26 }
 0x410   : > { %v615_v15 = vpop.xlane.xlu0 %614 }
 0x411   : > { %1434 = vrcp.f32 %v615_v15 }
 0x414   : > { %v618_v16 = vpop.xlane.xlu1 %617  ;;  %v625_v17 = vpop.permute.xlu0 %624 }
 0x415   : > { %1436 = vrcp.f32 %v618_v16  ;;  %1350 = vmatpush3.bf16.msra.mxu0 %v625_v17  ;;  %v1292_v17 = vld [vmem:[%s1557_s19 + $0x30] sm:$0xff] }
 0x416   : > { %1361 = vmatprep.subr.bf16.mxu0 %v1462_v2 }
 0x418   : > { %v780_v26 = vpop.permute.xlu1 %779 }
 0x419   : > { %v785_v29 = vsel %vm419_vm1, %v780_v26, 0 }
 0x41c   : > { %v778_v34 = vpop.permute.xlu1 %777 }
 0x41e   : > { %v1435_v18 = vpop.eup %1434 }
 0x41f   : > { %v621_v20 = vmul.f32 %v1435_v18, %v1431_v9 }
 0x422   : > { %v1437_v19 = vpop.eup %1436 }
 0x423   : > { %v622_v21 = vmul.f32 %v1437_v19, %v1433_v11 }
 0x425   : > { %v623_v23 = vpack.c.bf16 %v622_v21, %v621_v20  ;;  %v1293_v21 = vld [vmem:[%s1557_s19 + $0x38] sm:$0xff] }
 0x427   : > { %1352 = vmatmul.mubr.msk.bf16.vlgmr.msra.gmra.mxu0 %vm419_vm1, %v623_v23 }
 0x428   : > { %1362 = vmatpush3.bf16.msra.mxu0 %v1418_v22  ;;  %1363 = vmatprep.mubr.msk.bf16.mxu0 %vm1463_vm0, %v1462_v2 }
 0x429   : > { %1373 = vmatprep.subr.bf16.mxu0 %v1462_v2 }
 0x42f   : > { %1364 = vmatmul.mubr.msk.bf16.vlgmr.msra.gmra.mxu0 %vm419_vm1, %v542_v51 }
 0x430   : > { %1375 = vmatprep.mubr.msk.bf16.mxu0 %vm1463_vm0, %v1462_v2 }
 0x4e7   : > { %v664_v24 = vpop.f32.mrf.mxu0 }
 0x4e9   : > { %v1353_v25 = vpop.f32.mrf.mxu0 }
 0x4eb   : > { %v667_v27 = vpop.f32.mrf.mxu0 }
 0x4ec   : > { %v671_v28 = vpack.c.bf16 %v667_v27, %v664_v24 }
 0x4ed   : > { %v1354_v30 = vpop.f32.mrf.mxu0 }
 0x4ee   : > { %1358 = vmatmul.mubr.msk.bf16.vlgmr.msra.gmra.mxu1 %vm419_vm1, %v671_v28 }
 0x4ef   : > { %1368 = vmatpush3.bf16.xpose.msra.mxu1 %v785_v29  ;;  %v1614_v31 = vpop.f32.mrf.mxu0  ;;  %1369 = vmatprep.mubr.msk.bf16.mxu1 %vm1463_vm0, %v1462_v2 }
 0x4f0   : > { %1379 = vmatprep.subr.bf16.mxu1 %v1462_v2 }
 0x4f1   : > { %v1365_v32 = vpop.f32.mrf.mxu0 }
 0x4f3   : > { %v1619_v33 = vpop.f32.mrf.mxu0 }
 0x4f5   : > { %v1366_v35 = vpop.f32.mrf.mxu0 }
 0x4f6   : > { %1370 = vmatmul.mubr.msk.bf16.vlgmr.msra.gmra.mxu1 %vm419_vm1, %v778_v34 }
 0x4f7   : > { %1381 = vmatprep.mubr.msk.bf16.mxu1 %vm1463_vm0, %v1462_v2  ;;  %1380 = vmatpush3.bf16.msra.mxu1 %v1420_v10 }
 0x4f8   : > { %1391 = vmatprep.subr.bf16.mxu1 %v1462_v2 }
 0x5ae   : > { %v1624_v36 = vpop.f32.mrf.mxu1 }
 0x5b0   : > { %v1359_v38 = vpop.f32.mrf.mxu1 }
 0x5b2   : > { %v1626_v39 = vpop.f32.mrf.mxu1 }
 0x5b4   : > { %v1360_v40 = vpop.f32.mrf.mxu1 }
 0x5b6   : > { %v821_v42 = vpop.f32.mrf.mxu1 }
 0x5b7   : > { %v822_v43 = vadd.f32 %v1286_v41, %v821_v42 }
 0x5b8   : > { %v1371_v44 = vpop.f32.mrf.mxu1 }
 0x5b9   : > { %v828_v46 = vmul.f32 0.125, %v822_v43  ;;  %v768_v43 = vadd.f32 %v1614_v31, %v1624_v36 }
 0x5ba   : > { %v824_v47 = vpop.f32.mrf.mxu1 }
 0x5bb   : > { %v825_v48 = vadd.f32 %v1287_v45, %v824_v47  ;;  %v830_v49 = vsel %vm419_vm1, %v828_v46, -inf  ;;  %v771_v47 = vadd.f32 %v1619_v33, %v1626_v39 }
 0x5bc   : > { %831 = vmax.xlane.f32.xlu1 %v830_v49  ;;  %v1372_v50 = vpop.f32.mrf.mxu1  ;;  %v1421_v49 = vld [vmem:[%s1692_s6 + $0x18] sm:$0xff]  }
 0x5bd   : > { %v829_v51 = vmul.f32 0.125, %v825_v48 }
 0x5bf   : > { %v833_v52 = vsel %vm419_vm1, %v829_v51, -inf }
 0x5c0   : > { %834 = vmax.xlane.f32.xlu0 %v833_v52 }
 0x5cd   : > { %853 = vrot.lane.b32.xlu1 %v1571_v37, %s1465_s26 }
 0x5d1   : > { %958 = vrot.lane.b32.xlu1 %v1547_v14, %s1466_s9 }
 0x645   : > { %v832_v53 = vpop.xlane.xlu1 %831 }
 0x646   : > { %v836_v54 = vsub.f32 %v828_v46, %v832_v53 }
 0x648   : > { %v838_v55 = vmul.f32 1.442695, %v836_v54 }
 0x649   : > { %v835_v56 = vpop.xlane.xlu0 %834  ;;  %v854_v63 = vpop.permute.xlu1 %853 }
 0x64a   : > { %1438 = vpow2.f32 %v838_v55  ;;  %v837_v57 = vsub.f32 %v829_v51, %v835_v56  ;;  %1374 = vmatpush3.bf16.msra.mxu0 %v854_v63  ;;  %v1298_v63 = vld [vmem:[%s1693_s7] ss:$0 sm:$0xff] }
 0x64b   : > { %1385 = vmatprep.subr.bf16.mxu0 %v1462_v2 }
 0x64c   : > { %v840_v58 = vmul.f32 1.442695, %v837_v57 }
 0x64e   : > { %1440 = vpow2.f32 %v840_v58 }
 0x657   : > { %v1439_v59 = vpop.eup %1438 }
 0x658   : > { %v842_v60 = vsel %vm419_vm1, %v1439_v59, 0.0 }
 0x659   : > { %843 = vadd.xlane.f32.xlu0 %v842_v60 }
 0x65b   : > { %v1441_v61 = vpop.eup %1440 }
 0x65c   : > { %v845_v62 = vsel %vm419_vm1, %v1441_v61, 0.0 }
 0x65d   : > { %846 = vadd.xlane.f32.xlu0 %v845_v62 }
 0x673   : > { %960 = vrot.lane.b32.xlu0 %v1542_v6, %s1466_s9  ;;  %v959_v6 = vpop.permute.xlu1 %958 }
 0x6e2   : > { %v844_v14 = vpop.xlane.xlu0 %843 }
 0x6e3   : > { %1442 = vrcp.f32 %v844_v14 }
 0x6e6   : > { %v847_v0 = vpop.xlane.xlu0 %846 }
 0x6e7   : > { %1444 = vrcp.f32 %v847_v0 }
 0x6ea   : > { %v961_v4 = vpop.permute.xlu0 %960 }
 0x6eb   : > { %v966_v8 = vsel %vm419_vm1, %v961_v4, 0 }
 0x6f0   : > { %v1443_v1 = vpop.eup %1442 }
 0x6f1   : > { %v850_v5 = vmul.f32 %v1443_v1, %v1439_v59 }
 0x6f4   : > { %v1445_v3 = vpop.eup %1444 }
 0x6f5   : > { %v851_v7 = vmul.f32 %v1445_v3, %v1441_v61  ;;  %v1136_v61 = vld [vmem:[%s380_s17] sm:$0xff]  ;;  %v1137_v3 = vld [vmem:[%s380_s17 + $0x8] sm:$0xff] }
 0x6f7   : > { %v852_v9 = vpack.c.bf16 %v851_v7, %v850_v5 }
 0x6f9   : > { %1376 = vmatmul.mubr.msk.bf16.vlgmr.msra.gmra.mxu0 %vm419_vm1, %v852_v9 }
 0x6fa   : > { %1386 = vmatpush3.bf16.xpose.msra.mxu0 %v966_v8  ;;  %1387 = vmatprep.mubr.msk.bf16.mxu0 %vm1463_vm0, %v1462_v2 }
 0x6fb   : > { %1397 = vmatprep.subr.bf16.mxu0 %v1462_v2 }
 0x701   : > { %1388 = vmatmul.mubr.msk.bf16.vlgmr.msra.gmra.mxu0 %vm419_vm1, %v959_v6 }
 0x702   : > { %1399 = vmatprep.mubr.msk.bf16.mxu0 %vm1463_vm0, %v1462_v2  ;;  %1398 = vmatpush3.bf16.msra.mxu0 %v1421_v49 }
 0x7b9   : > { %v893_v11 = vpop.f32.mrf.mxu0 }
 0x7bb   : > { %v1377_v12 = vpop.f32.mrf.mxu0 }
 0x7bd   : > { %v896_v13 = vpop.f32.mrf.mxu0 }
 0x7be   : > { %v900_v15 = vpack.c.bf16 %v896_v13, %v893_v11 }
 0x7bf   : > { %v1378_v16 = vpop.f32.mrf.mxu0 }
 0x7c0   : > { %1382 = vmatmul.mubr.msk.bf16.vlgmr.msra.gmra.mxu1 %vm419_vm1, %v900_v15 }
 0x7c1   : > { %v1002_v18 = vpop.f32.mrf.mxu0  ;;  %1393 = vmatprep.mubr.msk.bf16.mxu1 %vm1463_vm0, %v1462_v2 }
 0x7c2   : > { %v1003_v19 = vadd.f32 %v1292_v17, %v1002_v18 }
 0x7c3   : > { %v1389_v20 = vpop.f32.mrf.mxu0 }
 0x7c4   : > { %v1009_v22 = vmul.f32 0.125, %v1003_v19 }
 0x7c5   : > { %v1005_v23 = vpop.f32.mrf.mxu0 }
 0x7c6   : > { %v1006_v24 = vadd.f32 %v1293_v21, %v1005_v23  ;;  %v1011_v25 = vsel %vm419_vm1, %v1009_v22, -inf }
 0x7c7   : > { %1012 = vmax.xlane.f32.xlu1 %v1011_v25  ;;  %v1390_v26 = vpop.f32.mrf.mxu0 }
 0x7c8   : > { %v1010_v27 = vmul.f32 0.125, %v1006_v24 }
 0x7ca   : > { %v1014_v28 = vsel %vm419_vm1, %v1010_v27, -inf }
 0x7cb   : > { %1015 = vmax.xlane.f32.xlu0 %v1014_v28 }
 0x850   : > { %v1013_v29 = vpop.xlane.xlu1 %1012 }
 0x851   : > { %v1017_v30 = vsub.f32 %v1009_v22, %v1013_v29 }
 0x853   : > { %v1019_v32 = vmul.f32 1.442695, %v1017_v30 }
 0x854   : > { %v1016_v34 = vpop.xlane.xlu0 %1015 }
 0x855   : > { %1446 = vpow2.f32 %v1019_v32  ;;  %v1018_v2 = vsub.f32 %v1010_v27, %v1016_v34 }
 0x857   : > { %v1021_v35 = vmul.f32 1.442695, %v1018_v2 }
 0x859   : > { %1448 = vpow2.f32 %v1021_v35 }
 0x862   : > { %v1447_v38 = vpop.eup %1446 }
 0x863   : > { %v1023_v40 = vsel %vm419_vm1, %v1447_v38, 0.0 }
 0x864   : > { %1024 = vadd.xlane.f32.xlu0 %v1023_v40 }
 0x866   : > { %v1449_v41 = vpop.eup %1448 }
 0x867   : > { %v1026_v42 = vsel %vm419_vm1, %v1449_v41, 0.0 }
 0x868   : > { %1027 = vadd.xlane.f32.xlu1 %v1026_v42 }
 0x87a   : > { %1034 = vrot.lane.b32.xlu0 %v1571_v37, %s1466_s9 }
 0x880   : > { %v946_v44 = vpop.f32.mrf.mxu1 }
 0x881   : > { %v953_v45 = vadd.f32 %v946_v44, %v768_v43 }
 0x882   : > { %v1383_v46 = vpop.f32.mrf.mxu1 }
 0x884   : > { %v949_v48 = vpop.f32.mrf.mxu1 }
 0x885   : > { %v954_v50 = vadd.f32 %v949_v48, %v771_v47 }
 0x886   : > { %v1384_v51 = vpop.f32.mrf.mxu1 }
 0x8ed   : > { %v1025_v52 = vpop.xlane.xlu0 %1024 }
 0x8ee   : > { %1450 = vrcp.f32 %v1025_v52 }
 0x8f1   : > { %v1028_v37 = vpop.xlane.xlu1 %1027  ;;  %v1035_v53 = vpop.permute.xlu0 %1034 }
 0x8f2   : > { %1452 = vrcp.f32 %v1028_v37  ;;  %1392 = vmatpush3.bf16.msra.mxu1 %v1035_v53 }
 0x8fb   : > { %v1451_v31 = vpop.eup %1450 }
 0x8fc   : > { %v1031_v55 = vmul.f32 %v1451_v31, %v1447_v38 }
 0x8ff   : > { %v1453_v36 = vpop.eup %1452 }
 0x900   : > { %v1032_v54 = vmul.f32 %v1453_v36, %v1449_v41 }
 0x902   : > { %v1033_v33 = vpack.c.bf16 %v1032_v54, %v1031_v55 }
 0x904   : > { %1394 = vmatmul.mubr.msk.bf16.vlgmr.msra.gmra.mxu1 %vm419_vm1, %v1033_v33 }
 0x9c4   : > { %v1074_v39 = vpop.f32.mrf.mxu1 }
 0x9c6   : > { %v1395_v56 = vpop.f32.mrf.mxu1 }
 0x9c8   : > { %v1077_v57 = vpop.f32.mrf.mxu1 }
 0x9c9   : > { %v1081_v58 = vpack.c.bf16 %v1077_v57, %v1074_v39 }
 0x9ca   : > { %v1396_v59 = vpop.f32.mrf.mxu1 }
 0x9cb   : > { %1400 = vmatmul.mubr.msk.bf16.vlgmr.msra.gmra.mxu0 %vm419_vm1, %v1081_v58 }
 0xa8b   : > { %v1127_v60 = vpop.f32.mrf.mxu0 }
 0xa8c   : > { %v1134_v62 = vadd.f32 %v1127_v60, %v953_v45 }
 0xa8d   : > { %v1401_v14 = vpop.f32.mrf.mxu0 }
 0xa8e   : > { %v1138_v0 = vadd.f32 %v1136_v61, %v1134_v62 }
 0xa8f   : > { %v1130_v1 = vpop.f32.mrf.mxu0 }
 0xa90   : > { %v1147_v4 = vadd.f32 %v1298_v63, %v1138_v0  ;;  %v1135_v5 = vadd.f32 %v1130_v1, %v954_v50 }
 0xa91   : > { %v1402_v7 = vpop.f32.mrf.mxu0 }
 0xa92   : > { %1150 = vst.msk [vmem:[%s385_s22] sm:$0xff] %vm1149_vm2, %v1147_v4  ;;  %v1139_v8 = vadd.f32 %v1137_v3, %v1135_v5 }
 0xa94   : > { %v1148_v9 = vadd.f32 %v1298_v63, %v1139_v8 }
 0xa96   : > { %1151 = vst.msk [vmem:[%s385_s22 + $0x8] sm:$0xff] %vm1149_vm2, %v1148_v9 }
 0xa97 PF: > { %s18_s27 = sadd.s32 1, %s1460_s27  }
 0xa98   : > { %p15_p4 = scmp.ge.s32.totalorder %s18_s27, 4  }
 0xa9a   :  { %17 = sbr.rel (!%p15_p4) target bundleno = 1 (0x1), region = 97 }

</bundles_post_ra>
